<compile_context>
chip_gen: v5e
topology: v5e:2x2
jax: 0.10.0
libtpu: 0.0.40
codegen_flags: <defaults>
</compile_context>

<pallas_src>
import functools

import jax
import jax.numpy as jnp
import numpy as np
from jax.experimental import pallas as pl
from jax.experimental.pallas import tpu as pltpu


# --------------------------- hardware-aware knobs -----------------------------
@functools.lru_cache(maxsize=None)
def _vmem_limit_bytes():
    """Scoped-VMEM budget: ~64 MiB on v5e/v6e (128 MiB physical), 32 MiB on v7x."""
    try:
        cap = int(pltpu.get_tpu_info().vmem_capacity_bytes)
    except Exception:                       # conservative, always-safe fallback
        return 32 * 1024 * 1024
    return (64 * 1024 * 1024) if cap >= (100 * 1024 * 1024) else (32 * 1024 * 1024)


def _largest_divisor_leq(n, target):
    for d in range(min(n, target), 0, -1):
        if n % d == 0:
            return d
    return 1


def _pick_strip_h(H, W, cin, cout, want_strips=2, budget_bytes=4 * 1024 * 1024):
    """Strip height: a divisor of H whose per-step f32 compute buffers fit the
    budget; prefer >= `want_strips` strips so the second parallel grid axis can
    feed both v7x TensorCores even at batch 1-2."""
    fits = []
    for sh in range(1, H + 1):
        if H % sh:
            continue
        per_step = 4 * (3 * sh * W * cin          # K=3*Cin tap-group buffer
                        + sh * W * cout           # f32 accumulator
                        + (sh + 2) * W * cin)     # haloed input rows
        if per_step <= budget_bytes:
            fits.append(sh)
    if not fits:
        return 1
    good = [sh for sh in fits if H // sh >= want_strips]
    return max(good) if good else max(fits)


# --------------------- kernel A: strip-tiled conv3x3 + stats ------------------
def _make_conv3x3_kernel(H, W, cin, cout, strip_h, apply_in_bn, ss_chunk):
    """3x3 conv (stride 1, pad 1) over one row strip of one image, with the
    previous layer's folded BN + ReLU optionally fused into the input path, and
    per-strip BN partial statistics (mean + centered sum-of-squares)."""
    K3 = 3 * cin
    inv_cnt = 1.0 / float(strip_h * W)

    def kernel(*refs):
        if apply_in_bn:
            x_ref, w_ref, sc_ref, sh_ref, y_ref, stats_ref = refs
            sc = sc_ref[...].reshape(1, 1, cin)
            sh = sh_ref[...].reshape(1, 1, cin)
        else:
            x_ref, w_ref, y_ref, stats_ref = refs

        mxu_dtype = w_ref.dtype
        s = pl.program_id(1)
        row0 = s * strip_h                      # first output row of this strip

        def prep(rows):
            # Fused bn1 + ReLU on the *input* (conv2 path): removes a full HBM
            # write + read of the relu(bn1(conv1)) intermediate.
            if apply_in_bn:
                rows = rows.astype(jnp.float32) * sc + sh
                rows = jnp.maximum(rows, 0.0)
            return rows.astype(mxu_dtype)

        # Strip rows + 1-row halo (clamped dynamic loads from the resident
        # image).  Zero the out-of-image halo rows AFTER the fused BN so the
        # conv's zero padding applies to the activations (matches PyTorch).
        top = prep(x_ref[0, pl.ds(jnp.maximum(row0 - 1, 0), 1), :, :])
        core = prep(x_ref[0, pl.ds(row0, strip_h), :, :])
        bot = prep(x_ref[0, pl.ds(jnp.minimum(row0 + strip_h, H - 1), 1), :, :])
        top = jnp.where(row0 == 0, jnp.zeros_like(top), top)
        bot = jnp.where(row0 + strip_h == H, jnp.zeros_like(bot), bot)
        xr = jnp.concatenate([top, core, bot], axis=0)    # (strip_h+2, W, Cin)

        # 3 accumulated MXU matmuls (K = 3*Cin), one per kx tap column: no
        # (H+2, W+2) padded image copy and no 9x-wide im2col buffer.
        zc = jnp.zeros((strip_h + 2, 1, cin), xr.dtype)
        acc = jnp.zeros((strip_h * W, cout), jnp.float32)
        for kx in range(3):
            if kx == 0:
                xs = jnp.concatenate([zc, xr[:, :W - 1, :]], axis=1)
            elif kx == 1:
                xs = xr
            else:
                xs = jnp.concatenate([xr[:, 1:, :], zc], axis=1)
            cols = jnp.concatenate([xs[ky:ky + strip_h] for ky in range(3)],
                                   axis=-1)               # (strip_h, W, 3*Cin)
            acc = acc + jnp.dot(cols.reshape(strip_h * W, K3),
                                w_ref[kx * K3:(kx + 1) * K3, :],
                                preferred_element_type=jnp.float32)

        # Store conv output (possibly bf16); per-strip BN partials: mean from
        # the f32 accumulator, centered SS streamed back from the stored tile
        # in small row chunks (no second full strip-sized f32 temporary).
        m = jnp.sum(acc, axis=0, keepdims=True) * inv_cnt            # (1, Cout)
        y_ref[0] = acc.reshape(strip_h, W, cout).astype(y_ref.dtype)

        def ss_body(i, ss):
            blk = y_ref[0, pl.ds(i * ss_chunk, ss_chunk), :, :]
            blk = blk.astype(jnp.float32).reshape(ss_chunk * W, cout) - m
            return ss + jnp.sum(blk * blk, axis=0, keepdims=True)

        ss = jax.lax.fori_loop(0, strip_h // ss_chunk, ss_body,
                               jnp.zeros((1, cout), jnp.float32))
        stats_ref[0, 0] = jnp.concatenate([m, ss], axis=0)

    return kernel


def _conv3x3(x_nhwc, w2d, in_scale=None, in_shift=None,
             compute_dtype=None, out_dtype=jnp.float32):
    """Strip-tiled conv3x3 over a (N, H/strip_h) parallel grid.

    Returns (y [N,H,W,Cout], stats [N,S,2,Cout], pixels_per_tile)."""
    N, H, W, cin = x_nhwc.shape
    cout = w2d.shape[-1]
    cd = compute_dtype if compute_dtype is not None else jnp.float32
    xk = x_nhwc if x_nhwc.dtype == cd else x_nhwc.astype(cd)
    wk = w2d if w2d.dtype == cd else w2d.astype(cd)

    strip_h = _pick_strip_h(H, W, cin, cout)
    n_strips = H // strip_h
    ss_chunk = _largest_divisor_leq(strip_h, 8)
    apply_in_bn = in_scale is not None
    kernel = _make_conv3x3_kernel(H, W, cin, cout, strip_h, apply_in_bn, ss_chunk)

    # Whole image is resident across the strip axis (constant block index ->
    # no re-DMA); the (9*Cin, Cout) weight is resident across the whole grid.
    # On v7x one could add pipeline_mode=pl.Buffered(1) on the weight spec to
    # reclaim its second double-buffer copy; left at the default for portability.
    in_specs = [
        pl.BlockSpec((1, H, W, cin), lambda n, s: (n, 0, 0, 0)),
        pl.BlockSpec((9 * cin, cout), lambda n, s: (0, 0)),
    ]
    args = [xk, wk]
    if apply_in_bn:
        in_specs += [pl.BlockSpec((1, cin), lambda n, s: (0, 0)),
                     pl.BlockSpec((1, cin), lambda n, s: (0, 0))]
        args += [in_scale.reshape(1, cin).astype(jnp.float32),
                 in_shift.reshape(1, cin).astype(jnp.float32)]

    y, stats = pl.pallas_call(
        kernel,
        grid=(N, n_strips),
        in_specs=in_specs,
        out_specs=[
            pl.BlockSpec((1, strip_h, W, cout), lambda n, s: (n, s, 0, 0)),
            pl.BlockSpec((1, 1, 2, cout), lambda n, s: (n, s, 0, 0)),
        ],
        out_shape=[
            jax.ShapeDtypeStruct((N, H, W, cout), out_dtype),
            jax.ShapeDtypeStruct((N, n_strips, 2, cout), jnp.float32),
        ],
        compiler_params=pltpu.CompilerParams(
            dimension_semantics=("parallel", "parallel"),
            vmem_limit_bytes=_vmem_limit_bytes()),
    )(*args)
    return y, stats, strip_h * W


# -------------------- BN fold (tiny, once per layer, in XLA) ------------------
def _fold_bn_params(stats, pix_per_tile, gamma, beta, eps=1e-5):
    """Chan-combine per-strip (mean, centered SS) -> folded BN scale/shift."""
    c = stats.shape[-1]
    st = stats.reshape(-1, 2, c).astype(jnp.float32)
    m_i, ss_i = st[:, 0, :], st[:, 1, :]
    n_tiles = st.shape[0]
    mean = jnp.mean(m_i, axis=0)
    var = (jnp.sum(ss_i, axis=0)
           + pix_per_tile * jnp.sum((m_i - mean) ** 2, axis=0)) / (n_tiles * pix_per_tile)
    inv = jax.lax.rsqrt(var + eps)
    scale = gamma.astype(jnp.float32) * inv
    shift = beta.astype(jnp.float32) - mean * scale
    return scale, shift


# --------------- kernel B: wide lane-dense bn2 + residual + ReLU --------------
def _bn_add_relu_kernel(y_ref, r_ref, sc_ref, sh_ref, o_ref):
    y = y_ref[...].astype(jnp.float32) * sc_ref[...] + sh_ref[...]
    y = y + r_ref[...].astype(jnp.float32)
    o_ref[...] = jnp.maximum(y, 0.0).astype(o_ref.dtype)


def _pick_lane_width(total, c):
    """Lane-dense epilogue width: (rows, C) when C % 128 == 0, else a wide
    multiple of 128 (up to 2048 lanes) so stores are long unmasked vst runs."""
    if c % 128 == 0:
        return c
    assert 128 % c == 0, "channel count must divide 128 or be a multiple of 128"
    for lanes in (2048, 1024, 512, 256, 128):
        if total % lanes == 0 and (total // lanes) % 8 == 0:
            return lanes
    for lanes in (2048, 1024, 512, 256, 128):
        if total % lanes == 0:
            return lanes
    return c                                  # graceful (narrow-store) fallback


def _pick_row_tile(rows, lanes, tile_bytes=2 * 1024 * 1024):
    target = max(8, tile_bytes // (lanes * 4))
    if rows <= target:
        return rows
    t = target - target % 8
    while t >= 8:
        if rows % t == 0:
            return t
        t -= 8
    return rows


def _bn_residual_relu(y, scale, shift, residual, out_dtype):
    """Final fused bn2 + residual-add + ReLU on a wide lane-dense 2-D view."""
    N, H, W, c = y.shape
    total = N * H * W * c
    lanes = _pick_lane_width(total, c)
    rows = total // lanes
    y2 = y.reshape(rows, lanes)                       # free (row-major) views
    r2 = residual.reshape(rows, lanes)
    rep = lanes // c
    sc = jnp.tile(scale.astype(jnp.float32), rep).reshape(1, lanes)
    sh = jnp.tile(shift.astype(jnp.float32), rep).reshape(1, lanes)

    tr = _pick_row_tile(rows, lanes)
    row_spec = pl.BlockSpec((tr, lanes), lambda i: (i, 0))
    vec_spec = pl.BlockSpec((1, lanes), lambda i: (0, 0))     # resident params
    out = pl.pallas_call(
        _bn_add_relu_kernel,
        grid=(rows // tr,),
        in_specs=[row_spec, row_spec, vec_spec, vec_spec],
        out_specs=row_spec,
        out_shape=jax.ShapeDtypeStruct((rows, lanes), out_dtype),
        compiler_params=pltpu.CompilerParams(
            dimension_semantics=("parallel",),
            vmem_limit_bytes=_vmem_limit_bytes()),
    )(y2, r2, sc, sh)
    return out.reshape(N, H, W, c)


# ------------------------------- full block ----------------------------------
def basic_block_forward_nhwc(x_nhwc, params, compute_dtype=None):
    """BasicBlock(inplanes=planes, stride=1, downsample=None) on NHWC activations.

    Keep activations NHWC end-to-end across blocks so no NCHW<->NHWC transpose
    passes appear in the hot path.  compute_dtype=jnp.bfloat16 runs the MXU in
    bf16 (f32 accumulate) and stores the conv intermediates in bf16 on every
    TPU generation (v5e included); compute_dtype=None is a strict f32 path."""
    # TODO(synk): stride>1 / downsample branch not implemented (module default
    # is stride=1, downsample=None, so it is never exercised here).
    N, H, W, c = x_nhwc.shape
    cout = params["w1"].shape[-1]
    assert c == cout, "no-downsample BasicBlock requires inplanes == planes"
    assert c % 128 == 0 or 128 % c == 0, \
        "channel count must divide 128 or be a multiple of 128"
    inter_dtype = compute_dtype if compute_dtype is not None else jnp.float32

    # conv1 (kernel A) -> per-strip bn1 partial stats
    y1, st1, cnt1 = _conv3x3(x_nhwc, params["w1"],
                             compute_dtype=compute_dtype, out_dtype=inter_dtype)
    s1, b1 = _fold_bn_params(st1, cnt1, params["g1"], params["b1"])

    # conv2 (kernel A) with bn1 + ReLU fused into its input path
    y2, st2, cnt2 = _conv3x3(y1, params["w2"], in_scale=s1, in_shift=b1,
                             compute_dtype=compute_dtype, out_dtype=inter_dtype)
    s2, b2 = _fold_bn_params(st2, cnt2, params["g2"], params["b2"])

    # bn2 + residual + ReLU (kernel B, wide lane-dense stores)
    return _bn_residual_relu(y2, s2, b2, x_nhwc, out_dtype=x_nhwc.dtype)


def basic_block_forward_nchw(x_nchw, params, compute_dtype=None):
    """PyTorch-layout (NCHW) adapter — used for parity testing only; chained
    ResNet blocks should stay NHWC so these transposes disappear entirely."""
    x = jnp.transpose(x_nchw, (0, 2, 3, 1))
    out = basic_block_forward_nhwc(x, params, compute_dtype)
    return jnp.transpose(out, (0, 3, 1, 2))


def _oihw_to_mxu(w_oihw):
    """PyTorch OIHW conv weight -> (9*Cin, Cout), rows ordered (kx, ky, cin) to
    match the kernel's per-kx K=3*Cin accumulation groups."""
    cout, cin = w_oihw.shape[0], w_oihw.shape[1]
    return jnp.transpose(w_oihw, (3, 2, 1, 0)).reshape(9 * cin, cout)


# ---------------- pure-JAX reference (for correctness check) -----------------
def _reference_forward(x_nchw, w1_oihw, g1, b1, w2_oihw, g2, b2):
    def conv(x, w):
        return jax.lax.conv_general_dilated(
            x, w, window_strides=(1, 1), padding=((1, 1), (1, 1)),
            dimension_numbers=("NCHW", "OIHW", "NCHW"),
            precision=jax.lax.Precision.HIGHEST)

    def bn(x, g, b):
        mean = jnp.mean(x, axis=(0, 2, 3), keepdims=True)
        var = jnp.mean((x - mean) ** 2, axis=(0, 2, 3), keepdims=True)
        return ((x - mean) * jax.lax.rsqrt(var + 1e-5)
                * g[None, :, None, None] + b[None, :, None, None])

    out = jax.nn.relu(bn(conv(x_nchw, w1_oihw), g1, b1))
    out = bn(conv(out, w2_oihw), g2, b2)
    return jax.nn.relu(out + x_nchw)


if __name__ == "__main__":
    N, C, H, W = 2, 4, 16, 16   # inplanes == planes == 4 (stride=1, no downsample)
    key = jax.random.PRNGKey(0)
    kx_, kw1, kw2, kg1, kb1, kg2, kb2 = jax.random.split(key, 7)

    x = jax.random.normal(kx_, (N, C, H, W), jnp.float32)
    w1_oihw = 0.1 * jax.random.normal(kw1, (C, C, 3, 3), jnp.float32)
    w2_oihw = 0.1 * jax.random.normal(kw2, (C, C, 3, 3), jnp.float32)
    g1 = 1.0 + 0.1 * jax.random.normal(kg1, (C,), jnp.float32)
    b1 = 0.1 * jax.random.normal(kb1, (C,), jnp.float32)
    g2 = 1.0 + 0.1 * jax.random.normal(kg2, (C,), jnp.float32)
    b2 = 0.1 * jax.random.normal(kb2, (C,), jnp.float32)

    params = {"w1": _oihw_to_mxu(w1_oihw), "w2": _oihw_to_mxu(w2_oihw),
              "g1": g1, "b1": b1, "g2": g2, "b2": b2}

    ref = jax.block_until_ready(
        _reference_forward(x, w1_oihw, g1, b1, w2_oihw, g2, b2))

    # --- strict f32 path (PyTorch NCHW layout adapter) ---
    fwd = jax.jit(lambda xx: basic_block_forward_nchw(xx, params))
    out = jax.block_until_ready(fwd(x))
    assert out.shape == (N, C, H, W), out.shape
    if not np.allclose(np.asarray(out), np.asarray(ref), atol=1e-3, rtol=1e-3):
        max_err = float(np.max(np.abs(np.asarray(out) - np.asarray(ref))))
        raise AssertionError(f"f32 BasicBlock mismatch, max abs err = {max_err}")

    # --- bf16 MXU + bf16 intermediates path (production NHWC layout), loose ---
    x_nhwc_bf16 = jnp.transpose(x, (0, 2, 3, 1)).astype(jnp.bfloat16)
    fwd_bf16 = jax.jit(lambda xx: basic_block_forward_nhwc(
        xx, params, compute_dtype=jnp.bfloat16))
    out_bf16 = jax.block_until_ready(fwd_bf16(x_nhwc_bf16))
    out_bf16_f32 = np.asarray(out_bf16.astype(jnp.float32))
    ref_nhwc = np.transpose(np.asarray(ref), (0, 2, 3, 1))
    if not np.allclose(out_bf16_f32, ref_nhwc, atol=1e-1, rtol=1e-1):
        max_err = float(np.max(np.abs(out_bf16_f32 - ref_nhwc)))
        raise AssertionError(f"bf16 BasicBlock mismatch, max abs err = {max_err}")

    print("KERNEL_OK")
</pallas_src>

<mosaic_0001>
module attributes {stable_mosaic.version = 11 : i64} {
  func.func @kernel(%arg0: i32, %arg1: i32, %arg2: memref<1x16x16x4xf32, #tpu.memory_space<vmem>>, %arg3: memref<36x4xf32, #tpu.memory_space<vmem>>, %arg4: memref<1x8x16x4xf32, #tpu.memory_space<vmem>>, %arg5: memref<1x1x2x4xf32, #tpu.memory_space<vmem>>) attributes {dimension_semantics = [#tpu.dimension_semantics<parallel>, #tpu.dimension_semantics<parallel>], iteration_bounds = array<i64: 2, 2>, scalar_prefetch = 0 : i64, scratch_operands = 0 : i64, tpu.core_type = #tpu.core_type<tc>, window_params = [{transform_indices = @transform_0, window_bounds = array<i64: 1, 16, 16, 4>}, {pipeline_mode = #tpu.pipeline_mode<synchronous>, transform_indices = @transform_1, window_bounds = array<i64: 36, 4>}, {transform_indices = @transform_2, window_bounds = array<i64: 1, 8, 16, 4>}, {transform_indices = @transform_3, window_bounds = array<i64: 1, 1, 2, 4>}]} {
    %c8_i32 = arith.constant 8 : i32
    %0 = arith.muli %arg1, %c8_i32 : i32
    %c1_i32 = arith.constant 1 : i32
    %1 = arith.subi %0, %c1_i32 : i32
    %c0_i32 = arith.constant 0 : i32
    %2 = arith.maxsi %1, %c0_i32 : i32
    %c0 = arith.constant 0 : index
    %3 = arith.index_cast %2 : i32 to index
    %c0_0 = arith.constant 0 : index
    %c0_1 = arith.constant 0 : index
    %4 = vector.load %arg2[%c0, %3, %c0_0, %c0_1] : memref<1x16x16x4xf32, #tpu.memory_space<vmem>>, vector<1x1x16x4xf32>
    %5 = vector.shape_cast %4 : vector<1x1x16x4xf32> to vector<1x16x4xf32>
    %c0_2 = arith.constant 0 : index
    %6 = arith.index_cast %0 : i32 to index
    %c0_3 = arith.constant 0 : index
    %c0_4 = arith.constant 0 : index
    %7 = vector.load %arg2[%c0_2, %6, %c0_3, %c0_4] : memref<1x16x16x4xf32, #tpu.memory_space<vmem>>, vector<1x8x16x4xf32>
    %8 = vector.shape_cast %7 : vector<1x8x16x4xf32> to vector<8x16x4xf32>
    %c8_i32_5 = arith.constant 8 : i32
    %9 = arith.addi %0, %c8_i32_5 : i32
    %c15_i32 = arith.constant 15 : i32
    %10 = arith.minsi %9, %c15_i32 : i32
    %c0_6 = arith.constant 0 : index
    %11 = arith.index_cast %10 : i32 to index
    %c0_7 = arith.constant 0 : index
    %c0_8 = arith.constant 0 : index
    %12 = vector.load %arg2[%c0_6, %11, %c0_7, %c0_8] : memref<1x16x16x4xf32, #tpu.memory_space<vmem>>, vector<1x1x16x4xf32>
    %13 = vector.shape_cast %12 : vector<1x1x16x4xf32> to vector<1x16x4xf32>
    %c0_i32_9 = arith.constant 0 : i32
    %14 = arith.cmpi eq, %0, %c0_i32_9 : i32
    %cst = arith.constant 0.000000e+00 : f32
    %15 = vector.broadcast %cst : f32 to vector<1x16x4xf32>
    %16 = arith.select %14, %15, %5 : vector<1x16x4xf32>
    %c8_i32_10 = arith.constant 8 : i32
    %17 = arith.addi %0, %c8_i32_10 : i32
    %c16_i32 = arith.constant 16 : i32
    %18 = arith.cmpi eq, %17, %c16_i32 : i32
    %cst_11 = arith.constant 0.000000e+00 : f32
    %19 = vector.broadcast %cst_11 : f32 to vector<1x16x4xf32>
    %20 = arith.select %18, %19, %13 : vector<1x16x4xf32>
    %21 = tpu.concatenate %16, %8, %20 in 0 : vector<1x16x4xf32>, vector<8x16x4xf32>, vector<1x16x4xf32> -> vector<10x16x4xf32>
    %cst_12 = arith.constant 0.000000e+00 : f32
    %22 = vector.broadcast %cst_12 : f32 to vector<10x1x4xf32>
    %cst_13 = arith.constant 0.000000e+00 : f32
    %23 = vector.broadcast %cst_13 : f32 to vector<128x4xf32>
    %24 = vector.extract_strided_slice %21 {offsets = [0, 0, 0], sizes = [10, 15, 4], strides = [1, 1, 1]} : vector<10x16x4xf32> to vector<10x15x4xf32>
    %25 = tpu.concatenate %22, %24 in 1 : vector<10x1x4xf32>, vector<10x15x4xf32> -> vector<10x16x4xf32>
    %26 = vector.extract_strided_slice %25 {offsets = [0, 0, 0], sizes = [8, 16, 4], strides = [1, 1, 1]} : vector<10x16x4xf32> to vector<8x16x4xf32>
    %27 = vector.extract_strided_slice %25 {offsets = [1, 0, 0], sizes = [8, 16, 4], strides = [1, 1, 1]} : vector<10x16x4xf32> to vector<8x16x4xf32>
    %28 = vector.extract_strided_slice %25 {offsets = [2, 0, 0], sizes = [8, 16, 4], strides = [1, 1, 1]} : vector<10x16x4xf32> to vector<8x16x4xf32>
    %29 = tpu.concatenate %26, %27, %28 in 2 : vector<8x16x4xf32>, vector<8x16x4xf32>, vector<8x16x4xf32> -> vector<8x16x12xf32>
    %30 = vector.shape_cast %29 : vector<8x16x12xf32> to vector<128x12xf32>
    %c0_14 = arith.constant 0 : index
    %c0_15 = arith.constant 0 : index
    %31 = vector.load %arg3[%c0_14, %c0_15] : memref<36x4xf32, #tpu.memory_space<vmem>>, vector<12x4xf32>
    %cst_16 = arith.constant dense<0.000000e+00> : vector<128x4xf32>
    %32 = tpu.matmul %30, %31, %cst_16 {dimension_numbers = #tpu.dot_dimension_numbers<[1], [0], [0], [1], [0, 0, 1, 1], [], []>} : vector<128x12xf32>, vector<12x4xf32>, vector<128x4xf32> -> vector<128x4xf32>
    %33 = arith.addf %23, %32 : vector<128x4xf32>
    %34 = vector.extract_strided_slice %21 {offsets = [0, 0, 0], sizes = [8, 16, 4], strides = [1, 1, 1]} : vector<10x16x4xf32> to vector<8x16x4xf32>
    %35 = vector.extract_strided_slice %21 {offsets = [1, 0, 0], sizes = [8, 16, 4], strides = [1, 1, 1]} : vector<10x16x4xf32> to vector<8x16x4xf32>
    %36 = vector.extract_strided_slice %21 {offsets = [2, 0, 0], sizes = [8, 16, 4], strides = [1, 1, 1]} : vector<10x16x4xf32> to vector<8x16x4xf32>
    %37 = tpu.concatenate %34, %35, %36 in 2 : vector<8x16x4xf32>, vector<8x16x4xf32>, vector<8x16x4xf32> -> vector<8x16x12xf32>
    %38 = vector.shape_cast %37 : vector<8x16x12xf32> to vector<128x12xf32>
    %c12 = arith.constant 12 : index
    %c0_17 = arith.constant 0 : index
    %39 = vector.load %arg3[%c12, %c0_17] : memref<36x4xf32, #tpu.memory_space<vmem>>, vector<12x4xf32>
    %cst_18 = arith.constant dense<0.000000e+00> : vector<128x4xf32>
    %40 = tpu.matmul %38, %39, %cst_18 {dimension_numbers = #tpu.dot_dimension_numbers<[1], [0], [0], [1], [0, 0, 1, 1], [], []>} : vector<128x12xf32>, vector<12x4xf32>, vector<128x4xf32> -> vector<128x4xf32>
    %41 = arith.addf %33, %40 : vector<128x4xf32>
    %42 = vector.extract_strided_slice %21 {offsets = [0, 1, 0], sizes = [10, 15, 4], strides = [1, 1, 1]} : vector<10x16x4xf32> to vector<10x15x4xf32>
    %43 = tpu.concatenate %42, %22 in 1 : vector<10x15x4xf32>, vector<10x1x4xf32> -> vector<10x16x4xf32>
    %44 = vector.extract_strided_slice %43 {offsets = [0, 0, 0], sizes = [8, 16, 4], strides = [1, 1, 1]} : vector<10x16x4xf32> to vector<8x16x4xf32>
    %45 = vector.extract_strided_slice %43 {offsets = [1, 0, 0], sizes = [8, 16, 4], strides = [1, 1, 1]} : vector<10x16x4xf32> to vector<8x16x4xf32>
    %46 = vector.extract_strided_slice %43 {offsets = [2, 0, 0], sizes = [8, 16, 4], strides = [1, 1, 1]} : vector<10x16x4xf32> to vector<8x16x4xf32>
    %47 = tpu.concatenate %44, %45, %46 in 2 : vector<8x16x4xf32>, vector<8x16x4xf32>, vector<8x16x4xf32> -> vector<8x16x12xf32>
    %48 = vector.shape_cast %47 : vector<8x16x12xf32> to vector<128x12xf32>
    %c24 = arith.constant 24 : index
    %c0_19 = arith.constant 0 : index
    %49 = vector.load %arg3[%c24, %c0_19] : memref<36x4xf32, #tpu.memory_space<vmem>>, vector<12x4xf32>
    %cst_20 = arith.constant dense<0.000000e+00> : vector<128x4xf32>
    %50 = tpu.matmul %48, %49, %cst_20 {dimension_numbers = #tpu.dot_dimension_numbers<[1], [0], [0], [1], [0, 0, 1, 1], [], []>} : vector<128x12xf32>, vector<12x4xf32>, vector<128x4xf32> -> vector<128x4xf32>
    %51 = arith.addf %41, %50 : vector<128x4xf32>
    %cst_21 = arith.constant dense<0.000000e+00> : vector<4xf32>
    %52 = vector.multi_reduction <add>, %51, %cst_21 [0] : vector<128x4xf32> to vector<4xf32>
    %53 = vector.shape_cast %52 : vector<4xf32> to vector<1x4xf32>
    %cst_22 = arith.constant 7.812500e-03 : f32
    %54 = vector.broadcast %cst_22 : f32 to vector<1x4xf32>
    %55 = arith.mulf %53, %54 : vector<1x4xf32>
    %56 = vector.shape_cast %51 : vector<128x4xf32> to vector<8x16x4xf32>
    %c0_23 = arith.constant 0 : index
    %c0_24 = arith.constant 0 : index
    %c0_25 = arith.constant 0 : index
    %c0_26 = arith.constant 0 : index
    %57 = vector.load %arg4[%c0_23, %c0_24, %c0_25, %c0_26] : memref<1x8x16x4xf32, #tpu.memory_space<vmem>>, vector<1x8x16x4xf32>
    %58 = vector.shape_cast %57 : vector<1x8x16x4xf32> to vector<8x16x4xf32>
    %59 = vector.shape_cast %56 : vector<8x16x4xf32> to vector<1x8x16x4xf32>
    tpu.vector_store %arg4[%c0_23, %c0_24, %c0_25, %c0_26], %59 {strides = array<i32>} : memref<1x8x16x4xf32, #tpu.memory_space<vmem>>, vector<1x8x16x4xf32>,
    %cst_27 = arith.constant 0.000000e+00 : f32
    %60 = vector.broadcast %cst_27 : f32 to vector<1x4xf32>
    %c0_i32_28 = arith.constant 0 : i32
    %c8_i32_29 = arith.constant 8 : i32
    %61 = arith.muli %c0_i32_28, %c8_i32_29 : i32
    %c0_30 = arith.constant 0 : index
    %62 = arith.index_cast %61 : i32 to index
    %c0_31 = arith.constant 0 : index
    %c0_32 = arith.constant 0 : index
    %63 = vector.load %arg4[%c0_30, %62, %c0_31, %c0_32] : memref<1x8x16x4xf32, #tpu.memory_space<vmem>>, vector<1x8x16x4xf32>
    %64 = vector.shape_cast %63 : vector<1x8x16x4xf32> to vector<8x16x4xf32>
    %65 = vector.shape_cast %64 : vector<8x16x4xf32> to vector<128x4xf32>
    %66 = vector.broadcast %55 : vector<1x4xf32> to vector<128x4xf32>
    %67 = arith.subf %65, %66 : vector<128x4xf32>
    %68 = arith.mulf %67, %67 : vector<128x4xf32>
    %cst_33 = arith.constant dense<0.000000e+00> : vector<4xf32>
    %69 = vector.multi_reduction <add>, %68, %cst_33 [0] : vector<128x4xf32> to vector<4xf32>
    %70 = vector.shape_cast %69 : vector<4xf32> to vector<1x4xf32>
    %71 = arith.addf %60, %70 : vector<1x4xf32>
    %c1_i32_34 = arith.constant 1 : i32
    %72 = tpu.concatenate %55, %71 in 0 : vector<1x4xf32>, vector<1x4xf32> -> vector<2x4xf32>
    %c0_35 = arith.constant 0 : index
    %c0_36 = arith.constant 0 : index
    %c0_37 = arith.constant 0 : index
    %c0_38 = arith.constant 0 : index
    %73 = vector.load %arg5[%c0_35, %c0_36, %c0_37, %c0_38] : memref<1x1x2x4xf32, #tpu.memory_space<vmem>>, vector<1x1x2x4xf32>
    %74 = vector.shape_cast %73 : vector<1x1x2x4xf32> to vector<2x4xf32>
    %75 = vector.shape_cast %72 : vector<2x4xf32> to vector<1x1x2x4xf32>
    tpu.vector_store %arg5[%c0_35, %c0_36, %c0_37, %c0_38], %75 {strides = array<i32>} : memref<1x1x2x4xf32, #tpu.memory_space<vmem>>, vector<1x1x2x4xf32>,
    return
  }
  func.func @transform_0(%arg0: i32, %arg1: i32) -> (i32, i32, i32, i32) {
    %c0_i32 = arith.constant 0 : i32
    %c0_i32_0 = arith.constant 0 : i32
    %c0_i32_1 = arith.constant 0 : i32
    %c0_i32_2 = arith.constant 0 : i32
    return %arg0, %c0_i32, %c0_i32_0, %c0_i32_1 : i32, i32, i32, i32
  }
  func.func @transform_1(%arg0: i32, %arg1: i32) -> (i32, i32) {
    %c0_i32 = arith.constant 0 : i32
    %c0_i32_0 = arith.constant 0 : i32
    %c0_i32_1 = arith.constant 0 : i32
    return %c0_i32, %c0_i32_0 : i32, i32
  }
  func.func @transform_2(%arg0: i32, %arg1: i32) -> (i32, i32, i32, i32) {
    %c0_i32 = arith.constant 0 : i32
    %c0_i32_0 = arith.constant 0 : i32
    %c0_i32_1 = arith.constant 0 : i32
    return %arg0, %arg1, %c0_i32, %c0_i32_0 : i32, i32, i32, i32
  }
  func.func @transform_3(%arg0: i32, %arg1: i32) -> (i32, i32, i32, i32) {
    %c0_i32 = arith.constant 0 : i32
    %c0_i32_0 = arith.constant 0 : i32
    %c0_i32_1 = arith.constant 0 : i32
    return %arg0, %arg1, %c0_i32, %c0_i32_0 : i32, i32, i32, i32
  }
}

module attributes {stable_mosaic.version = 11 : i64} {
  func.func @kernel(%arg0: i32, %arg1: i32, %arg2: memref<1x16x16x4xf32, #tpu.memory_space<vmem>>, %arg3: memref<36x4xf32, #tpu.memory_space<vmem>>, %arg4: memref<1x4xf32, #tpu.memory_space<vmem>>, %arg5: memref<1x4xf32, #tpu.memory_space<vmem>>, %arg6: memref<1x8x16x4xf32, #tpu.memory_space<vmem>>, %arg7: memref<1x1x2x4xf32, #tpu.memory_space<vmem>>) attributes {dimension_semantics = [#tpu.dimension_semantics<parallel>, #tpu.dimension_semantics<parallel>], iteration_bounds = array<i64: 2, 2>, scalar_prefetch = 0 : i64, scratch_operands = 0 : i64, tpu.core_type = #tpu.core_type<tc>, window_params = [{transform_indices = @transform_0, window_bounds = array<i64: 1, 16, 16, 4>}, {pipeline_mode = #tpu.pipeline_mode<synchronous>, transform_indices = @transform_1, window_bounds = array<i64: 36, 4>}, {pipeline_mode = #tpu.pipeline_mode<synchronous>, transform_indices = @transform_2, window_bounds = array<i64: 1, 4>}, {pipeline_mode = #tpu.pipeline_mode<synchronous>, transform_indices = @transform_3, window_bounds = array<i64: 1, 4>}, {transform_indices = @transform_4, window_bounds = array<i64: 1, 8, 16, 4>}, {transform_indices = @transform_5, window_bounds = array<i64: 1, 1, 2, 4>}]} {
    %c0 = arith.constant 0 : index
    %c0_0 = arith.constant 0 : index
    %0 = vector.load %arg4[%c0, %c0_0] : memref<1x4xf32, #tpu.memory_space<vmem>>, vector<1x4xf32>
    %1 = vector.shape_cast %0 : vector<1x4xf32> to vector<1x1x4xf32>
    %c0_1 = arith.constant 0 : index
    %c0_2 = arith.constant 0 : index
    %2 = vector.load %arg5[%c0_1, %c0_2] : memref<1x4xf32, #tpu.memory_space<vmem>>, vector<1x4xf32>
    %3 = vector.shape_cast %2 : vector<1x4xf32> to vector<1x1x4xf32>
    %c8_i32 = arith.constant 8 : i32
    %4 = arith.muli %arg1, %c8_i32 : i32
    %c1_i32 = arith.constant 1 : i32
    %5 = arith.subi %4, %c1_i32 : i32
    %c0_i32 = arith.constant 0 : i32
    %6 = arith.maxsi %5, %c0_i32 : i32
    %c0_3 = arith.constant 0 : index
    %7 = arith.index_cast %6 : i32 to index
    %c0_4 = arith.constant 0 : index
    %c0_5 = arith.constant 0 : index
    %8 = vector.load %arg2[%c0_3, %7, %c0_4, %c0_5] : memref<1x16x16x4xf32, #tpu.memory_space<vmem>>, vector<1x1x16x4xf32>
    %9 = vector.shape_cast %8 : vector<1x1x16x4xf32> to vector<1x16x4xf32>
    %10 = vector.broadcast %1 : vector<1x1x4xf32> to vector<1x16x4xf32>
    %11 = arith.mulf %9, %10 : vector<1x16x4xf32>
    %12 = vector.broadcast %3 : vector<1x1x4xf32> to vector<1x16x4xf32>
    %13 = arith.addf %11, %12 : vector<1x16x4xf32>
    %cst = arith.constant 0.000000e+00 : f32
    %14 = vector.broadcast %cst : f32 to vector<1x16x4xf32>
    %15 = arith.maximumf %13, %14 : vector<1x16x4xf32>
    %c0_6 = arith.constant 0 : index
    %16 = arith.index_cast %4 : i32 to index
    %c0_7 = arith.constant 0 : index
    %c0_8 = arith.constant 0 : index
    %17 = vector.load %arg2[%c0_6, %16, %c0_7, %c0_8] : memref<1x16x16x4xf32, #tpu.memory_space<vmem>>, vector<1x8x16x4xf32>
    %18 = vector.shape_cast %17 : vector<1x8x16x4xf32> to vector<8x16x4xf32>
    %19 = vector.broadcast %1 : vector<1x1x4xf32> to vector<8x16x4xf32>
    %20 = arith.mulf %18, %19 : vector<8x16x4xf32>
    %21 = vector.broadcast %3 : vector<1x1x4xf32> to vector<8x16x4xf32>
    %22 = arith.addf %20, %21 : vector<8x16x4xf32>
    %cst_9 = arith.constant 0.000000e+00 : f32
    %23 = vector.broadcast %cst_9 : f32 to vector<8x16x4xf32>
    %24 = arith.maximumf %22, %23 : vector<8x16x4xf32>
    %c8_i32_10 = arith.constant 8 : i32
    %25 = arith.addi %4, %c8_i32_10 : i32
    %c15_i32 = arith.constant 15 : i32
    %26 = arith.minsi %25, %c15_i32 : i32
    %c0_11 = arith.constant 0 : index
    %27 = arith.index_cast %26 : i32 to index
    %c0_12 = arith.constant 0 : index
    %c0_13 = arith.constant 0 : index
    %28 = vector.load %arg2[%c0_11, %27, %c0_12, %c0_13] : memref<1x16x16x4xf32, #tpu.memory_space<vmem>>, vector<1x1x16x4xf32>
    %29 = vector.shape_cast %28 : vector<1x1x16x4xf32> to vector<1x16x4xf32>
    %30 = vector.broadcast %1 : vector<1x1x4xf32> to vector<1x16x4xf32>
    %31 = arith.mulf %29, %30 : vector<1x16x4xf32>
    %32 = vector.broadcast %3 : vector<1x1x4xf32> to vector<1x16x4xf32>
    %33 = arith.addf %31, %32 : vector<1x16x4xf32>
    %cst_14 = arith.constant 0.000000e+00 : f32
    %34 = vector.broadcast %cst_14 : f32 to vector<1x16x4xf32>
    %35 = arith.maximumf %33, %34 : vector<1x16x4xf32>
    %c0_i32_15 = arith.constant 0 : i32
    %36 = arith.cmpi eq, %4, %c0_i32_15 : i32
    %cst_16 = arith.constant 0.000000e+00 : f32
    %37 = vector.broadcast %cst_16 : f32 to vector<1x16x4xf32>
    %38 = arith.select %36, %37, %15 : vector<1x16x4xf32>
    %c8_i32_17 = arith.constant 8 : i32
    %39 = arith.addi %4, %c8_i32_17 : i32
    %c16_i32 = arith.constant 16 : i32
    %40 = arith.cmpi eq, %39, %c16_i32 : i32
    %cst_18 = arith.constant 0.000000e+00 : f32
    %41 = vector.broadcast %cst_18 : f32 to vector<1x16x4xf32>
    %42 = arith.select %40, %41, %35 : vector<1x16x4xf32>
    %43 = tpu.concatenate %38, %24, %42 in 0 : vector<1x16x4xf32>, vector<8x16x4xf32>, vector<1x16x4xf32> -> vector<10x16x4xf32>
    %cst_19 = arith.constant 0.000000e+00 : f32
    %44 = vector.broadcast %cst_19 : f32 to vector<10x1x4xf32>
    %cst_20 = arith.constant 0.000000e+00 : f32
    %45 = vector.broadcast %cst_20 : f32 to vector<128x4xf32>
    %46 = vector.extract_strided_slice %43 {offsets = [0, 0, 0], sizes = [10, 15, 4], strides = [1, 1, 1]} : vector<10x16x4xf32> to vector<10x15x4xf32>
    %47 = tpu.concatenate %44, %46 in 1 : vector<10x1x4xf32>, vector<10x15x4xf32> -> vector<10x16x4xf32>
    %48 = vector.extract_strided_slice %47 {offsets = [0, 0, 0], sizes = [8, 16, 4], strides = [1, 1, 1]} : vector<10x16x4xf32> to vector<8x16x4xf32>
    %49 = vector.extract_strided_slice %47 {offsets = [1, 0, 0], sizes = [8, 16, 4], strides = [1, 1, 1]} : vector<10x16x4xf32> to vector<8x16x4xf32>
    %50 = vector.extract_strided_slice %47 {offsets = [2, 0, 0], sizes = [8, 16, 4], strides = [1, 1, 1]} : vector<10x16x4xf32> to vector<8x16x4xf32>
    %51 = tpu.concatenate %48, %49, %50 in 2 : vector<8x16x4xf32>, vector<8x16x4xf32>, vector<8x16x4xf32> -> vector<8x16x12xf32>
    %52 = vector.shape_cast %51 : vector<8x16x12xf32> to vector<128x12xf32>
    %c0_21 = arith.constant 0 : index
    %c0_22 = arith.constant 0 : index
    %53 = vector.load %arg3[%c0_21, %c0_22] : memref<36x4xf32, #tpu.memory_space<vmem>>, vector<12x4xf32>
    %cst_23 = arith.constant dense<0.000000e+00> : vector<128x4xf32>
    %54 = tpu.matmul %52, %53, %cst_23 {dimension_numbers = #tpu.dot_dimension_numbers<[1], [0], [0], [1], [0, 0, 1, 1], [], []>} : vector<128x12xf32>, vector<12x4xf32>, vector<128x4xf32> -> vector<128x4xf32>
    %55 = arith.addf %45, %54 : vector<128x4xf32>
    %56 = vector.extract_strided_slice %43 {offsets = [0, 0, 0], sizes = [8, 16, 4], strides = [1, 1, 1]} : vector<10x16x4xf32> to vector<8x16x4xf32>
    %57 = vector.extract_strided_slice %43 {offsets = [1, 0, 0], sizes = [8, 16, 4], strides = [1, 1, 1]} : vector<10x16x4xf32> to vector<8x16x4xf32>
    %58 = vector.extract_strided_slice %43 {offsets = [2, 0, 0], sizes = [8, 16, 4], strides = [1, 1, 1]} : vector<10x16x4xf32> to vector<8x16x4xf32>
    %59 = tpu.concatenate %56, %57, %58 in 2 : vector<8x16x4xf32>, vector<8x16x4xf32>, vector<8x16x4xf32> -> vector<8x16x12xf32>
    %60 = vector.shape_cast %59 : vector<8x16x12xf32> to vector<128x12xf32>
    %c12 = arith.constant 12 : index
    %c0_24 = arith.constant 0 : index
    %61 = vector.load %arg3[%c12, %c0_24] : memref<36x4xf32, #tpu.memory_space<vmem>>, vector<12x4xf32>
    %cst_25 = arith.constant dense<0.000000e+00> : vector<128x4xf32>
    %62 = tpu.matmul %60, %61, %cst_25 {dimension_numbers = #tpu.dot_dimension_numbers<[1], [0], [0], [1], [0, 0, 1, 1], [], []>} : vector<128x12xf32>, vector<12x4xf32>, vector<128x4xf32> -> vector<128x4xf32>
    %63 = arith.addf %55, %62 : vector<128x4xf32>
    %64 = vector.extract_strided_slice %43 {offsets = [0, 1, 0], sizes = [10, 15, 4], strides = [1, 1, 1]} : vector<10x16x4xf32> to vector<10x15x4xf32>
    %65 = tpu.concatenate %64, %44 in 1 : vector<10x15x4xf32>, vector<10x1x4xf32> -> vector<10x16x4xf32>
    %66 = vector.extract_strided_slice %65 {offsets = [0, 0, 0], sizes = [8, 16, 4], strides = [1, 1, 1]} : vector<10x16x4xf32> to vector<8x16x4xf32>
    %67 = vector.extract_strided_slice %65 {offsets = [1, 0, 0], sizes = [8, 16, 4], strides = [1, 1, 1]} : vector<10x16x4xf32> to vector<8x16x4xf32>
    %68 = vector.extract_strided_slice %65 {offsets = [2, 0, 0], sizes = [8, 16, 4], strides = [1, 1, 1]} : vector<10x16x4xf32> to vector<8x16x4xf32>
    %69 = tpu.concatenate %66, %67, %68 in 2 : vector<8x16x4xf32>, vector<8x16x4xf32>, vector<8x16x4xf32> -> vector<8x16x12xf32>
    %70 = vector.shape_cast %69 : vector<8x16x12xf32> to vector<128x12xf32>
    %c24 = arith.constant 24 : index
    %c0_26 = arith.constant 0 : index
    %71 = vector.load %arg3[%c24, %c0_26] : memref<36x4xf32, #tpu.memory_space<vmem>>, vector<12x4xf32>
    %cst_27 = arith.constant dense<0.000000e+00> : vector<128x4xf32>
    %72 = tpu.matmul %70, %71, %cst_27 {dimension_numbers = #tpu.dot_dimension_numbers<[1], [0], [0], [1], [0, 0, 1, 1], [], []>} : vector<128x12xf32>, vector<12x4xf32>, vector<128x4xf32> -> vector<128x4xf32>
    %73 = arith.addf %63, %72 : vector<128x4xf32>
    %cst_28 = arith.constant dense<0.000000e+00> : vector<4xf32>
    %74 = vector.multi_reduction <add>, %73, %cst_28 [0] : vector<128x4xf32> to vector<4xf32>
    %75 = vector.shape_cast %74 : vector<4xf32> to vector<1x4xf32>
    %cst_29 = arith.constant 7.812500e-03 : f32
    %76 = vector.broadcast %cst_29 : f32 to vector<1x4xf32>
    %77 = arith.mulf %75, %76 : vector<1x4xf32>
    %78 = vector.shape_cast %73 : vector<128x4xf32> to vector<8x16x4xf32>
    %c0_30 = arith.constant 0 : index
    %c0_31 = arith.constant 0 : index
    %c0_32 = arith.constant 0 : index
    %c0_33 = arith.constant 0 : index
    %79 = vector.load %arg6[%c0_30, %c0_31, %c0_32, %c0_33] : memref<1x8x16x4xf32, #tpu.memory_space<vmem>>, vector<1x8x16x4xf32>
    %80 = vector.shape_cast %79 : vector<1x8x16x4xf32> to vector<8x16x4xf32>
    %81 = vector.shape_cast %78 : vector<8x16x4xf32> to vector<1x8x16x4xf32>
    tpu.vector_store %arg6[%c0_30, %c0_31, %c0_32, %c0_33], %81 {strides = array<i32>} : memref<1x8x16x4xf32, #tpu.memory_space<vmem>>, vector<1x8x16x4xf32>,
    %cst_34 = arith.constant 0.000000e+00 : f32
    %82 = vector.broadcast %cst_34 : f32 to vector<1x4xf32>
    %c0_i32_35 = arith.constant 0 : i32
    %c8_i32_36 = arith.constant 8 : i32
    %83 = arith.muli %c0_i32_35, %c8_i32_36 : i32
    %c0_37 = arith.constant 0 : index
    %84 = arith.index_cast %83 : i32 to index
    %c0_38 = arith.constant 0 : index
    %c0_39 = arith.constant 0 : index
    %85 = vector.load %arg6[%c0_37, %84, %c0_38, %c0_39] : memref<1x8x16x4xf32, #tpu.memory_space<vmem>>, vector<1x8x16x4xf32>
    %86 = vector.shape_cast %85 : vector<1x8x16x4xf32> to vector<8x16x4xf32>
    %87 = vector.shape_cast %86 : vector<8x16x4xf32> to vector<128x4xf32>
    %88 = vector.broadcast %77 : vector<1x4xf32> to vector<128x4xf32>
    %89 = arith.subf %87, %88 : vector<128x4xf32>
    %90 = arith.mulf %89, %89 : vector<128x4xf32>
    %cst_40 = arith.constant dense<0.000000e+00> : vector<4xf32>
    %91 = vector.multi_reduction <add>, %90, %cst_40 [0] : vector<128x4xf32> to vector<4xf32>
    %92 = vector.shape_cast %91 : vector<4xf32> to vector<1x4xf32>
    %93 = arith.addf %82, %92 : vector<1x4xf32>
    %c1_i32_41 = arith.constant 1 : i32
    %94 = tpu.concatenate %77, %93 in 0 : vector<1x4xf32>, vector<1x4xf32> -> vector<2x4xf32>
    %c0_42 = arith.constant 0 : index
    %c0_43 = arith.constant 0 : index
    %c0_44 = arith.constant 0 : index
    %c0_45 = arith.constant 0 : index
    %95 = vector.load %arg7[%c0_42, %c0_43, %c0_44, %c0_45] : memref<1x1x2x4xf32, #tpu.memory_space<vmem>>, vector<1x1x2x4xf32>
    %96 = vector.shape_cast %95 : vector<1x1x2x4xf32> to vector<2x4xf32>
    %97 = vector.shape_cast %94 : vector<2x4xf32> to vector<1x1x2x4xf32>
    tpu.vector_store %arg7[%c0_42, %c0_43, %c0_44, %c0_45], %97 {strides = array<i32>} : memref<1x1x2x4xf32, #tpu.memory_space<vmem>>, vector<1x1x2x4xf32>,
    return
  }
  func.func @transform_0(%arg0: i32, %arg1: i32) -> (i32, i32, i32, i32) {
    %c0_i32 = arith.constant 0 : i32
    %c0_i32_0 = arith.constant 0 : i32
    %c0_i32_1 = arith.constant 0 : i32
    %c0_i32_2 = arith.constant 0 : i32
    return %arg0, %c0_i32, %c0_i32_0, %c0_i32_1 : i32, i32, i32, i32
  }
  func.func @transform_1(%arg0: i32, %arg1: i32) -> (i32, i32) {
    %c0_i32 = arith.constant 0 : i32
    %c0_i32_0 = arith.constant 0 : i32
    %c0_i32_1 = arith.constant 0 : i32
    return %c0_i32, %c0_i32_0 : i32, i32
  }
  func.func @transform_2(%arg0: i32, %arg1: i32) -> (i32, i32) {
    %c0_i32 = arith.constant 0 : i32
    %c0_i32_0 = arith.constant 0 : i32
    %c0_i32_1 = arith.constant 0 : i32
    return %c0_i32, %c0_i32_0 : i32, i32
  }
  func.func @transform_3(%arg0: i32, %arg1: i32) -> (i32, i32) {
    %c0_i32 = arith.constant 0 : i32
    %c0_i32_0 = arith.constant 0 : i32
    %c0_i32_1 = arith.constant 0 : i32
    return %c0_i32, %c0_i32_0 : i32, i32
  }
  func.func @transform_4(%arg0: i32, %arg1: i32) -> (i32, i32, i32, i32) {
    %c0_i32 = arith.constant 0 : i32
    %c0_i32_0 = arith.constant 0 : i32
    %c0_i32_1 = arith.constant 0 : i32
    return %arg0, %arg1, %c0_i32, %c0_i32_0 : i32, i32, i32, i32
  }
  func.func @transform_5(%arg0: i32, %arg1: i32) -> (i32, i32, i32, i32) {
    %c0_i32 = arith.constant 0 : i32
    %c0_i32_0 = arith.constant 0 : i32
    %c0_i32_1 = arith.constant 0 : i32
    return %arg0, %arg1, %c0_i32, %c0_i32_0 : i32, i32, i32, i32
  }
}

module attributes {stable_mosaic.version = 11 : i64} {
  func.func @_bn_add_relu_kernel(%arg0: i32, %arg1: memref<8x256xf32, #tpu.memory_space<vmem>>, %arg2: memref<8x256xf32, #tpu.memory_space<vmem>>, %arg3: memref<1x256xf32, #tpu.memory_space<vmem>>, %arg4: memref<1x256xf32, #tpu.memory_space<vmem>>, %arg5: memref<8x256xf32, #tpu.memory_space<vmem>>) attributes {dimension_semantics = [#tpu.dimension_semantics<parallel>], iteration_bounds = array<i64: 1>, scalar_prefetch = 0 : i64, scratch_operands = 0 : i64, tpu.core_type = #tpu.core_type<tc>, window_params = [{transform_indices = @transform_0, window_bounds = array<i64: 8, 256>}, {transform_indices = @transform_1, window_bounds = array<i64: 8, 256>}, {pipeline_mode = #tpu.pipeline_mode<synchronous>, transform_indices = @transform_2, window_bounds = array<i64: 1, 256>}, {pipeline_mode = #tpu.pipeline_mode<synchronous>, transform_indices = @transform_3, window_bounds = array<i64: 1, 256>}, {transform_indices = @transform_4, window_bounds = array<i64: 8, 256>}]} {
    %c0 = arith.constant 0 : index
    %c0_0 = arith.constant 0 : index
    %0 = vector.load %arg1[%c0, %c0_0] : memref<8x256xf32, #tpu.memory_space<vmem>>, vector<8x256xf32>
    %c0_1 = arith.constant 0 : index
    %c0_2 = arith.constant 0 : index
    %1 = vector.load %arg3[%c0_1, %c0_2] : memref<1x256xf32, #tpu.memory_space<vmem>>, vector<1x256xf32>
    %2 = vector.broadcast %1 : vector<1x256xf32> to vector<8x256xf32>
    %3 = arith.mulf %0, %2 : vector<8x256xf32>
    %c0_3 = arith.constant 0 : index
    %c0_4 = arith.constant 0 : index
    %4 = vector.load %arg4[%c0_3, %c0_4] : memref<1x256xf32, #tpu.memory_space<vmem>>, vector<1x256xf32>
    %5 = vector.broadcast %4 : vector<1x256xf32> to vector<8x256xf32>
    %6 = arith.addf %3, %5 : vector<8x256xf32>
    %c0_5 = arith.constant 0 : index
    %c0_6 = arith.constant 0 : index
    %7 = vector.load %arg2[%c0_5, %c0_6] : memref<8x256xf32, #tpu.memory_space<vmem>>, vector<8x256xf32>
    %8 = arith.addf %6, %7 : vector<8x256xf32>
    %cst = arith.constant 0.000000e+00 : f32
    %9 = vector.broadcast %cst : f32 to vector<8x256xf32>
    %10 = arith.maximumf %8, %9 : vector<8x256xf32>
    %c0_7 = arith.constant 0 : index
    %c0_8 = arith.constant 0 : index
    %11 = vector.load %arg5[%c0_7, %c0_8] : memref<8x256xf32, #tpu.memory_space<vmem>>, vector<8x256xf32>
    tpu.vector_store %arg5[%c0_7, %c0_8], %10 {strides = array<i32>} : memref<8x256xf32, #tpu.memory_space<vmem>>, vector<8x256xf32>,
    return
  }
  func.func @transform_0(%arg0: i32) -> (i32, i32) {
    %c0_i32 = arith.constant 0 : i32
    %c0_i32_0 = arith.constant 0 : i32
    return %arg0, %c0_i32 : i32, i32
  }
  func.func @transform_1(%arg0: i32) -> (i32, i32) {
    %c0_i32 = arith.constant 0 : i32
    %c0_i32_0 = arith.constant 0 : i32
    return %arg0, %c0_i32 : i32, i32
  }
  func.func @transform_2(%arg0: i32) -> (i32, i32) {
    %c0_i32 = arith.constant 0 : i32
    %c0_i32_0 = arith.constant 0 : i32
    %c0_i32_1 = arith.constant 0 : i32
    return %c0_i32, %c0_i32_0 : i32, i32
  }
  func.func @transform_3(%arg0: i32) -> (i32, i32) {
    %c0_i32 = arith.constant 0 : i32
    %c0_i32_0 = arith.constant 0 : i32
    %c0_i32_1 = arith.constant 0 : i32
    return %c0_i32, %c0_i32_0 : i32, i32
  }
  func.func @transform_4(%arg0: i32) -> (i32, i32) {
    %c0_i32 = arith.constant 0 : i32
    %c0_i32_0 = arith.constant 0 : i32
    return %arg0, %c0_i32 : i32, i32
  }
}

</mosaic_0001>

<bundles_post_ra>
// kernel: tile.18
= control target key start
LH: loop header
LB: loop body
LE: loop exit
PB: predicated region body
PF: predicated region fallthrough
CT: control target
= control target key end

     0   :  { %s64_s0 = inlined_call_operand.vmem [shape: f32[4], index: 0, kind: input, shape index: {}]   ;;  %s65_s1 = inlined_call_operand.vmem [shape: f32[64,4], index: 1, kind: output, shape index: {}]  }
   0x1   :  { %v4_v0 = vld [vmem:[%s64_s0] ss:$0 sm:$0xff] }
   0x2   :  { %5 = vst [vmem:[%s65_s1] sm:$0xff] %v4_v0 }
   0x3   :  { %20 = vst [vmem:[%s65_s1 + $0x8] sm:$0xff] %v4_v0 }
   0x4   :  { %21 = vst [vmem:[%s65_s1 + $0x10] sm:$0xff] %v4_v0 }
   0x5   :  { %22 = vst [vmem:[%s65_s1 + $0x18] sm:$0xff] %v4_v0 }
   0x6   :  { %23 = vst [vmem:[%s65_s1 + $0x20] sm:$0xff] %v4_v0 }
   0x7   :  { %24 = vst [vmem:[%s65_s1 + $0x28] sm:$0xff] %v4_v0 }
   0x8   :  { %25 = vst [vmem:[%s65_s1 + $0x30] sm:$0xff] %v4_v0 }
   0x9   :  { %26 = vst [vmem:[%s65_s1 + $0x38] sm:$0xff] %v4_v0 }

// kernel: tile.19
= control target key start
LH: loop header
LB: loop body
LE: loop exit
PB: predicated region body
PF: predicated region fallthrough
CT: control target
= control target key end

     0   :  { %vm5_vm0 = vcmask 1041409   ;;  %s426_s14 = smov 124   ;;  %s427_s15 = smov 116   ;;  %vm7_vm1 = vcmask 31744   ;;  %vm17_vm2 = vcmask 1048544   ;;  %vm27_vm3 = vcmask 1015744   ;;  %s697_s0 = inlined_call_operand.vmem [shape: f32[64,4], index: 0, kind: input, shape index: {}]   ;;  %s698_s1 = inlined_call_operand.vmem [shape: f32[1,256], index: 1, kind: output, shape index: {}]  }
   0x1   :  { %v332_v0 = vld [vmem:[%s697_s0 + $0x1f] sm:$0x1]   ;;  %v336_v3 = vld [vmem:[%s697_s0 + $0x1d] sm:$0x1]   ;;  %v334_v6 = vld [vmem:[%s697_s0 + $0x1e] sm:$0x1]  }
   0x2   :  { %v333_v1 = vld [vmem:[%s697_s0 + $0x3e] sm:$0x2]   ;;  %v337_v4 = vld [vmem:[%s697_s0 + $0x3c] sm:$0x2]   ;;  %v335_v7 = vld [vmem:[%s697_s0 + $0x3d] sm:$0x2]  }
   0x3   :  { %v14_v2 = vsel %vm5_vm0, %v333_v1, %v332_v0  ;;  %v34_v5 = vsel %vm5_vm0, %v337_v4, %v336_v3  ;;  %v338_v8 = vld [vmem:[%s697_s0 + $0x1c] sm:$0x1]   ;;  %v24_v10 = vsel %vm5_vm0, %v335_v7, %v334_v6  ;;  %v340_v11 = vld [vmem:[%s697_s0 + $0x1b] sm:$0x1]   ;;  %s428_s28 = smov 108   ;;  %s429_s29 = smov 120  }
   0x4   :  { %15 = vrot.lane.b32.xlu0 %v14_v2, %s426_s14  ;;  %35 = vrot.lane.b32.xlu1 %v34_v5, %s427_s15  ;;  %v339_v9 = vld [vmem:[%s697_s0 + $0x3b] sm:$0x2]   ;;  %v341_v12 = vld [vmem:[%s697_s0 + $0x3a] sm:$0x2]   ;;  %s430_s30 = smov 112   ;;  %s431_s14 = smov 104  }
   0x5   :  { %v44_v13 = vsel %vm5_vm0, %v339_v9, %v338_v8  ;;  %v54_v14 = vsel %vm5_vm0, %v341_v12, %v340_v11  ;;  %v342_v15 = vld [vmem:[%s697_s0 + $0x1a] sm:$0x1]   ;;  %v344_v17 = vld [vmem:[%s697_s0 + $0x19] sm:$0x1]   ;;  %v346_v19 = vld [vmem:[%s697_s0 + $0x18] sm:$0x1]  }
   0x6   :  { %55 = vrot.lane.b32.xlu2 %v54_v14, %s428_s28  ;;  %v343_v16 = vld [vmem:[%s697_s0 + $0x39] sm:$0x2]   ;;  %v345_v18 = vld [vmem:[%s697_s0 + $0x38] sm:$0x2]   ;;  %v347_v20 = vld [vmem:[%s697_s0 + $0x37] sm:$0x2]  }
   0x7   :  { %v64_v21 = vsel %vm5_vm0, %v343_v16, %v342_v15  ;;  %v74_v22 = vsel %vm5_vm0, %v345_v18, %v344_v17  ;;  %v84_v23 = vsel %vm5_vm0, %v347_v20, %v346_v19  ;;  %s432_s15 = smov 100   ;;  %s433_s16 = smov 96   ;;  %v348_v24 = vld [vmem:[%s697_s0 + $0x17] sm:$0x1]   ;;  %v350_v26 = vld [vmem:[%s697_s0 + $0x16] sm:$0x1]  }
   0x8   :  { %v349_v25 = vld [vmem:[%s697_s0 + $0x36] sm:$0x2]   ;;  %v351_v27 = vld [vmem:[%s697_s0 + $0x35] sm:$0x2]   ;;  %v352_v28 = vld [vmem:[%s697_s0 + $0x15] sm:$0x1]  }
   0x9   :  { %v353_v29 = vld [vmem:[%s697_s0 + $0x34] sm:$0x2]   ;;  %v94_v30 = vsel %vm5_vm0, %v349_v25, %v348_v24  ;;  %v104_v31 = vsel %vm5_vm0, %v351_v27, %v350_v26  ;;  %s436_s2 = smov 84   ;;  %v354_v33 = vld [vmem:[%s697_s0 + $0x14] sm:$0x1]   ;;  %s439_s17 = smov 72  }
   0xa   :  { %v114_v32 = vsel %vm5_vm0, %v353_v29, %v352_v28  ;;  %v355_v34 = vld [vmem:[%s697_s0 + $0x33] sm:$0x2]   ;;  %v356_v35 = vld [vmem:[%s697_s0 + $0x13] sm:$0x1]   ;;  %v358_v37 = vld [vmem:[%s697_s0 + $0x12] sm:$0x1]  }
   0xb   :  { %v357_v36 = vld [vmem:[%s697_s0 + $0x32] sm:$0x2]   ;;  %v359_v38 = vld [vmem:[%s697_s0 + $0x31] sm:$0x2]   ;;  %v124_v39 = vsel %vm5_vm0, %v355_v34, %v354_v33  ;;  %v360_v42 = vld [vmem:[%s697_s0 + $0x11] sm:$0x1]  }
   0xc   :  { %25 = vrot.lane.b32.xlu0 %v24_v10, %s429_s29  ;;  %45 = vrot.lane.b32.xlu1 %v44_v13, %s430_s30  ;;  %s434_s29 = smov 92   ;;  %s435_s30 = smov 88   ;;  %v134_v40 = vsel %vm5_vm0, %v357_v36, %v356_v35  ;;  %v144_v41 = vsel %vm5_vm0, %v359_v38, %v358_v37  ;;  %v361_v43 = vld [vmem:[%s697_s0 + $0x30] sm:$0x2]   ;;  %v362_v44 = vld [vmem:[%s697_s0 + $0x10] sm:$0x1]  }
   0xd   :  { %v363_v45 = vld [vmem:[%s697_s0 + $0x2f] sm:$0x2]   ;;  %v364_v46 = vld [vmem:[%s697_s0 + $0xf] sm:$0x1]   ;;  %v154_v48 = vsel %vm5_vm0, %v361_v43, %v360_v42  ;;  %s442_s3 = smov 60   ;;  %s445_s18 = smov 48  }
   0xe   :  { %65 = vrot.lane.b32.xlu2 %v64_v21, %s431_s14  ;;  %v365_v47 = vld [vmem:[%s697_s0 + $0x2e] sm:$0x2]   ;;  %v164_v49 = vsel %vm5_vm0, %v363_v45, %v362_v44  ;;  %v366_v51 = vld [vmem:[%s697_s0 + $0xe] sm:$0x1]   ;;  %v368_v53 = vld [vmem:[%s697_s0 + $0xd] sm:$0x1]  }
   0xf   :  { %v174_v50 = vsel %vm5_vm0, %v365_v47, %v364_v46  ;;  %v367_v52 = vld [vmem:[%s697_s0 + $0x2d] sm:$0x2]   ;;  %v369_v54 = vld [vmem:[%s697_s0 + $0x2c] sm:$0x2]   ;;  %v370_v55 = vld [vmem:[%s697_s0 + $0xc] sm:$0x1]  }
  0x10   :  { %v371_v56 = vld [vmem:[%s697_s0 + $0x2b] sm:$0x2]   ;;  %v184_v57 = vsel %vm5_vm0, %v367_v52, %v366_v51  ;;  %v194_v58 = vsel %vm5_vm0, %v369_v54, %v368_v53  ;;  %v372_v60 = vld [vmem:[%s697_s0 + $0xb] sm:$0x1]   ;;  %v374_v62 = vld [vmem:[%s697_s0 + $0xa] sm:$0x1]  }
  0x11   :  { %v204_v59 = vsel %vm5_vm0, %v371_v56, %v370_v55  ;;  %v373_v61 = vld [vmem:[%s697_s0 + $0x2a] sm:$0x2]   ;;  %v375_v63 = vld [vmem:[%s697_s0 + $0x29] sm:$0x2]   ;;  %v376_v0 = vld [vmem:[%s697_s0 + $0x9] sm:$0x1]  }
  0x12   :  { %v377_v1 = vld [vmem:[%s697_s0 + $0x28] sm:$0x2]   ;;  %v214_v2 = vsel %vm5_vm0, %v373_v61, %v372_v60  ;;  %v224_v3 = vsel %vm5_vm0, %v375_v63, %v374_v62  ;;  %s448_s4 = smov 36   ;;  %v378_v5 = vld [vmem:[%s697_s0 + $0x8] sm:$0x1]   ;;  %s451_s19 = smov 24  }
  0x13   :  { %v234_v4 = vsel %vm5_vm0, %v377_v1, %v376_v0  ;;  %v379_v6 = vld [vmem:[%s697_s0 + $0x27] sm:$0x2]   ;;  %v380_v7 = vld [vmem:[%s697_s0 + $0x7] sm:$0x1]   ;;  %v382_v9 = vld [vmem:[%s697_s0 + $0x6] sm:$0x1]  }
  0x14   :  { %75 = vrot.lane.b32.xlu0 %v74_v22, %s432_s15  ;;  %85 = vrot.lane.b32.xlu1 %v84_v23, %s433_s16  ;;  %s437_s15 = smov 80   ;;  %s438_s16 = smov 76   ;;  %v381_v8 = vld [vmem:[%s697_s0 + $0x26] sm:$0x2]   ;;  %v383_v10 = vld [vmem:[%s697_s0 + $0x25] sm:$0x2]   ;;  %v244_v11 = vsel %vm5_vm0, %v379_v6, %v378_v5 }
  0x15   :  { %v254_v12 = vsel %vm5_vm0, %v381_v8, %v380_v7  ;;  %v264_v13 = vsel %vm5_vm0, %v383_v10, %v382_v9  ;;  %v384_v14 = vld [vmem:[%s697_s0 + $0x5] sm:$0x1]   ;;  %v386_v16 = vld [vmem:[%s697_s0 + $0x4] sm:$0x1]   ;;  %v388_v18 = vld [vmem:[%s697_s0 + $0x3] sm:$0x1]  }
  0x16   :  { %95 = vrot.lane.b32.xlu2 %v94_v30, %s434_s29  ;;  %v385_v15 = vld [vmem:[%s697_s0 + $0x24] sm:$0x2]   ;;  %v387_v17 = vld [vmem:[%s697_s0 + $0x23] sm:$0x2]   ;;  %v389_v19 = vld [vmem:[%s697_s0 + $0x22] sm:$0x2]  }
  0x17   :  { %v274_v20 = vsel %vm5_vm0, %v385_v15, %v384_v14  ;;  %v284_v21 = vsel %vm5_vm0, %v387_v17, %v386_v16  ;;  %v294_v22 = vsel %vm5_vm0, %v389_v19, %v388_v18  ;;  %s454_s5 = smov 12   ;;  %v390_v23 = vld [vmem:[%s697_s0 + $0x2] sm:$0x1]   ;;  %v392_v25 = vld [vmem:[%s697_s0 + $0x1] sm:$0x1]   ;;  %s455_s14 = smov 8  }
  0x18   :  { %v391_v24 = vld [vmem:[%s697_s0 + $0x21] sm:$0x2]   ;;  %v393_v26 = vld [vmem:[%s697_s0 + $0x20] sm:$0x2]   ;;  %v2_v29 = vld [vmem:[%s697_s0] sm:$0x1]  }
  0x19   :  { %v304_v27 = vsel %vm5_vm0, %v391_v24, %v390_v23  ;;  %v314_v28 = vsel %vm5_vm0, %v393_v26, %v392_v25  ;;  %v331_v30 = vld [vmem:[%s697_s0 + $0x1f] sm:$0x2]   ;;  %vm37_vm4 = vcmask 982944   ;;  %vm47_vm5 = vcmask 950144  }
  0x1a   :  { %vm57_vm6 = vcmask 917344   ;;  %vm67_vm7 = vcmask 884544   ;;  %vm77_vm8 = vcmask 851744   ;;  %vm87_vm9 = vcmask 818944  }
  0x1b   :  { %vm97_vm10 = vcmask 786144   ;;  %vm107_vm11 = vcmask 753344   ;;  %vm117_vm12 = vcmask 720544   ;;  %vm127_vm13 = vcmask 687744  }
  0x1c   :  { %105 = vrot.lane.b32.xlu0 %v104_v31, %s435_s30  ;;  %115 = vrot.lane.b32.xlu1 %v114_v32, %s436_s2  ;;  %s440_s30 = smov 68   ;;  %s441_s2 = smov 64   ;;  %v6_v31 = vsel %vm5_vm0, %v331_v30, %v2_v29  ;;  %vm137_vm14 = vcmask 654944   ;;  %vm147_vm15 = vcmask 622144   ;;  %vm157_vm0 = vcmask 589344  }
  0x1d   :  { %8 = vst.msk [vmem:[#allocation0] ss:$8 sm:$0x3] %vm7_vm1, %v6_v31   ;;  %vm167_vm1 = vcmask 556544  }
  0x1e   :  { %125 = vrot.lane.b32.xlu2 %v124_v39, %s437_s15  ;;  %s456_s15 = smov 4  }
  0x24   :  { %135 = vrot.lane.b32.xlu0 %v134_v40, %s438_s16  ;;  %145 = vrot.lane.b32.xlu1 %v144_v41, %s439_s17  ;;  %s443_s16 = smov 56   ;;  %s444_s17 = smov 52  }
  0x26   :  { %155 = vrot.lane.b32.xlu2 %v154_v48, %s440_s30 }
  0x2c   :  { %165 = vrot.lane.b32.xlu0 %v164_v49, %s441_s2  ;;  %175 = vrot.lane.b32.xlu1 %v174_v50, %s442_s3  ;;  %s446_s2 = smov 44   ;;  %s447_s3 = smov 40  }
  0x2e   :  { %185 = vrot.lane.b32.xlu2 %v184_v57, %s443_s16 }
  0x34   :  { %195 = vrot.lane.b32.xlu0 %v194_v58, %s444_s17  ;;  %205 = vrot.lane.b32.xlu1 %v204_v59, %s445_s18  ;;  %s449_s17 = smov 32   ;;  %s450_s18 = smov 28  }
  0x36   :  { %215 = vrot.lane.b32.xlu2 %v214_v2, %s446_s2 }
  0x3c   :  { %225 = vrot.lane.b32.xlu0 %v224_v3, %s447_s3  ;;  %235 = vrot.lane.b32.xlu1 %v234_v4, %s448_s4  ;;  %s452_s3 = smov 20   ;;  %s453_s4 = smov 16  }
  0x3e   :  { %245 = vrot.lane.b32.xlu2 %v244_v11, %s449_s17 }
  0x44   :  { %255 = vrot.lane.b32.xlu0 %v254_v12, %s450_s18  ;;  %265 = vrot.lane.b32.xlu1 %v264_v13, %s451_s19 }
  0x46   :  { %275 = vrot.lane.b32.xlu2 %v274_v20, %s452_s3 }
  0x4c   :  { %285 = vrot.lane.b32.xlu0 %v284_v21, %s453_s4  ;;  %295 = vrot.lane.b32.xlu1 %v294_v22, %s454_s5 }
  0x4e   :  { %305 = vrot.lane.b32.xlu2 %v304_v27, %s455_s14 }
  0x54   :  { %315 = vrot.lane.b32.xlu0 %v314_v28, %s456_s15 }
  0x60   :  { %v56_v32 = vpop.permute.xlu2 %55  }
  0x68   :  { %v66_v33 = vpop.permute.xlu2 %65  }
  0x70   :  { %v96_v34 = vpop.permute.xlu2 %95  }
  0x76   :  { %v16_v35 = vpop.permute.xlu0 %15   ;;  %v36_v36 = vpop.permute.xlu1 %35  }
  0x77   :  { %18 = vst.msk [vmem:[#allocation0] ss:$8 sm:$0x3] %vm17_vm2, %v16_v35   ;;  %vm177_vm2 = vcmask 523744  }
  0x78   :  { %v126_v37 = vpop.permute.xlu2 %125  }
  0x7e   :  { %v26_v38 = vpop.permute.xlu0 %25   ;;  %v46_v39 = vpop.permute.xlu1 %45  }
  0x7f   :  { %28 = vst.msk [vmem:[#allocation0] ss:$8 sm:$0x3] %vm27_vm3, %v26_v38   ;;  %vm187_vm3 = vcmask 490944  }
  0x80   :  { %38 = vst.msk [vmem:[#allocation0] ss:$8 sm:$0x3] %vm37_vm4, %v36_v36   ;;  %v156_v40 = vpop.permute.xlu2 %155   ;;  %vm197_vm4 = vcmask 458144  }
  0x81   :  { %48 = vst.msk [vmem:[#allocation0] ss:$8 sm:$0x3] %vm47_vm5, %v46_v39   ;;  %vm207_vm5 = vcmask 425344  }
  0x82   :  { %58 = vst.msk [vmem:[#allocation0] ss:$8 sm:$0x3] %vm57_vm6, %v56_v32   ;;  %vm217_vm6 = vcmask 392544  }
  0x83   :  { %68 = vst.msk [vmem:[#allocation0] ss:$8 sm:$0x3] %vm67_vm7, %v66_v33   ;;  %vm227_vm7 = vcmask 359744  }
  0x86   :  { %v76_v41 = vpop.permute.xlu0 %75   ;;  %v86_v42 = vpop.permute.xlu1 %85  }
  0x87   :  { %78 = vst.msk [vmem:[#allocation0] ss:$8 sm:$0x3] %vm77_vm8, %v76_v41   ;;  %vm237_vm8 = vcmask 326944  }
  0x88   :  { %88 = vst.msk [vmem:[#allocation0] ss:$8 sm:$0x3] %vm87_vm9, %v86_v42   ;;  %v186_v43 = vpop.permute.xlu2 %185   ;;  %vm247_vm9 = vcmask 294144  }
  0x89   :  { %98 = vst.msk [vmem:[#allocation0] ss:$8 sm:$0x3] %vm97_vm10, %v96_v34   ;;  %vm257_vm10 = vcmask 261344  }
  0x8e   :  { %v106_v44 = vpop.permute.xlu0 %105   ;;  %v116_v45 = vpop.permute.xlu1 %115  }
  0x8f   :  { %108 = vst.msk [vmem:[#allocation0] ss:$8 sm:$0x3] %vm107_vm11, %v106_v44   ;;  %vm267_vm11 = vcmask 228544  }
  0x90   :  { %118 = vst.msk [vmem:[#allocation0] ss:$8 sm:$0x3] %vm117_vm12, %v116_v45   ;;  %v216_v46 = vpop.permute.xlu2 %215   ;;  %vm277_vm12 = vcmask 195744  }
  0x91   :  { %128 = vst.msk [vmem:[#allocation0] ss:$8 sm:$0x3] %vm127_vm13, %v126_v37   ;;  %vm287_vm13 = vcmask 162944  }
  0x96   :  { %v136_v47 = vpop.permute.xlu0 %135   ;;  %v146_v48 = vpop.permute.xlu1 %145  }
  0x97   :  { %138 = vst.msk [vmem:[#allocation0] ss:$8 sm:$0x3] %vm137_vm14, %v136_v47   ;;  %vm297_vm14 = vcmask 130144  }
  0x98   :  { %148 = vst.msk [vmem:[#allocation0] ss:$8 sm:$0x3] %vm147_vm15, %v146_v48   ;;  %v246_v49 = vpop.permute.xlu2 %245   ;;  %vm307_vm15 = vcmask 97344  }
  0x99   :  { %158 = vst.msk [vmem:[#allocation0] ss:$8 sm:$0x3] %vm157_vm0, %v156_v40   ;;  %vm317_vm0 = vcmask 64544  }
  0x9e   :  { %v166_v50 = vpop.permute.xlu0 %165   ;;  %v176_v51 = vpop.permute.xlu1 %175  }
  0x9f   :  { %168 = vst.msk [vmem:[#allocation0] ss:$8 sm:$0x3] %vm167_vm1, %v166_v50  }
  0xa0   :  { %178 = vst.msk [vmem:[#allocation0] ss:$8 sm:$0x3] %vm177_vm2, %v176_v51   ;;  %v276_v52 = vpop.permute.xlu2 %275  }
  0xa1   :  { %188 = vst.msk [vmem:[#allocation0] ss:$8 sm:$0x3] %vm187_vm3, %v186_v43  }
  0xa6   :  { %v196_v53 = vpop.permute.xlu0 %195   ;;  %v206_v54 = vpop.permute.xlu1 %205  }
  0xa7   :  { %198 = vst.msk [vmem:[#allocation0] ss:$8 sm:$0x3] %vm197_vm4, %v196_v53  }
  0xa8   :  { %208 = vst.msk [vmem:[#allocation0] ss:$8 sm:$0x3] %vm207_vm5, %v206_v54   ;;  %v306_v55 = vpop.permute.xlu2 %305  }
  0xa9   :  { %218 = vst.msk [vmem:[#allocation0] ss:$8 sm:$0x3] %vm217_vm6, %v216_v46  }
  0xae   :  { %v226_v56 = vpop.permute.xlu0 %225   ;;  %v236_v57 = vpop.permute.xlu1 %235  }
  0xaf   :  { %228 = vst.msk [vmem:[#allocation0] ss:$8 sm:$0x3] %vm227_vm7, %v226_v56  }
  0xb0   :  { %238 = vst.msk [vmem:[#allocation0] ss:$8 sm:$0x3] %vm237_vm8, %v236_v57  }
  0xb1   :  { %248 = vst.msk [vmem:[#allocation0] ss:$8 sm:$0x3] %vm247_vm9, %v246_v49  }
  0xb6   :  { %v256_v58 = vpop.permute.xlu0 %255   ;;  %v266_v59 = vpop.permute.xlu1 %265  }
  0xb7   :  { %258 = vst.msk [vmem:[#allocation0] ss:$8 sm:$0x3] %vm257_vm10, %v256_v58  }
  0xb8   :  { %268 = vst.msk [vmem:[#allocation0] ss:$8 sm:$0x3] %vm267_vm11, %v266_v59  }
  0xb9   :  { %278 = vst.msk [vmem:[#allocation0] ss:$8 sm:$0x3] %vm277_vm12, %v276_v52  }
  0xbe   :  { %v286_v60 = vpop.permute.xlu0 %285   ;;  %v296_v61 = vpop.permute.xlu1 %295  }
  0xbf   :  { %288 = vst.msk [vmem:[#allocation0] ss:$8 sm:$0x3] %vm287_vm13, %v286_v60  }
  0xc0   :  { %298 = vst.msk [vmem:[#allocation0] ss:$8 sm:$0x3] %vm297_vm14, %v296_v61  }
  0xc1   :  { %308 = vst.msk [vmem:[#allocation0] ss:$8 sm:$0x3] %vm307_vm15, %v306_v55  }
  0xc6   :  { %v316_v62 = vpop.permute.xlu0 %315  }
  0xc7   :  { %318 = vst.msk [vmem:[#allocation0] ss:$8 sm:$0x3] %vm317_vm0, %v316_v62  }
  0xce   :  { %v321_v63 = vld [vmem:[#allocation0] sm:$0x1]  ;;  %v326_v0 = vld [vmem:[#allocation0 + $0x8] sm:$0x1] }
  0xcf   :  { %324 = vst [vmem:[%s698_s1] sm:$0x1] %v321_v63 }
  0xd0   :  { %394 = vst [vmem:[%s698_s1 + $0x1] sm:$0x1] %v326_v0 }

// kernel: _lambda_.5
= control target key start
LH: loop header
LB: loop body
LE: loop exit
PB: predicated region body
PF: predicated region fallthrough
CT: control target
= control target key end

     0   :  { %s96_s0 = inlined_call_operand.vmem [shape: f32[8,256], index: 0, kind: input, shape index: {}]   ;;  %s97_s2 = inlined_call_operand.vmem [shape: f32[1,256], index: 2, kind: input, shape index: {}]   ;;  %s98_s3 = inlined_call_operand.vmem [shape: f32[1,256], index: 3, kind: input, shape index: {}]   ;;  %s99_s1 = inlined_call_operand.vmem [shape: f32[8,256], index: 1, kind: input, shape index: {}]   ;;  %s100_s4 = inlined_call_operand.vmem [shape: f32[8,256], index: 4, kind: output, shape index: {}]  }
   0x1   :  { %v17_v0 = vld [vmem:[%s96_s0] sm:$0xff]  ;;  %v18_v5 = vld [vmem:[%s96_s0 + $0x8] sm:$0xff] }
   0x2   :  { %v19_v1 = vld [vmem:[%s97_s2] sm:$0x3]  ;;  %v36_v11 = vld [vmem:[%s99_s1 + $0x8] sm:$0xff] }
   0x3   :  { %v27_v2 = vld [vmem:[%s98_s3] sm:$0x3]  ;;  %v21_v3 = vperm.slane %v19_v1, 0  ;;  %v22_v6 = vperm.slane %v19_v1, 1 }
   0x4   :  { %v29_v4 = vperm.slane %v27_v2, 0  ;;  %v30_v7 = vperm.slane %v27_v2, 1  ;;  %v35_v10 = vld [vmem:[%s99_s1] sm:$0xff] }
   0x5   :  { %v25_v8 = vmul.f32 %v21_v3, %v17_v0  ;;  %v26_v9 = vmul.f32 %v22_v6, %v18_v5 }
   0x7   :  { %v33_v12 = vadd.f32 %v29_v4, %v25_v8  ;;  %v34_v13 = vadd.f32 %v30_v7, %v26_v9 }
   0x9   :  { %v37_v14 = vadd.f32 %v35_v10, %v33_v12  ;;  %v38_v15 = vadd.f32 %v36_v11, %v34_v13 }
   0xb   :  { %v39_v16 = vmax.f32 %v37_v14, 0.0  ;;  %v40_v17 = vmax.f32 %v38_v15, 0.0 }
   0xd   :  { %41 = vst [vmem:[%s100_s4] sm:$0xff] %v39_v16 }
   0xe   :  { %42 = vst [vmem:[%s100_s4 + $0x8] sm:$0xff] %v40_v17 }

// kernel: _lambda_.3
= control target key start
LH: loop header
LB: loop body
LE: loop exit
PB: predicated region body
PF: predicated region fallthrough
CT: control target
= control target key end

     0   :  { %s1657_s12 = smov 0   ;;  %s1659_s13 = smov 0   ;;  %s2451_s0 = inlined_call_operand.vmem [shape: f32[2,16,16,4], index: 0, kind: input, shape index: {}]   ;;  %s2452_s1 = inlined_call_operand.vmem [shape: f32[36,4], index: 1, kind: input, shape index: {}]   ;;  %s2453_s2 = inlined_call_operand.vmem [shape: f32[2,16,16,4], index: 2, kind: output, shape index: {0}]   ;;  %s2454_s3 = inlined_call_operand.vmem [shape: f32[2,2,2,4], index: 3, kind: output, shape index: {1}]  }
   0x1   :  { %s1661_s14 = smov 0   ;;  %s1663_s15 = smov 0  }
   0x2   :  { %s1665_s16 = smov 0  }
   0x3 LB: > { %s23_s17 = sadd.s32 1, %s1625_s14  ;;  %s26_s18 = sadd.s32 1, %s1629_s15  ;;  %s1633_s16 = sphi %s1665_s16, %s14_s16   ;;  %s1629_s15 = sphi %s1663_s15, %s2458_s15   ;;  %s1625_s14 = sphi %s1661_s14, %s2457_s14   ;;  %s1621_s13 = sphi %s1659_s13, %s2456_s13   ;;  %s1617_s12 = sphi %s1657_s12, %s2455_s12  }
   0x4   : > { %p24_p0 = scmp.ge.s32.totalorder %s23_s17, 2  ;;  %p1466_p1 = scmp.ge.s32.totalorder %s1633_s16, 1 }
   0x5   : > { %p156_p2 = scmp.lt.s32.totalorder %s1633_s16, 5 }
   0x6   : > { %s2460_s17 = smov (%p24_p0, %s23_s17), 0  ;;  %s2462_s18 = smov (!%p24_p0, %s26_s18), %s1629_s15 }
   0x7   : > { %p157_p3 = pnand %p1466_p1, %p156_p2  ;;  %p28_p4 = scmp.ge.s32.totalorder %s2462_s18, 2 }
   0x8   : > { %p193_p5 = scmp.lt.s32.totalorder (!%p157_p3), %s1621_s13, 1  ;;  %s1534_s19 = sshll.u32 (!%p157_p3), %s1617_s12, 7 }
   0x9   : > { %s2464_s18 = smov (%p28_p4, %s2462_s18), 0  ;;  %160 = sbr.rel (%p157_p3) target bundleno = 590 (0x24e), region = 28 }
   0xa   : > { %s1635_s25 = smov (!%p157_p3), 4   ;;  %s1636_s26 = smov (!%p157_p3), 8  }
   0xb   : > { %s1729_s27 = sshll.u32 (!%p157_p3), %s1617_s12, 3  ;;  %p211_p11 = scmp.lt.s32.totalorder (!%p157_p3), %s1617_s12, 1 }
   0xc   : > { %s1476_s28 = sadd.s32 (!%p157_p3), 4294967295, %s1729_s27  ;;  %s1770_s4 = sadd.s32 (!%p157_p3), 8, %s1729_s27 }
   0xd   : > { %p219_p6 = scmp.gt.s32.totalorder (!%p157_p3), %s1476_s28, 0  ;;  %p256_p7 = scmp.eq.s32.totalorder (!%p157_p3), %s1770_s4, 16 }
   0xe   : > { %s2466_s13 = smov (!%p193_p5, %s1621_s13), 1  ;;  %vm846_vm0 = vcmask 1046528   ;;  %vm282_vm1 = vcmask 1040384   ;;  %p244_p8 = scmp.lt.s32.totalorder %s1770_s4, 15  ;;  %v611_v40 = vld [vmem:[%s2452_s1 + $0x14] sm:$0xf] }
   0xf   : > { %s1533_s20 = sshll.u32 %s2466_s13, 8  ;;  %s2468_s28 = smov (!%p219_p6, %s1476_s28), 0  ;;  %vm661_vm2 = vcmask 1043456   ;;  %v610_v42 = vld [vmem:[%s2452_s1 + $0xc] sm:$0xff]  ;;  %v481_v43 = vld [vmem:[%s2452_s1 + $0x8] sm:$0xf] }
  0x10   : > { %s1696_s23 = scalar_lea.vmem %s2451_s0, %s1533_s20  ;;  %s1477_s29 = sshll.u32 %s2468_s28, 4  ;;  %1480 = vmatpush.msk.msra.mxu0 %vm661_vm2, %v611_v40  ;;  %1535 = vmatpush.msk.msra.mxu3 %vm661_vm2, %v611_v40  ;;  %v480_v46 = vld [vmem:[%s2452_s1] sm:$0xff]  ;;  %v1914_v50 = vld [vmem:[%s2452_s1 + $0x18] sm:$0xff]  ;;  %vm463_vm3 = vcmask 64512   ;;  %vm446_vm4 = vcmask 31744   ;;  %vm612_vm5 = vcmask 97280  }
  0x11   : > { %s1699_s24 = scalar_lea.vmem %s1696_s23, %s1534_s19  ;;  %s1754_s30 = scalar_lea.vmem %s1696_s23, %s1477_s29  ;;  %1497 = vmatpush.msk.msra.mxu1 %vm661_vm2, %v481_v43  ;;  %v1902_v47 = vld [vmem:[%s2452_s1 + $0x20] sm:$0xf]  ;;  %vm1317_vm6 = vcmask 25600  }
  0x12   : > { %v1702_v0 = vld [vmem:[%s1699_s24] sm:$0xff]  ;;  %v1705_v1 = vld [vmem:[%s1699_s24 + $0x8] sm:$0xff]  ;;  %v1708_v2 = vld [vmem:[%s1699_s24 + $0x10] sm:$0xff]  ;;  %s245_s5 = scalar_select %p244_p8, %s1770_s4, 15  ;;  %680 = vmatpush.msra.mxu0 %v610_v42  ;;  %1536 = vmatpush.msra.mxu3 %v610_v42 }
  0x13   : > { %482 = vrot.lane.b32.xlu1 %v1702_v0, %s1635_s25  ;;  %v850_v3 = vrot.slane %v1702_v0, 1  ;;  %v851_v4 = vrot.slane %v1705_v1, 1  ;;  %530 = vrot.lane.b32.xlu2 %v1708_v2, %s1636_s26  ;;  %v286_v5 = vrot.slane %v1702_v0, 7  ;;  %v1718_v6 = vld [vmem:[%s1699_s24 + $0x18] sm:$0xff]  ;;  %v289_v7 = vrot.slane %v1708_v2, 7  ;;  %v1751_v15 = vld [vmem:[%s1699_s24 + $0x70] sm:$0xff] }
  0x14   : > { %v853_v9 = vrot.slane %v1708_v2, 1  ;;  %v854_v10 = vrot.slane %v1718_v6, 1  ;;  %v1759_v16 = vld [vmem:[%s1699_s24 + $0x60] sm:$0xff]  ;;  %v287_v17 = vrot.slane %v1705_v1, 7  ;;  %v290_v20 = vrot.slane %v1718_v6, 7  ;;  %v1784_v21 = vld [vmem:[%s1699_s24 + $0x68] sm:$0xff]  ;;  %1537 = vmatpush.msk.msrb.mxu3 %vm661_vm2, %v481_v43  ;;  %796 = vmatpush.msra.mxu1 %v480_v46 }
  0x15   : > { %v1722_v8 = vsel %vm846_vm0, %v850_v3, %v851_v4  ;;  %v1732_v11 = vsel %vm282_vm1, 0.0, %v286_v5  ;;  %v1735_v12 = vsel %vm282_vm1, 0.0, %v289_v7  ;;  %v1748_v14 = vsel %vm846_vm0, %v851_v4, 0.0  ;;  %v1787_v22 = vld [vmem:[%s1699_s24 + $0x28] sm:$0xff]  ;;  %v1797_v24 = vld [vmem:[%s1699_s24 + $0x20] sm:$0xff]  ;;  %v1804_v27 = vld [vmem:[%s1699_s24 + $0x78] sm:$0xff]  ;;  %1514 = vmatpush.msk.msra.mxu2 %vm661_vm2, %v1902_v47 }
  0x16   : > { %913 = vrot.lane.b32.xlu0 %v1722_v8, %s1635_s25  ;;  %v1741_v13 = vsel %vm846_vm0, %v853_v9, %v854_v10  ;;  %v1767_v18 = vsel %vm282_vm1, %v286_v5, %v287_v17  ;;  %v1775_v19 = vsel %vm846_vm0, %v854_v10, 0.0  ;;  %v1792_v23 = vsel %vm282_vm1, %v289_v7, %v290_v20  ;;  %s1479_s6 = sshll.u32 %s245_s5, 4  ;;  %p250_p9 = scmp.eq.s32.totalorder %s1729_s27, 0  ;;  %v1865_v36 = vld [vmem:[%s1699_s24 + $0x30] sm:$0xff]  ;;  %v1868_v37 = vld [vmem:[%s1699_s24 + $0x38] sm:$0xff]  ;;  %1538 = vmatpush.msrb.mxu3 %v480_v46  ;;  %v1969_v20 = vld [vmem:[%s1699_s24 + $0x40] sm:$0xff] }
  0x17   : > { %v857_v25 = vrot.slane %v1787_v22, 1  ;;  %v856_v26 = vrot.slane %v1797_v24, 1  ;;  %v292_v29 = vrot.slane %v1797_v24, 7  ;;  %s1584_s7 = scalar_select %p256_p7, 0, 255  ;;  %v293_v33 = vrot.slane %v1787_v22, 7  ;;  %1110 = vmatpush.msra.mxu2 %v1914_v50 }
  0x18   : > { %s247_s8 = scalar_lea.vmem %s1696_s23, %s1479_s6  ;;  %v859_v38 = vrot.slane %v1865_v36, 1  ;;  %v860_v39 = vrot.slane %v1868_v37, 1  ;;  %v304_v44 = vrot.slane %v1759_v16, 7  ;;  %v295_v48 = vrot.slane %v1865_v36, 7  ;;  %p201_p10 = scmp.lt.s32.totalorder %s1729_s27, 15 }
  0x19   : > { %v1807_v28 = vsel %vm846_vm0, %v856_v26, %v857_v25  ;;  %v1817_v30 = vsel %vm282_vm1, 0.0, %v292_v29  ;;  %v1836_v31 = vsel %vm846_vm0, %v857_v25, 0.0  ;;  %v1841_v32 = vld [vmem:[%s247_s8] sm:%s1584_s7]  ;;  %v1849_v34 = vsel %vm282_vm1, %v292_v29, %v293_v33  ;;  %v1858_v35 = vld [vmem:[%s247_s8 + $0x8] sm:%s1584_s7]  ;;  %s1590_s6 = scalar_select %p250_p9, 0, 255 }
  0x1a   : > { %v1882_v41 = vsel %vm846_vm0, %v859_v38, %v860_v39  ;;  %v1909_v49 = vsel %vm282_vm1, 0.0, %v304_v44  ;;  %v1920_v51 = vsel %vm282_vm1, 0.0, %v295_v48  ;;  %v307_v52 = vrot.slane %v1751_v15, 7  ;;  %v1972_v25 = vld [vmem:[%s1699_s24 + $0x48] sm:$0xff]  ;;  %s2470_s27 = smov (!%p201_p10, %s1729_s27), 15  ;;  %s2472_s12 = smov (!%p211_p11, %s1617_s12), 1 }
  0x1b   : > { %349 = vrot.lane.b32.xlu1 %v1732_v11, %s1635_s25  ;;  %398 = vrot.lane.b32.xlu2 %v1735_v12, %s1636_s26  ;;  %v1931_v55 = vsel %vm846_vm0, %v860_v39, 0.0  ;;  %v296_v56 = vrot.slane %v1868_v37, 7  ;;  %v305_v59 = vrot.slane %v1784_v21, 7  ;;  %v1951_v61 = vld [vmem:[%s1754_s30] sm:%s1590_s6]  ;;  %v862_v29 = vrot.slane %v1969_v20, 1  ;;  %s1473_s9 = sshll.u32 %s2466_s13, 1 }
  0x1c   : > { %v1928_v54 = vsel %vm282_vm1, 0.0, %v307_v52  ;;  %v1954_v63 = vld [vmem:[%s1754_s30 + $0x8] sm:%s1590_s6]  ;;  %v283_v4 = vrot.slane %v1951_v61, 7  ;;  %v847_v10 = vrot.slane %v1951_v61, 1  ;;  %v863_v33 = vrot.slane %v1972_v25, 1  ;;  %s1471_s30 = sshll.u32 %s2466_s13, 5  ;;  %s214_s10 = sadd.s32 %s1473_s9, %s2472_s12 }
  0x1d   : > { %v1941_v58 = vsel %vm282_vm1, %v295_v48, %v296_v56  ;;  %v1963_v9 = vsel %vm282_vm1, %v304_v44, %v305_v59  ;;  %v848_v17 = vrot.slane %v1954_v63, 1  ;;  %v308_v44 = vrot.slane %v1804_v27, 7  ;;  %s1474_s11 = sshll.u32 %s214_s10, 1 }
  0x1e   : > { %962 = vrot.lane.b32.xlu0 %v1741_v13, %s1636_s26  ;;  %v331_v26 = vsel %vm282_vm1, 0.0, %v283_v4  ;;  %v1990_v48 = vsel %vm846_vm0, %v862_v29, %v863_v33  ;;  %v298_v59 = vrot.slane %v1969_v20, 7  ;;  %s216_s21 = scalar_lea.vmem %s2454_s3, %s1474_s11 }
  0x1f   : > { %v849_v38 = vsel %vm846_vm0, %v847_v10, %v848_v17 }
  0x23   : > { %915 = vrot.lane.b32.xlu1 %v1748_v14, %s1635_s25  ;;  %554 = vrot.lane.b32.xlu2 %v1751_v15, %s1636_s26 }
  0x26   : > { %506 = vrot.lane.b32.xlu0 %v1759_v16, %s1635_s25 }
  0x2b   : > { %351 = vrot.lane.b32.xlu1 %v1767_v18, %s1635_s25  ;;  %484 = vrot.lane.b32.xlu2 %v1705_v1, %s1635_s25 }
  0x2e   : > { %964 = vrot.lane.b32.xlu0 %v1775_v19, %s1636_s26 }
  0x33   : > { %532 = vrot.lane.b32.xlu1 %v1718_v6, %s1636_s26  ;;  %508 = vrot.lane.b32.xlu2 %v1784_v21, %s1635_s25 }
  0x36   : > { %400 = vrot.lane.b32.xlu0 %v1792_v23, %s1636_s26 }
  0x3b   : > { %556 = vrot.lane.b32.xlu1 %v1804_v27, %s1636_s26  ;;  %966 = vrot.lane.b32.xlu2 %v1807_v28, %s1636_s26 }
  0x3e   : > { %917 = vrot.lane.b32.xlu0 %v1741_v13, %s1635_s25 }
  0x43   : > { %486 = vrot.lane.b32.xlu1 %v1708_v2, %s1635_s25  ;;  %402 = vrot.lane.b32.xlu2 %v1817_v30, %s1636_s26 }
  0x46   : > { %353 = vrot.lane.b32.xlu0 %v1735_v12, %s1635_s25 }
  0x4b   : > { %510 = vrot.lane.b32.xlu1 %v1751_v15, %s1635_s25  ;;  %919 = vrot.lane.b32.xlu2 %v1775_v19, %s1635_s25 }
  0x4e   : > { %534 = vrot.lane.b32.xlu0 %v1797_v24, %s1636_s26 }
  0x53   : > { %968 = vrot.lane.b32.xlu1 %v1836_v31, %s1636_s26  ;;  %355 = vrot.lane.b32.xlu2 %v1792_v23, %s1635_s25 }
  0x56   : > { %558 = vrot.lane.b32.xlu0 %v1841_v32, %s1636_s26 }
  0x5b   : > { %404 = vrot.lane.b32.xlu1 %v1849_v34, %s1636_s26  ;;  %536 = vrot.lane.b32.xlu2 %v1787_v22, %s1636_s26 }
  0x5e   : > { %488 = vrot.lane.b32.xlu0 %v1718_v6, %s1635_s25 }
  0x63   : > { %921 = vrot.lane.b32.xlu1 %v1807_v28, %s1635_s25  ;;  %560 = vrot.lane.b32.xlu2 %v1858_v35, %s1636_s26 }
  0x66   : > { %512 = vrot.lane.b32.xlu0 %v1804_v27, %s1635_s25 }
  0x6b   : > { %357 = vrot.lane.b32.xlu1 %v1817_v30, %s1635_s25  ;;  %490 = vrot.lane.b32.xlu2 %v1797_v24, %s1635_s25 }
  0x6d   : > { %v531_v45 = vpop.permute.xlu2 %530 }
  0x6e   : > { %970 = vrot.lane.b32.xlu0 %v1882_v41, %s1636_s26 }
  0x73   : > { %538 = vrot.lane.b32.xlu1 %v1865_v36, %s1636_s26  ;;  %373 = vrot.lane.b32.xlu2 %v1909_v49, %s1635_s25 }
  0x75   : > { %v399_v53 = vpop.permute.xlu2 %398 }
  0x76   : > { %406 = vrot.lane.b32.xlu0 %v1920_v51, %s1636_s26 }
  0x7b   : > { %422 = vrot.lane.b32.xlu1 %v1928_v54, %s1636_s26  ;;  %972 = vrot.lane.b32.xlu2 %v1931_v55, %s1636_s26 }
  0x7d   : > { %v555_v57 = vpop.permute.xlu2 %554 }
  0x7e   : > { %923 = vrot.lane.b32.xlu0 %v1836_v31, %s1635_s25 }
  0x83   : > { %492 = vrot.lane.b32.xlu1 %v1787_v22, %s1635_s25  ;;  %408 = vrot.lane.b32.xlu2 %v1941_v58, %s1636_s26 }
  0x85   : > { %v483_v60 = vpop.permute.xlu1 %482  ;;  %v485_v62 = vpop.permute.xlu2 %484 }
  0x86   : > { %v578_v3 = vsel %vm446_vm4, %v1951_v61, %v483_v60  ;;  %359 = vrot.lane.b32.xlu0 %v1849_v34, %s1635_s25  ;;  %v310_v60 = vrot.slane %v1841_v32, 7  ;;  %v311_v61 = vrot.slane %v1858_v35, 7 }
  0x87   : > { %v594_v5 = vsel %vm463_vm3, %v578_v3, %v531_v45 }
  0x88   : > { %v914_v7 = vpop.permute.xlu0 %913  ;;  %1481 = vmatmul.msk.f32.vlgmr.msra.gmra.mxu0 %vm612_vm5, %v594_v5  ;;  %v312_v29 = vsel %vm282_vm1, %v310_v60, %v311_v61 }
  0x89   : > { %v1010_v45 = vsel %vm446_vm4, %v849_v38, %v914_v7  ;;  %v2004_v7 = vld [vmem:[%s1699_s24 + $0x50] sm:$0xff] }
  0x8b   : > { %375 = vrot.lane.b32.xlu1 %v1963_v9, %s1635_s25  ;;  %925 = vrot.lane.b32.xlu2 %v1882_v41, %s1635_s25 }
  0x8d   : > { %v350_v39 = vpop.permute.xlu1 %349  ;;  %v509_v40 = vpop.permute.xlu2 %508 }
  0x8e   : > { %v447_v42 = vsel %vm446_vm4, %v331_v26, %v350_v39  ;;  %540 = vrot.lane.b32.xlu0 %v1868_v37, %s1636_s26  ;;  %v2007_v26 = vsel %vm282_vm1, 0.0, %v298_v59  ;;  %v895_v39 = vsel %vm846_vm0, %v848_v17, 0.0 }
  0x8f   : > { %v464_v43 = vsel %vm463_vm3, %v447_v42, %v399_v53  ;;  %v309_v53 = vsel %vm282_vm1, %v307_v52, %v308_v44 }
  0x90   : > { %v963_v46 = vpop.permute.xlu0 %962  ;;  %1498 = vmatmul.msk.f32.vlgmr.msra.gmra.mxu1 %vm612_vm5, %v464_v43 }
  0x91   : > { %v1026_v56 = vsel %vm463_vm3, %v1010_v45, %v963_v46  ;;  %v284_v45 = vrot.slane %v1954_v63, 7 }
  0x92   : > { %1515 = vmatmul.msk.f32.vlgmr.msra.gmra.mxu2 %vm612_vm5, %v1026_v56  ;;  %v340_v56 = vsel %vm282_vm1, 0.0, %v310_v60 }
  0x93   : > { %974 = vrot.lane.b32.xlu1 %v1990_v48, %s1636_s26  ;;  %361 = vrot.lane.b32.xlu2 %v1920_v51, %s1635_s25 }
  0x95   : > { %v916_v3 = vpop.permute.xlu1 %915  ;;  %v967_v5 = vpop.permute.xlu2 %966 }
  0x96   : > { %424 = vrot.lane.b32.xlu0 %v309_v53, %s1636_s26 }
  0x98   : > { %v507_v10 = vpop.permute.xlu0 %506 }
  0x99   : > { %v590_v52 = vsel %vm446_vm4, %v2004_v7, %v507_v10  ;;  %v2041_v10 = vld [vmem:[%s1699_s24 + $0x58] sm:$0xff]  ;;  %s1470_s24 = sshll.u32 %s2470_s27, 1 }
  0x9a   : > { %v606_v38 = vsel %vm463_vm3, %v590_v52, %v555_v57  ;;  %v1011_v57 = vsel %vm446_vm4, %v895_v39, %v916_v3  ;;  %s205_s7 = sadd.s32 %s1471_s30, %s1470_s24 }
  0x9b   : > { %1493 = vmatmul.msk.f32.vlgmr.msra.gmra.mxu3 %vm612_vm5, %v606_v38  ;;  %410 = vrot.lane.b32.xlu1 %v2007_v26, %s1636_s26 }
  0x9c   : > { %542 = vrot.lane.b32.xlu2 %v1969_v20, %s1636_s26  ;;  %1539 = vmatpush.msk.msra.mxu3 %vm661_vm2, %v1902_v47  ;;  %v579_v47 = vsel %vm446_vm4, %v1954_v63, %v485_v62 }
  0x9d   : > { %v352_v42 = vpop.permute.xlu1 %351  ;;  %v403_v43 = vpop.permute.xlu2 %402 }
  0x9e   : > { %494 = vrot.lane.b32.xlu0 %v1865_v36, %s1635_s25  ;;  %1540 = vmatpush.msra.mxu3 %v1914_v50  ;;  %v285_v50 = vsel %vm282_vm1, %v283_v4, %v284_v45  ;;  %v591_v4 = vsel %vm446_vm4, %v2041_v10, %v509_v40  ;;  %v299_v40 = vrot.slane %v1972_v25, 7 }
  0x9f   : > { %v448_v60 = vsel %vm446_vm4, %v285_v50, %v352_v42 }
  0xa0   : > { %v965_v44 = vpop.permute.xlu0 %964 }
  0xa1   : > { %v1027_v46 = vsel %vm463_vm3, %v1011_v57, %v965_v44  ;;  %v2066_v44 = vsel %vm282_vm1, %v298_v59, %v299_v40 }
  0xa2   : > { %1516 = vmatmul.msk.f32.gmra.mxu2 %vm612_vm5, %v1027_v46 }
  0xa3   : > { %927 = vrot.lane.b32.xlu1 %v1931_v55, %s1635_s25 }
  0xa4   : > { %426 = vrot.lane.b32.xlu2 %v340_v56, %s1636_s26  ;;  %v865_v56 = vrot.slane %v2004_v7, 1 }
  0xa5   : > { %v533_v17 = vpop.permute.xlu1 %532  ;;  %v920_v61 = vpop.permute.xlu2 %919 }
  0xa6   : > { %377 = vrot.lane.b32.xlu0 %v1928_v54, %s1635_s25  ;;  %v595_v3 = vsel %vm463_vm3, %v579_v47, %v533_v17  ;;  %v2050_v54 = vsel %vm846_vm0, %v863_v33, 0.0  ;;  %v866_v47 = vrot.slane %v2041_v10, 1 }
  0xa7   : > { %1482 = vmatmul.msk.f32.gmra.mxu0 %vm612_vm5, %v595_v3  ;;  %v301_v3 = vrot.slane %v2004_v7, 7 }
  0xa8   : > { %v401_v62 = vpop.permute.xlu0 %400  ;;  %v2076_v50 = vsel %vm846_vm0, %v865_v56, %v866_v47 }
  0xa9   : > { %v465_v63 = vsel %vm463_vm3, %v448_v60, %v401_v62  ;;  %v1013_v62 = vsel %vm446_vm4, %v1748_v14, %v920_v61 }
  0xaa   : > { %1499 = vmatmul.msk.f32.gmra.mxu1 %vm612_vm5, %v465_v63 }
  0xab   : > { %363 = vrot.lane.b32.xlu1 %v1941_v58, %s1635_s25 }
  0xac   : > { %496 = vrot.lane.b32.xlu2 %v1868_v37, %s1635_s25 }
  0xad   : > { %v557_v52 = vpop.permute.xlu1 %556  ;;  %v356_v38 = vpop.permute.xlu2 %355 }
  0xae   : > { %976 = vrot.lane.b32.xlu0 %v2050_v54, %s1636_s26  ;;  %v607_v39 = vsel %vm463_vm3, %v591_v4, %v557_v52  ;;  %v868_v52 = vrot.slane %v1759_v16, 1 }
  0xaf   : > { %1494 = vmatmul.msk.f32.gmra.mxu3 %vm612_vm5, %v607_v39 }
  0xb0   : > { %v918_v42 = vpop.permute.xlu0 %917 }
  0xb1   : > { %v1012_v57 = vsel %vm446_vm4, %v1722_v8, %v918_v42 }
  0xb2   : > { %v1028_v33 = vsel %vm463_vm3, %v1012_v57, %v967_v5  ;;  %v450_v57 = vsel %vm446_vm4, %v1767_v18, %v356_v38 }
  0xb3   : > { %544 = vrot.lane.b32.xlu1 %v1972_v25, %s1636_s26  ;;  %1517 = vmatmul.msk.f32.gmra.mxu2 %vm612_vm5, %v1028_v33  ;;  %v871_v33 = vrot.slane %v1751_v15, 1 }
  0xb4   : > { %379 = vrot.lane.b32.xlu2 %v309_v53, %s1635_s25 }
  0xb5   : > { %v487_v45 = vpop.permute.xlu1 %486  ;;  %v537_v46 = vpop.permute.xlu2 %536 }
  0xb6   : > { %412 = vrot.lane.b32.xlu0 %v2066_v44, %s1636_s26 }
  0xb8   : > { %v354_v8 = vpop.permute.xlu0 %353 }
  0xb9   : > { %v449_v5 = vsel %vm446_vm4, %v1732_v11, %v354_v8  ;;  %v580_v11 = vsel %vm446_vm4, %v1702_v0, %v487_v45  ;;  %v869_v0 = vrot.slane %v1784_v21, 1  ;;  %v872_v45 = vrot.slane %v1804_v27, 1 }
  0xba   : > { %v466_v59 = vsel %vm463_vm3, %v449_v5, %v403_v43 }
  0xbb   : > { %428 = vrot.lane.b32.xlu1 %v312_v29, %s1636_s26  ;;  %1500 = vmatmul.msk.f32.gmra.mxu1 %vm612_vm5, %v466_v59  ;;  %v2090_v29 = vsel %vm282_vm1, 0.0, %v301_v3  ;;  %v2109_v42 = vsel %vm846_vm0, %v868_v52, %v869_v0  ;;  %v2125_v38 = vsel %vm846_vm0, %v871_v33, %v872_v45  ;;  %v2134_v59 = vsel %vm846_vm0, %v866_v47, 0.0 }
  0xbc   : > { %978 = vrot.lane.b32.xlu2 %v2076_v50, %s1636_s26  ;;  %v903_v33 = vsel %vm846_vm0, %v872_v45, 0.0 }
  0xbd   : > { %v511_v53 = vpop.permute.xlu1 %510  ;;  %v561_v17 = vpop.permute.xlu2 %560 }
  0xbe   : > { %929 = vrot.lane.b32.xlu0 %v1990_v48, %s1635_s25  ;;  %v592_v14 = vsel %vm446_vm4, %v1759_v16, %v511_v53  ;;  %v302_v53 = vrot.slane %v2041_v10, 7 }
  0xc0   : > { %v535_v60 = vpop.permute.xlu0 %534 }
  0xc1   : > { %v596_v43 = vsel %vm463_vm3, %v580_v11, %v535_v60 }
  0xc2   : > { %1483 = vmatmul.msk.f32.gmra.mxu0 %vm612_vm5, %v596_v43 }
  0xc3   : > { %498 = vrot.lane.b32.xlu1 %v1969_v20, %s1635_s25 }
  0xc4   : > { %414 = vrot.lane.b32.xlu2 %v2090_v29, %s1636_s26 }
  0xc5   : > { %v969_v63 = vpop.permute.xlu1 %968  ;;  %v491_v4 = vpop.permute.xlu2 %490 }
  0xc6   : > { %365 = vrot.lane.b32.xlu0 %v2007_v26, %s1635_s25  ;;  %v1029_v39 = vsel %vm463_vm3, %v1013_v62, %v969_v63 }
  0xc7   : > { %1518 = vmatmul.msk.f32.gmra.mxu2 %vm612_vm5, %v1029_v39  ;;  %v2157_v39 = vsel %vm846_vm0, %v869_v0, 0.0 }
  0xc8   : > { %v559_v61 = vpop.permute.xlu0 %558 }
  0xc9   : > { %v608_v40 = vsel %vm463_vm3, %v592_v14, %v559_v61  ;;  %v582_v14 = vsel %vm446_vm4, %v1708_v2, %v491_v4 }
  0xca   : > { %1495 = vmatmul.msk.f32.gmra.mxu3 %vm612_vm5, %v608_v40 }
  0xcb   : > { %931 = vrot.lane.b32.xlu1 %v2050_v54, %s1635_s25 }
  0xcc   : > { %937 = vrot.lane.b32.xlu2 %v2109_v42, %s1635_s25 }
  0xcd   : > { %v405_v56 = vpop.permute.xlu1 %404  ;;  %v374_v8 = vpop.permute.xlu2 %373 }
  0xce   : > { %546 = vrot.lane.b32.xlu0 %v2004_v7, %s1636_s26  ;;  %v467_v5 = vsel %vm463_vm3, %v450_v57, %v405_v56  ;;  %v459_v4 = vsel %vm446_vm4, %v2090_v29, %v374_v8 }
  0xcf   : > { %1501 = vmatmul.msk.f32.gmra.mxu1 %vm612_vm5, %v467_v5 }
  0xd0   : > { %v489_v18 = vpop.permute.xlu0 %488 }
  0xd1   : > { %v581_v15 = vsel %vm446_vm4, %v1705_v1, %v489_v18  ;;  %v874_v18 = vrot.slane %v1841_v32, 1 }
  0xd2   : > { %v597_v27 = vsel %vm463_vm3, %v581_v15, %v537_v46  ;;  %v2142_v46 = vsel %vm282_vm1, %v301_v3, %v302_v53  ;;  %v875_v15 = vrot.slane %v1858_v35, 1 }
  0xd3   : > { %986 = vrot.lane.b32.xlu1 %v2125_v38, %s1636_s26  ;;  %1484 = vmatmul.msk.f32.gmra.mxu0 %vm612_vm5, %v597_v27 }
  0xd4   : > { %367 = vrot.lane.b32.xlu2 %v2066_v44, %s1635_s25 }
  0xd5   : > { %v922_v11 = vpop.permute.xlu1 %921  ;;  %v973_v60 = vpop.permute.xlu2 %972 }
  0xd6   : > { %980 = vrot.lane.b32.xlu0 %v2134_v59, %s1636_s26  ;;  %v1014_v3 = vsel %vm446_vm4, %v1741_v13, %v922_v11 }
  0xd8   : > { %v513_v1 = vpop.permute.xlu0 %512 }
  0xd9   : > { %v593_v43 = vsel %vm446_vm4, %v1784_v21, %v513_v1 }
  0xda   : > { %v609_v47 = vsel %vm463_vm3, %v593_v43, %v561_v17 }
  0xdb   : > { %416 = vrot.lane.b32.xlu1 %v2142_v46, %s1636_s26  ;;  %1496 = vmatmul.msk.f32.gmra.mxu3 %vm612_vm5, %v609_v47 }
  0xdc   : > { %548 = vrot.lane.b32.xlu2 %v2041_v10, %s1636_s26 }
  0xdd   : > { %v358_v62 = vpop.permute.xlu1 %357  ;;  %v409_v63 = vpop.permute.xlu2 %408 }
  0xde   : > { %500 = vrot.lane.b32.xlu0 %v1972_v25, %s1635_s25  ;;  %v451_v0 = vsel %vm446_vm4, %v1735_v12, %v358_v62 }
  0xe0   : > { %v971_v52 = vpop.permute.xlu0 %970 }
  0xe1   : > { %v1030_v17 = vsel %vm463_vm3, %v1014_v3, %v971_v52 }
  0xe2   : > { %1519 = vmatmul.msk.f32.gmra.mxu2 %vm612_vm5, %v1030_v17 }
  0xe3   : > { %939 = vrot.lane.b32.xlu1 %v2157_v39, %s1635_s25 }
  0xe4   : > { %982 = vrot.lane.b32.xlu2 %v2109_v42, %s1636_s26 }
  0xe5   : > { %v539_v61 = vpop.permute.xlu1 %538  ;;  %v926_v40 = vpop.permute.xlu2 %925 }
  0xe6   : > { %933 = vrot.lane.b32.xlu0 %v2076_v50, %s1635_s25  ;;  %v598_v13 = vsel %vm463_vm3, %v582_v14, %v539_v61  ;;  %v1016_v43 = vsel %vm446_vm4, %v1807_v28, %v926_v40 }
  0xe7   : > { %1485 = vmatmul.msk.f32.gmra.mxu0 %vm612_vm5, %v598_v13 }
  0xe8   : > { %v407_v57 = vpop.permute.xlu0 %406 }
  0xe9   : > { %v468_v2 = vsel %vm463_vm3, %v451_v0, %v407_v57 }
  0xea   : > { %1502 = vmatmul.msk.f32.gmra.mxu1 %vm612_vm5, %v468_v2 }
  0xeb   : > { %369 = vrot.lane.b32.xlu1 %v2090_v29, %s1635_s25 }
  0xec   : > { %502 = vrot.lane.b32.xlu2 %v2004_v7, %s1635_s25  ;;  %v876_v7 = vsel %vm846_vm0, %v874_v18, %v875_v15 }
  0xed   : > { %v423_v56 = vpop.permute.xlu1 %422  ;;  %v362_v5 = vpop.permute.xlu2 %361 }
  0xee   : > { %v476_v12 = vsel %vm463_vm3, %v459_v4, %v423_v56  ;;  %988 = vrot.lane.b32.xlu0 %v903_v33, %s1636_s26  ;;  %v453_v3 = vsel %vm446_vm4, %v1817_v30, %v362_v5 }
  0xef   : > { %1510 = vmatmul.msk.f32.vlgmr.msrb.gmra.mxu3 %vm612_vm5, %v476_v12 }
  0xf0   : > { %v924_v8 = vpop.permute.xlu0 %923 }
  0xf1   : > { %v1015_v29 = vsel %vm446_vm4, %v1775_v19, %v924_v8 }
  0xf2   : > { %v1031_v45 = vsel %vm463_vm3, %v1015_v29, %v973_v60 }
  0xf3   : > { %550 = vrot.lane.b32.xlu1 %v1759_v16, %s1636_s26  ;;  %1520 = vmatmul.msk.f32.gmra.mxu2 %vm612_vm5, %v1031_v45 }
  0xf4   : > { %935 = vrot.lane.b32.xlu2 %v2134_v59, %s1635_s25 }
  0xf5   : > { %v493_v32 = vpop.permute.xlu1 %492 }
  0xf6   : > { %418 = vrot.lane.b32.xlu0 %v1909_v49, %s1636_s26  ;;  %v543_v35 = vpop.permute.xlu2 %542  ;;  %v583_v60 = vsel %vm446_vm4, %v1718_v6, %v493_v32 }
  0xf8   : > { %v360_v27 = vpop.permute.xlu0 %359 }
  0xf9   : > { %v452_v19 = vsel %vm446_vm4, %v1792_v23, %v360_v27 }
  0xfa   : > { %v469_v53 = vsel %vm463_vm3, %v452_v19, %v409_v63  ;;  %v904_v63 = vsel %vm846_vm0, %v875_v15, 0.0 }
  0xfb   : > { %984 = vrot.lane.b32.xlu1 %v2157_v39, %s1636_s26  ;;  %1503 = vmatmul.msk.f32.gmra.mxu1 %vm612_vm5, %v469_v53 }
  0xfc   : > { %990 = vrot.lane.b32.xlu2 %v876_v7, %s1636_s26 }
  0xfd   : > { %v376_v16 = vpop.permute.xlu1 %375 }
  0xfe   : > { %941 = vrot.lane.b32.xlu0 %v2125_v38, %s1635_s25  ;;  %v427_v11 = vpop.permute.xlu2 %426  ;;  %v460_v28 = vsel %vm446_vm4, %v2142_v46, %v376_v16 }
 0x100   : > { %v541_v1 = vpop.permute.xlu0 %540 }
 0x101   : > { %v599_v23 = vsel %vm463_vm3, %v583_v60, %v541_v1 }
 0x102   : > { %1486 = vmatmul.msk.f32.gmra.mxu0 %vm612_vm5, %v599_v23 }
 0x103   : > { %504 = vrot.lane.b32.xlu1 %v2041_v10, %s1635_s25 }
 0x104   : > { %420 = vrot.lane.b32.xlu2 %v1963_v9, %s1636_s26 }
 0x105   : > { %v975_v38 = vpop.permute.xlu1 %974  ;;  %v682_v13 = vpop.f32.mrf.mxu0 }
 0x106   : > { %371 = vrot.lane.b32.xlu0 %v2142_v46, %s1635_s25  ;;  %v1032_v6 = vsel %vm463_vm3, %v1016_v43, %v975_v38  ;;  %v497_v47 = vpop.permute.xlu2 %496 }
 0x107   : > { %1521 = vmatmul.msk.f32.gmra.mxu2 %vm612_vm5, %v1032_v6  ;;  %v585_v29 = vsel %vm446_vm4, %v1787_v22, %v497_v47 }
 0x108   : > { %v425_v62 = vpop.permute.xlu0 %424 }
 0x109   : > { %v477_v10 = vsel %vm463_vm3, %v460_v28, %v425_v62 }
 0x10a   : > { %1511 = vmatmul.msk.f32.gmra.mxu3 %vm612_vm5, %v477_v10 }
 0x10b   : > { %943 = vrot.lane.b32.xlu1 %v903_v33, %s1635_s25  ;;  %s1472_s25 = sshll.u32 %s205_s7, 3 }
 0x10c   : > { %992 = vrot.lane.b32.xlu2 %v904_v63, %s1636_s26  ;;  %s2244_s8 = scalar_lea.vmem %s2453_s2, %s1472_s25 }
 0x10d   : > { %v411_v52 = vpop.permute.xlu1 %410  ;;  %v798_v61 = vpop.f32.mrf.mxu1 }
 0x10e   : > { %552 = vrot.lane.b32.xlu0 %v1784_v21, %s1636_s26  ;;  %v470_v46 = vsel %vm463_vm3, %v453_v3, %v411_v52  ;;  %v380_v17 = vpop.permute.xlu2 %379  ;;  %v799_v0 = vadd.f32 %v798_v61, %v682_v13 }
 0x10f   : > { %1504 = vmatmul.msk.f32.gmra.mxu1 %vm612_vm5, %v470_v46  ;;  %v462_v22 = vsel %vm446_vm4, %v1963_v9, %v380_v17 }
 0x110   : > { %v495_v14 = vpop.permute.xlu0 %494 }
 0x111   : > { %v584_v30 = vsel %vm446_vm4, %v1797_v24, %v495_v14 }
 0x112   : > { %v600_v40 = vsel %vm463_vm3, %v584_v30, %v543_v35 }
 0x113   : > { %1487 = vmatmul.msk.f32.gmra.mxu0 %vm612_vm5, %v600_v40 }
 0x115   : > { %v928_v21 = vpop.permute.xlu1 %927  ;;  %v1112_v57 = vpop.f32.mrf.mxu2 }
 0x116   : > { %v1160_v2 = vadd.f32 %v1112_v57, %v799_v0  ;;  %v979_v24 = vpop.permute.xlu2 %978  ;;  %v1017_v12 = vsel %vm446_vm4, %v1836_v31, %v928_v21 }
 0x118   : > { %1214 = vst.msk [vmem:[%s2244_s8] sm:$0xff] %vm446_vm4, %v1160_v2  ;;  %v378_v4 = vpop.permute.xlu0 %377 }
 0x119   : > { %v461_v33 = vsel %vm446_vm4, %v1909_v49, %v378_v4 }
 0x11a   : > { %v478_v56 = vsel %vm463_vm3, %v461_v33, %v427_v11  ;;  %v1176_v11 = vsel %vm446_vm4, %v1160_v2, 0.0 }
 0x11b   : > { %1512 = vmatmul.msk.f32.gmra.mxu3 %vm612_vm5, %v478_v56 }
 0x11d   : > { %v364_v5 = vpop.permute.xlu1 %363 }
 0x11e   : > { %v415_v8 = vpop.permute.xlu2 %414  ;;  %v454_v31 = vsel %vm446_vm4, %v1849_v34, %v364_v5 }
 0x120   : > { %v977_v18 = vpop.permute.xlu0 %976 }
 0x121   : > { %v1033_v15 = vsel %vm463_vm3, %v1017_v12, %v977_v18 }
 0x122   : > { %1522 = vmatmul.msk.f32.gmra.mxu2 %vm612_vm5, %v1033_v15 }
 0x124   : > { %v685_v7 = vpop.f32.mrf.mxu0 }
 0x125   : > { %v545_v45 = vpop.permute.xlu1 %544  ;;  %v1115_v19 = vpop.f32.mrf.mxu2 }
 0x126   : > { %v601_v49 = vsel %vm463_vm3, %v585_v29, %v545_v45  ;;  %v938_v1 = vpop.permute.xlu2 %937 }
 0x127   : > { %1488 = vmatmul.msk.f32.gmra.mxu0 %vm612_vm5, %v601_v49  ;;  %v801_v32 = vpop.f32.mrf.mxu1 }
 0x128   : > { %v802_v35 = vadd.f32 %v801_v32, %v685_v7  ;;  %v413_v27 = vpop.permute.xlu0 %412 }
 0x129   : > { %v471_v53 = vsel %vm463_vm3, %v454_v31, %v413_v27 }
 0x12a   : > { %v1161_v16 = vadd.f32 %v1115_v19, %v802_v35  ;;  %1505 = vmatmul.msk.f32.gmra.mxu1 %vm612_vm5, %v471_v53 }
 0x12c   : > { %v1177_v60 = vsel %vm446_vm4, %v1161_v16, 0.0  ;;  %1215 = vst.msk [vmem:[%s2244_s8 + $0x8] sm:$0xff] %vm446_vm4, %v1161_v16 }
 0x12d   : > { %v1178_v23 = vadd.f32 %v1177_v60, %v1176_v11  ;;  %v429_v34 = vpop.permute.xlu1 %428 }
 0x12e   : > { %v479_v43 = vsel %vm463_vm3, %v462_v22, %v429_v34  ;;  %v368_v28 = vpop.permute.xlu2 %367 }
 0x12f   : > { %1513 = vmatmul.msk.f32.gmra.mxu3 %vm612_vm5, %v479_v43 }
 0x130   : > { %v930_v38 = vpop.permute.xlu0 %929 }
 0x131   : > { %v1018_v6 = vsel %vm446_vm4, %v1882_v41, %v930_v38 }
 0x132   : > { %v1034_v47 = vsel %vm463_vm3, %v1018_v6, %v979_v24 }
 0x133   : > { %1523 = vmatmul.msk.f32.gmra.mxu2 %vm612_vm5, %v1034_v47 }
 0x135   : > { %v499_v9 = vpop.permute.xlu1 %498 }
 0x136   : > { %v586_v41 = vsel %vm446_vm4, %v1865_v36, %v499_v9  ;;  %v549_v61 = vpop.permute.xlu2 %548  ;;  %v1118_v30 = vpop.f32.mrf.mxu2 }
 0x138   : > { %v366_v62 = vpop.permute.xlu0 %365  ;;  %v804_v52 = vpop.f32.mrf.mxu1 }
 0x139   : > { %v455_v10 = vsel %vm446_vm4, %v1920_v51, %v366_v62  ;;  %v1022_v51 = vsel %vm446_vm4, %v2076_v50, %v938_v1  ;;  %v456_v50 = vsel %vm446_vm4, %v1941_v58, %v368_v28 }
 0x13a   : > { %v472_v63 = vsel %vm463_vm3, %v455_v10, %v415_v8 }
 0x13b   : > { %1506 = vmatmul.msk.f32.gmra.mxu1 %vm612_vm5, %v472_v63 }
 0x13d   : > { %v932_v3 = vpop.permute.xlu1 %931 }
 0x13e   : > { %v1019_v2 = vsel %vm446_vm4, %v1931_v55, %v932_v3  ;;  %v983_v33 = vpop.permute.xlu2 %982 }
 0x13f   : > { %v688_v46 = vpop.f32.mrf.mxu0 }
 0x140   : > { %v805_v17 = vadd.f32 %v804_v52, %v688_v46  ;;  %v547_v14 = vpop.permute.xlu0 %546 }
 0x141   : > { %v602_v40 = vsel %vm463_vm3, %v586_v41, %v547_v14 }
 0x142   : > { %v1162_v13 = vadd.f32 %v1118_v30, %v805_v17  ;;  %1489 = vmatmul.msk.f32.gmra.mxu0 %vm612_vm5, %v602_v40 }
 0x144   : > { %v1179_v0 = vsel %vm446_vm4, %v1162_v13, 0.0  ;;  %1216 = vst.msk [vmem:[%s2244_s8 + $0x10] sm:$0xff] %vm446_vm4, %v1162_v13 }
 0x145   : > { %v1180_v21 = vadd.f32 %v1179_v0, %v1178_v23  ;;  %v987_v57 = vpop.permute.xlu1 %986 }
 0x146   : > { %v1038_v36 = vsel %vm463_vm3, %v1022_v51, %v987_v57  ;;  %v503_v7 = vpop.permute.xlu2 %502 }
 0x147   : > { %1527 = vmatmul.msk.f32.vlgmr.msra.gmra.mxu3 %vm612_vm5, %v1038_v36  ;;  %v588_v60 = vsel %vm446_vm4, %v1969_v20, %v503_v7 }
 0x148   : > { %v981_v4 = vpop.permute.xlu0 %980 }
 0x149   : > { %v1035_v24 = vsel %vm463_vm3, %v1019_v2, %v981_v4 }
 0x14a   : > { %1524 = vmatmul.msk.f32.gmra.mxu2 %vm612_vm5, %v1035_v24  ;;  %v1121_v29 = vpop.f32.mrf.mxu2 }
 0x14c   : > { %v807_v12 = vpop.f32.mrf.mxu1 }
 0x14d   : > { %v417_v56 = vpop.permute.xlu1 %416 }
 0x14e   : > { %v473_v5 = vsel %vm463_vm3, %v456_v50, %v417_v56  ;;  %v936_v53 = vpop.permute.xlu2 %935 }
 0x14f   : > { %1507 = vmatmul.msk.f32.gmra.mxu1 %vm612_vm5, %v473_v5  ;;  %v1021_v20 = vsel %vm446_vm4, %v2050_v54, %v936_v53 }
 0x150   : > { %v501_v18 = vpop.permute.xlu0 %500  ;;  %v691_v15 = vpop.f32.mrf.mxu0 }
 0x151   : > { %v587_v55 = vsel %vm446_vm4, %v1868_v37, %v501_v18  ;;  %v808_v8 = vadd.f32 %v807_v12, %v691_v15 }
 0x152   : > { %v603_v45 = vsel %vm463_vm3, %v587_v55, %v549_v61 }
 0x153   : > { %v1163_v49 = vadd.f32 %v1121_v29, %v808_v8  ;;  %1490 = vmatmul.msk.f32.gmra.mxu0 %vm612_vm5, %v603_v45 }
 0x155   : > { %v1181_v58 = vsel %vm446_vm4, %v1163_v49, 0.0  ;;  %1217 = vst.msk [vmem:[%s2244_s8 + $0x18] sm:$0xff] %vm446_vm4, %v1163_v49  ;;  %v940_v32 = vpop.permute.xlu1 %939 }
 0x156   : > { %v1182_v31 = vadd.f32 %v1181_v58, %v1180_v21  ;;  %v1023_v16 = vsel %vm446_vm4, %v2134_v59, %v940_v32  ;;  %v991_v6 = vpop.permute.xlu2 %990 }
 0x158   : > { %v934_v35 = vpop.permute.xlu0 %933 }
 0x159   : > { %v1020_v27 = vsel %vm446_vm4, %v1990_v48, %v934_v35 }
 0x15a   : > { %v1036_v37 = vsel %vm463_vm3, %v1020_v27, %v983_v33  ;;  %v718_v33 = vpop.f32.mrf.mxu3 }
 0x15b   : > { %1525 = vmatmul.msk.f32.gmra.mxu2 %vm612_vm5, %v1036_v37 }
 0x15d   : > { %v370_v19 = vpop.permute.xlu1 %369 }
 0x15e   : > { %v457_v43 = vsel %vm446_vm4, %v2007_v26, %v370_v19  ;;  %v421_v41 = vpop.permute.xlu2 %420 }
 0x160   : > { %v989_v22 = vpop.permute.xlu0 %988 }
 0x161   : > { %v1039_v11 = vsel %vm463_vm3, %v1023_v16, %v989_v22 }
 0x162   : > { %1528 = vmatmul.msk.f32.gmra.mxu3 %vm612_vm5, %v1039_v11  ;;  %v721_v5 = vpop.f32.mrf.mxu3 }
 0x164   : > { %v694_v23 = vpop.f32.mrf.mxu0 }
 0x165   : > { %v551_v1 = vpop.permute.xlu1 %550  ;;  %v1124_v47 = vpop.f32.mrf.mxu2 }
 0x166   : > { %v604_v48 = vsel %vm463_vm3, %v588_v60, %v551_v1  ;;  %v993_v30 = vpop.permute.xlu2 %992 }
 0x167   : > { %1491 = vmatmul.msk.f32.gmra.mxu0 %vm612_vm5, %v604_v48  ;;  %v810_v34 = vpop.f32.mrf.mxu1 }
 0x168   : > { %v811_v59 = vadd.f32 %v810_v34, %v694_v23  ;;  %v419_v38 = vpop.permute.xlu0 %418 }
 0x169   : > { %v474_v9 = vsel %vm463_vm3, %v457_v43, %v419_v38 }
 0x16a   : > { %v1164_v28 = vadd.f32 %v1124_v47, %v811_v59  ;;  %1508 = vmatmul.msk.f32.gmra.mxu1 %vm612_vm5, %v474_v9  ;;  %v724_v8 = vpop.f32.mrf.mxu3 }
 0x16c   : > { %v1183_v62 = vsel %vm446_vm4, %v1164_v28, 0.0  ;;  %1218 = vst.msk [vmem:[%s2244_s8 + $0x20] sm:$0xff] %vm446_vm4, %v1164_v28 }
 0x16d   : > { %v1184_v10 = vadd.f32 %v1183_v62, %v1182_v31  ;;  %v985_v63 = vpop.permute.xlu1 %984 }
 0x16e   : > { %v1037_v26 = vsel %vm463_vm3, %v1021_v20, %v985_v63 }
 0x16f   : > { %1526 = vmatmul.msk.f32.gmra.mxu2 %vm612_vm5, %v1037_v26 }
 0x170   : > { %v942_v3 = vpop.permute.xlu0 %941 }
 0x171   : > { %v1024_v52 = vsel %vm446_vm4, %v2109_v42, %v942_v3 }
 0x172   : > { %v1040_v46 = vsel %vm463_vm3, %v1024_v52, %v991_v6  ;;  %v727_v29 = vpop.f32.mrf.mxu3 }
 0x173   : > { %1529 = vmatmul.msk.f32.gmra.mxu3 %vm612_vm5, %v1040_v46 }
 0x175   : > { %v505_v54 = vpop.permute.xlu1 %504 }
 0x176   : > { %v589_v21 = vsel %vm446_vm4, %v1972_v25, %v505_v54 }
 0x178   : > { %v372_v17 = vpop.permute.xlu0 %371  ;;  %v813_v13 = vpop.f32.mrf.mxu1 }
 0x179   : > { %v458_v14 = vsel %vm446_vm4, %v2066_v44, %v372_v17  ;;  %v1127_v44 = vpop.f32.mrf.mxu2 }
 0x17a   : > { %v475_v61 = vsel %vm463_vm3, %v458_v14, %v421_v41  ;;  %v834_v32 = vpop.f32.mrf.mxu3 }
 0x17b   : > { %1509 = vmatmul.msk.f32.gmra.mxu1 %vm612_vm5, %v475_v61  ;;  %v835_v48 = vadd.f32 %v834_v32, %v718_v33 }
 0x17d   : > { %v944_v40 = vpop.permute.xlu1 %943 }
 0x17e   : > { %v1025_v42 = vsel %vm446_vm4, %v2157_v39, %v944_v40 }
 0x17f   : > { %v697_v51 = vpop.f32.mrf.mxu0  ;;  %v1041_v0 = vsel %vm463_vm3, %v1025_v42, %v993_v30 }
 0x180   : > { %v814_v57 = vadd.f32 %v813_v13, %v697_v51  ;;  %v553_v36 = vpop.permute.xlu0 %552  ;;  %1530 = vmatmul.msk.f32.gmra.mxu3 %vm612_vm5, %v1041_v0 }
 0x181   : > { %v605_v2 = vsel %vm463_vm3, %v589_v21, %v553_v36 }
 0x182   : > { %v1165_v4 = vadd.f32 %v1127_v44, %v814_v57  ;;  %1492 = vmatmul.msk.f32.gmra.mxu0 %vm612_vm5, %v605_v2 }
 0x184   : > { %v1185_v39 = vsel %vm446_vm4, %v1165_v4, 0.0  ;;  %1219 = vst.msk [vmem:[%s2244_s8 + $0x28] sm:$0xff] %vm446_vm4, %v1165_v4 }
 0x185   : > { %v1186_v24 = vadd.f32 %v1185_v39, %v1184_v10 }
 0x18a   : > { %v1130_v12 = vpop.f32.mrf.mxu2 }
 0x18c   : > { %v816_v50 = vpop.f32.mrf.mxu1 }
 0x18d   : > { %v837_v37 = vpop.f32.mrf.mxu3 }
 0x18e   : > { %v838_v9 = vadd.f32 %v837_v37, %v721_v5  ;;  %v1233_v37 = vld [vmem:[%s2244_s8 + $0x18] sm:$0xff] }
 0x190   : > { %v700_v56 = vpop.f32.mrf.mxu0 }
 0x191   : > { %v817_v25 = vadd.f32 %v816_v50, %v700_v56 }
 0x193   : > { %v1166_v18 = vadd.f32 %v1130_v12, %v817_v25 }
 0x195   : > { %v1187_v15 = vsel %vm446_vm4, %v1166_v18, 0.0  ;;  %1220 = vst.msk [vmem:[%s2244_s8 + $0x30] sm:$0xff] %vm446_vm4, %v1166_v18 }
 0x196   : > { %v1188_v55 = vadd.f32 %v1187_v15, %v1186_v24 }
 0x19e   : > { %v840_v19 = vpop.f32.mrf.mxu3 }
 0x19f   : > { %v841_v52 = vadd.f32 %v840_v19, %v724_v8 }
 0x1a4   : > { %v703_v45 = vpop.f32.mrf.mxu0 }
 0x1a5   : > { %v1133_v58 = vpop.f32.mrf.mxu2 }
 0x1a7   : > { %v819_v49 = vpop.f32.mrf.mxu1 }
 0x1a8   : > { %v820_v7 = vadd.f32 %v819_v49, %v703_v45 }
 0x1aa   : > { %v1167_v31 = vadd.f32 %v1133_v58, %v820_v7  ;;  %v1230_v7 = vld [vmem:[%s2244_s8] sm:$0xff]  ;;  %v1231_v58 = vld [vmem:[%s2244_s8 + $0x8] sm:$0xff] }
 0x1ac   : > { %v1189_v35 = vsel %vm446_vm4, %v1167_v31, 0.0  ;;  %1221 = vst.msk [vmem:[%s2244_s8 + $0x38] sm:$0xff] %vm446_vm4, %v1167_v31 }
 0x1ad   : > { %v1190_v27 = vadd.f32 %v1189_v35, %v1188_v55  ;;  %v1232_v35 = vld [vmem:[%s2244_s8 + $0x10] sm:$0xff] }
 0x1b2   : > { %v843_v60 = vpop.f32.mrf.mxu3 }
 0x1b3   : > { %v844_v0 = vadd.f32 %v843_v60, %v727_v29 }
 0x1b6   : > { %v1136_v11 = vpop.f32.mrf.mxu2 }
 0x1b8   : > { %v822_v53 = vpop.f32.mrf.mxu1 }
 0x1bf   : > { %v706_v16 = vpop.f32.mrf.mxu0 }
 0x1c0   : > { %v823_v22 = vadd.f32 %v822_v53, %v706_v16 }
 0x1c2   : > { %v1168_v1 = vadd.f32 %v1136_v11, %v823_v22  ;;  %v1234_v22 = vld [vmem:[%s2244_s8 + $0x20] sm:$0xff] }
 0x1c4   : > { %1222 = vst.msk [vmem:[%s2244_s8 + $0x40] sm:$0xff] %vm446_vm4, %v1168_v1  ;;  %v1191_v54 = vsel %vm446_vm4, %v1168_v1, 0.0  ;;  %v1235_v1 = vld [vmem:[%s2244_s8 + $0x28] sm:$0xff] }
 0x1c5   : > { %v1192_v14 = vadd.f32 %v1191_v54, %v1190_v27 }
 0x1ca   : > { %v1148_v23 = vpop.f32.mrf.mxu3 }
 0x1cb   : > { %v1172_v34 = vadd.f32 %v1148_v23, %v835_v48 }
 0x1cc   : > { %v825_v43 = vpop.f32.mrf.mxu1 }
 0x1cd   : > { %1226 = vst.msk [vmem:[%s2244_s8 + $0x60] sm:$0xff] %vm446_vm4, %v1172_v34  ;;  %v1139_v6 = vpop.f32.mrf.mxu2  ;;  %v1199_v39 = vsel %vm446_vm4, %v1172_v34, 0.0 }
 0x1d0   : > { %v709_v59 = vpop.f32.mrf.mxu0 }
 0x1d1   : > { %v826_v38 = vadd.f32 %v825_v43, %v709_v59  ;;  %v1236_v59 = vld [vmem:[%s2244_s8 + $0x30] sm:$0xff] }
 0x1d3   : > { %v1169_v47 = vadd.f32 %v1139_v6, %v826_v38 }
 0x1d5   : > { %1223 = vst.msk [vmem:[%s2244_s8 + $0x48] sm:$0xff] %vm446_vm4, %v1169_v47  ;;  %v1193_v17 = vsel %vm446_vm4, %v1169_v47, 0.0 }
 0x1d6   : > { %v1194_v13 = vadd.f32 %v1193_v17, %v1192_v14 }
 0x1dc   : > { %v1239_v54 = vld [vmem:[%s2244_s8 + $0x48] sm:$0xff] }
 0x1de   : > { %v1142_v26 = vpop.f32.mrf.mxu2 }
 0x1e4   : > { %v712_v62 = vpop.f32.mrf.mxu0 }
 0x1e5   : > { %v1151_v28 = vpop.f32.mrf.mxu3 }
 0x1e6   : > { %v1173_v20 = vadd.f32 %v1151_v28, %v838_v9  ;;  %v1237_v28 = vld [vmem:[%s2244_s8 + $0x38] sm:$0xff] }
 0x1e7   : > { %v828_v10 = vpop.f32.mrf.mxu1 }
 0x1e8   : > { %1227 = vst.msk [vmem:[%s2244_s8 + $0x68] sm:$0xff] %vm446_vm4, %v1173_v20  ;;  %v829_v63 = vadd.f32 %v828_v10, %v712_v62  ;;  %v1201_v33 = vsel %vm446_vm4, %v1173_v20, 0.0 }
 0x1ea   : > { %v1170_v3 = vadd.f32 %v1142_v26, %v829_v63  ;;  %v1238_v26 = vld [vmem:[%s2244_s8 + $0x40] sm:$0xff] }
 0x1ec   : > { %1224 = vst.msk [vmem:[%s2244_s8 + $0x50] sm:$0xff] %vm446_vm4, %v1170_v3  ;;  %v1195_v40 = vsel %vm446_vm4, %v1170_v3, 0.0 }
 0x1ed   : > { %v1196_v57 = vadd.f32 %v1195_v40, %v1194_v13 }
 0x1f2   : > { %v1145_v51 = vpop.f32.mrf.mxu2 }
 0x1f3   : > { %v1240_v40 = vld [vmem:[%s2244_s8 + $0x50] sm:$0xff] }
 0x1f6   : > { %v1154_v46 = vpop.f32.mrf.mxu3 }
 0x1f7   : > { %v1174_v41 = vadd.f32 %v1154_v46, %v841_v52 }
 0x1f8   : > { %v831_v61 = vpop.f32.mrf.mxu1 }
 0x1f9   : > { %1228 = vst.msk [vmem:[%s2244_s8 + $0x70] sm:$0xff] %vm446_vm4, %v1174_v41  ;;  %v1203_v56 = vsel %vm446_vm4, %v1174_v41, 0.0 }
 0x1ff   : > { %v715_v30 = vpop.f32.mrf.mxu0 }
 0x200   : > { %v832_v42 = vadd.f32 %v831_v61, %v715_v30 }
 0x202   : > { %v1171_v21 = vadd.f32 %v1145_v51, %v832_v42 }
 0x203   : > { %v1157_v36 = vpop.f32.mrf.mxu3 }
 0x204   : > { %v1197_v44 = vsel %vm446_vm4, %v1171_v21, 0.0  ;;  %1225 = vst.msk [vmem:[%s2244_s8 + $0x58] sm:$0xff] %vm446_vm4, %v1171_v21  ;;  %v1175_v2 = vadd.f32 %v1157_v36, %v844_v0 }
 0x205   : > { %v1198_v4 = vadd.f32 %v1197_v44, %v1196_v57 }
 0x206   : > { %1229 = vst.msk [vmem:[%s2244_s8 + $0x78] sm:$0xff] %vm446_vm4, %v1175_v2  ;;  %v1205_v5 = vsel %vm446_vm4, %v1175_v2, 0.0 }
 0x207   : > { %v1200_v24 = vadd.f32 %v1199_v39, %v1198_v4  ;;  %v1242_v4 = vld [vmem:[%s2244_s8 + $0x60] sm:$0xff] }
 0x209   : > { %v1202_v50 = vadd.f32 %v1201_v33, %v1200_v24 }
 0x20b   : > { %v1204_v25 = vadd.f32 %v1203_v56, %v1202_v50  ;;  %v1241_v21 = vld [vmem:[%s2244_s8 + $0x58] sm:$0xff]  ;;  %v1243_v56 = vld [vmem:[%s2244_s8 + $0x68] sm:$0xff] }
 0x20d   : > { %v1206_v12 = vadd.f32 %v1205_v5, %v1204_v25 }
 0x20f   : > { %v1207_v18 = vrot.slane %v1206_v12, 4 }
 0x211   : > { %v1208_v15 = vadd.f32 %v1207_v18, %v1206_v12 }
 0x213   : > { %v1209_v55 = vrot.slane %v1208_v15, 2 }
 0x215   : > { %v1210_v8 = vadd.f32 %v1209_v55, %v1208_v15  ;;  %v1244_v15 = vld [vmem:[%s2244_s8 + $0x70] sm:$0xff] }
 0x217   : > { %v1211_v29 = vrot.slane %v1210_v8, 1 }
 0x219   : > { %v1212_v45 = vadd.f32 %v1211_v29, %v1210_v8 }
 0x21b   : > { %v2378_v49 = vmul.f32 0.0078125, %v1212_v45 }
 0x21d   : > { %v1246_v32 = vsub.f32 %v1230_v7, %v2378_v49  ;;  %v1247_v31 = vsub.f32 %v1231_v58, %v2378_v49  ;;  %v1248_v27 = vsub.f32 %v1232_v35, %v2378_v49  ;;  %v1249_v19 = vsub.f32 %v1233_v37, %v2378_v49  ;;  %v1245_v7 = vld [vmem:[%s2244_s8 + $0x78] sm:$0xff] }
 0x21e   : > { %v1250_v11 = vsub.f32 %v1234_v22, %v2378_v49  ;;  %v1251_v48 = vsub.f32 %v1235_v1, %v2378_v49  ;;  %v1252_v6 = vsub.f32 %v1236_v59, %v2378_v49  ;;  %v1253_v62 = vsub.f32 %v1237_v28, %v2378_v49 }
 0x21f   : > { %v1262_v53 = vmul.f32 %v1246_v32, %v1246_v32  ;;  %v1263_v16 = vmul.f32 %v1247_v31, %v1247_v31  ;;  %v1264_v60 = vmul.f32 %v1248_v27, %v1248_v27  ;;  %v1265_v23 = vmul.f32 %v1249_v19, %v1249_v19 }
 0x220   : > { %v1266_v47 = vmul.f32 %v1250_v11, %v1250_v11  ;;  %v1267_v10 = vmul.f32 %v1251_v48, %v1251_v48  ;;  %v1254_v52 = vsub.f32 %v1238_v26, %v2378_v49  ;;  %v1268_v46 = vmul.f32 %v1252_v6, %v1252_v6 }
 0x221   : > { %v1278_v34 = vsel %vm446_vm4, %v1262_v53, 0.0  ;;  %v1279_v43 = vsel %vm446_vm4, %v1263_v16, 0.0  ;;  %v1281_v9 = vsel %vm446_vm4, %v1264_v60, 0.0  ;;  %v1283_v63 = vsel %vm446_vm4, %v1265_v23, 0.0 }
 0x222   : > { %v1280_v38 = vadd.f32 %v1279_v43, %v1278_v34  ;;  %v1285_v41 = vsel %vm446_vm4, %v1266_v47, 0.0  ;;  %v1255_v14 = vsub.f32 %v1239_v54, %v2378_v49  ;;  %v1269_v61 = vmul.f32 %v1253_v62, %v1253_v62 }
 0x223   : > { %v1287_v30 = vsel %vm446_vm4, %v1267_v10, 0.0  ;;  %v1256_v13 = vsub.f32 %v1240_v40, %v2378_v49  ;;  %v1270_v51 = vmul.f32 %v1254_v52, %v1254_v52  ;;  %v1289_v0 = vsel %vm446_vm4, %v1268_v46, 0.0 }
 0x224   : > { %v1282_v20 = vadd.f32 %v1281_v9, %v1280_v38  ;;  %v1257_v36 = vsub.f32 %v1241_v21, %v2378_v49  ;;  %v1271_v44 = vmul.f32 %v1255_v14, %v1255_v14  ;;  %v1291_v2 = vsel %vm446_vm4, %v1269_v61, 0.0 }
 0x225   : > { %v1258_v24 = vsub.f32 %v1242_v4, %v2378_v49  ;;  %v1272_v33 = vmul.f32 %v1256_v13, %v1256_v13  ;;  %v1293_v50 = vsel %vm446_vm4, %v1270_v51, 0.0  ;;  %v1259_v5 = vsub.f32 %v1243_v56, %v2378_v49 }
 0x226   : > { %v1284_v3 = vadd.f32 %v1283_v63, %v1282_v20  ;;  %v1273_v12 = vmul.f32 %v1257_v36, %v1257_v36  ;;  %v1295_v18 = vsel %vm446_vm4, %v1271_v44, 0.0  ;;  %v1260_v8 = vsub.f32 %v1244_v15, %v2378_v49 }
 0x227   : > { %v1274_v29 = vmul.f32 %v1258_v24, %v1258_v24  ;;  %v1297_v45 = vsel %vm446_vm4, %v1272_v33, 0.0  ;;  %v1261_v32 = vsub.f32 %v1245_v7, %v2378_v49  ;;  %v1275_v31 = vmul.f32 %v1259_v5, %v1259_v5 }
 0x228   : > { %v1286_v17 = vadd.f32 %v1285_v41, %v1284_v3  ;;  %v1299_v35 = vsel %vm446_vm4, %v1273_v12, 0.0  ;;  %v1276_v37 = vmul.f32 %v1260_v8, %v1260_v8 }
 0x229   : > { %v1301_v19 = vsel %vm446_vm4, %v1274_v29, 0.0  ;;  %v1277_v16 = vmul.f32 %v1261_v32, %v1261_v32  ;;  %v1303_v22 = vsel %vm446_vm4, %v1275_v31, 0.0 }
 0x22a   : > { %v1288_v42 = vadd.f32 %v1287_v30, %v1286_v17  ;;  %v1305_v60 = vsel %vm446_vm4, %v1276_v37, 0.0 }
 0x22b   : > { %v1307_v48 = vsel %vm446_vm4, %v1277_v16, 0.0 }
 0x22c   : > { %v1290_v57 = vadd.f32 %v1289_v0, %v1288_v42 }
 0x22e   : > { %v1292_v39 = vadd.f32 %v1291_v2, %v1290_v57 }
 0x230   : > { %v1294_v25 = vadd.f32 %v1293_v50, %v1292_v39 }
 0x232   : > { %v1296_v55 = vadd.f32 %v1295_v18, %v1294_v25 }
 0x234   : > { %v1298_v58 = vadd.f32 %v1297_v45, %v1296_v55 }
 0x236   : > { %v1300_v27 = vadd.f32 %v1299_v35, %v1298_v58 }
 0x238   : > { %v1302_v53 = vadd.f32 %v1301_v19, %v1300_v27 }
 0x23a   : > { %v1304_v11 = vadd.f32 %v1303_v22, %v1302_v53 }
 0x23c   : > { %v1306_v1 = vadd.f32 %v1305_v60, %v1304_v11 }
 0x23e   : > { %v1308_v23 = vadd.f32 %v1307_v48, %v1306_v1 }
 0x240   : > { %v1309_v34 = vrot.slane %v1308_v23, 4 }
 0x242   : > { %v1310_v43 = vadd.f32 %v1309_v34, %v1308_v23 }
 0x244   : > { %v1311_v59 = vrot.slane %v1310_v43, 2 }
 0x246   : > { %v1312_v38 = vadd.f32 %v1311_v59, %v1310_v43 }
 0x248   : > { %v1313_v6 = vrot.slane %v1312_v38, 1 }
 0x24a   : > { %v1314_v47 = vadd.f32 %v1313_v6, %v1312_v38 }
 0x24c   : > { %v1316_v9 = vsel %vm282_vm1, %v2378_v49, %v1314_v47 }
 0x24d   : > { %1318 = vst.msk [vmem:[%s216_s21] sm:$0x3] %vm1317_vm6, %v1316_v9 }
 0x24e PF: > { %s14_s16 = sadd.s32 1, %s1633_s16   ;;  %s2455_s12 = smov %s1625_s14 }
 0x24f   : > { %p11_p12 = scmp.ge.s32.totalorder %s14_s16, 6   ;;  %s2456_s13 = smov %s1629_s15 }
 0x250   : > { %s2457_s14 = smov %s2460_s17  ;;  %s2458_s15 = smov %s2464_s18 }
 0x251   :  { %13 = sbr.rel (!%p11_p12) target bundleno = 3 (0x3), region = 73 }

// kernel: _lambda_.4
= control target key start
LH: loop header
LB: loop body
LE: loop exit
PB: predicated region body
PF: predicated region fallthrough
CT: control target
= control target key end

     0   :  { %s1779_s18 = smov 0   ;;  %s1781_s19 = smov 0   ;;  %s2615_s0 = inlined_call_operand.vmem [shape: f32[2,16,16,4], index: 0, kind: input, shape index: {}]   ;;  %s2616_s1 = inlined_call_operand.vmem [shape: f32[36,4], index: 1, kind: input, shape index: {}]   ;;  %s2617_s2 = inlined_call_operand.vmem [shape: f32[1,4], index: 2, kind: input, shape index: {}]   ;;  %s2618_s3 = inlined_call_operand.vmem [shape: f32[1,4], index: 3, kind: input, shape index: {}]   ;;  %s2619_s4 = inlined_call_operand.vmem [shape: f32[2,16,16,4], index: 4, kind: output, shape index: {0}]   ;;  %s2620_s5 = inlined_call_operand.vmem [shape: f32[2,2,2,4], index: 5, kind: output, shape index: {1}]  }
   0x1   :  { %s1783_s20 = smov 0   ;;  %s1785_s21 = smov 0  }
   0x2   :  { %s1787_s22 = smov 0  }
   0x3 LB: > { %s25_s23 = sadd.s32 1, %s1737_s20  ;;  %s28_s24 = sadd.s32 1, %s1741_s21  ;;  %s1745_s22 = sphi %s1787_s22, %s16_s22   ;;  %s1741_s21 = sphi %s1785_s21, %s2628_s21   ;;  %s1737_s20 = sphi %s1783_s20, %s2627_s20   ;;  %s1733_s19 = sphi %s1781_s19, %s2626_s19   ;;  %s1729_s18 = sphi %s1779_s18, %s2625_s18  }
   0x4   : > { %p26_p0 = scmp.ge.s32.totalorder %s25_s23, 2  ;;  %p1588_p1 = scmp.ge.s32.totalorder %s1745_s22, 1 }
   0x5   : > { %p206_p2 = scmp.lt.s32.totalorder %s1745_s22, 5 }
   0x6   : > { %s2630_s23 = smov (%p26_p0, %s25_s23), 0  ;;  %s2632_s24 = smov (!%p26_p0, %s28_s24), %s1741_s21 }
   0x7   : > { %p207_p3 = pnand %p1588_p1, %p206_p2  ;;  %p30_p4 = scmp.ge.s32.totalorder %s2632_s24, 2 }
   0x8   : > { %p247_p5 = scmp.lt.s32.totalorder (!%p207_p3), %s1733_s19, 1  ;;  %s1656_s25 = sshll.u32 (!%p207_p3), %s1729_s18, 7 }
   0x9   : > { %s2634_s24 = smov (%p30_p4, %s2632_s24), 0  ;;  %210 = sbr.rel (%p207_p3) target bundleno = 593 (0x251), region = 36 }
   0xa   : > { %s1747_s10 = smov (!%p207_p3), 4   ;;  %s1748_s11 = smov (!%p207_p3), 8  }
   0xb   : > { %s1925_s12 = sshll.u32 (!%p207_p3), %s1729_s18, 3  ;;  %p265_p11 = scmp.lt.s32.totalorder (!%p207_p3), %s1729_s18, 1 }
   0xc   : > { %s359_s13 = sadd.s32 (!%p207_p3), 8, %s1925_s12  ;;  %s1598_s27 = sadd.s32 (!%p207_p3), 4294967295, %s1925_s12 }
   0xd   : > { %p360_p6 = scmp.lt.s32.totalorder (!%p207_p3), %s359_s13, 15  ;;  %p378_p7 = scmp.eq.s32.totalorder (!%p207_p3), %s359_s13, 16 }
   0xe   : > { %s2636_s19 = smov (!%p247_p5, %s1733_s19), 1  ;;  %v1818_v0 = vld [vmem:[%s2617_s2] ss:$0 sm:$0xff]  ;;  %vm968_vm0 = vcmask 1046528   ;;  %vm404_vm1 = vcmask 1040384   ;;  %vm783_vm3 = vcmask 1043456  }
   0xf   : > { %s1655_s26 = sshll.u32 %s2636_s19, 8  ;;  %v1828_v1 = vld [vmem:[%s2618_s3] ss:$0 sm:$0xff]  ;;  %p275_p8 = scmp.gt.s32.totalorder %s1598_s27, 0  ;;  %vm568_vm5 = vcmask 31744   ;;  %vm585_vm6 = vcmask 64512  }
  0x10   : > { %s1823_s6 = scalar_lea.vmem %s2615_s0, %s1655_s26  ;;  %p372_p9 = scmp.eq.s32.totalorder %s1925_s12, 0  ;;  %vm734_vm7 = vcmask 97280   ;;  %vm1439_vm8 = vcmask 25600  }
  0x11   : > { %s1831_s9 = scalar_lea.vmem %s1823_s6, %s1656_s25  ;;  %s2638_s27 = smov (!%p275_p8, %s1598_s27), 0 }
  0x12   : > { %v307_v2 = vld [vmem:[%s1831_s9 + $0x60] sm:$0xff]  ;;  %v296_v4 = vld [vmem:[%s1831_s9 + $0x8] sm:$0xff]  ;;  %v297_v8 = vld [vmem:[%s1831_s9 + $0x10] sm:$0xff]  ;;  %s361_s14 = scalar_select %p360_p6, %s359_s13, 15 }
  0x13   : > { %v295_v3 = vld [vmem:[%s1831_s9] sm:$0xff]  ;;  %v323_v5 = vmul.f32 %v1818_v0, %v307_v2  ;;  %v312_v7 = vmul.f32 %v1818_v0, %v296_v4  ;;  %v298_v9 = vld [vmem:[%s1831_s9 + $0x18] sm:$0xff]  ;;  %v309_v10 = vld [vmem:[%s1831_s9 + $0x70] sm:$0xff]  ;;  %v313_v11 = vmul.f32 %v1818_v0, %v297_v8  ;;  %s379_s17 = scalar_select %p378_p7, 1, 0 }
  0x14   : > { %v311_v6 = vmul.f32 %v1818_v0, %v295_v3  ;;  %v314_v15 = vmul.f32 %v1818_v0, %v298_v9  ;;  %v325_v17 = vmul.f32 %v1818_v0, %v309_v10  ;;  %v308_v38 = vld [vmem:[%s1831_s9 + $0x68] sm:$0xff]  ;;  %v299_v41 = vld [vmem:[%s1831_s9 + $0x20] sm:$0xff]  ;;  %v310_v47 = vld [vmem:[%s1831_s9 + $0x78] sm:$0xff]  ;;  %s1601_s15 = sshll.u32 %s361_s14, 4  ;;  %s1599_s8 = sshll.u32 %s2638_s27, 4 }
  0x15   : > { %v339_v12 = vadd.f32 %v1828_v1, %v323_v5  ;;  %v328_v14 = vadd.f32 %v1828_v1, %v312_v7  ;;  %v329_v16 = vadd.f32 %v1828_v1, %v313_v11  ;;  %v324_v42 = vmul.f32 %v1818_v0, %v308_v38  ;;  %v300_v43 = vld [vmem:[%s1831_s9 + $0x28] sm:$0xff]  ;;  %s363_s16 = scalar_lea.vmem %s1823_s6, %s1601_s15  ;;  %v301_v11 = vld [vmem:[%s1831_s9 + $0x30] sm:$0xff]  ;;  %s278_s15 = scalar_lea.vmem %s1823_s6, %s1599_s8 }
  0x16   : > { %v327_v13 = vadd.f32 %v1828_v1, %v311_v6  ;;  %v330_v22 = vadd.f32 %v1828_v1, %v314_v15  ;;  %v341_v26 = vadd.f32 %v1828_v1, %v325_v17  ;;  %v316_v44 = vmul.f32 %v1818_v0, %v300_v43  ;;  %v364_v62 = vld [vmem:[%s363_s16] sm:$0xff]  ;;  %v365_v10 = vld [vmem:[%s363_s16 + $0x8] sm:$0xff]  ;;  %s373_s26 = scalar_select %p372_p9, 1, 0 }
  0x17   : > { %v1849_v18 = vmax.f32 %v339_v12, 0.0  ;;  %v1853_v20 = vmax.f32 %v328_v14, 0.0  ;;  %v1855_v21 = vmax.f32 %v329_v16, 0.0  ;;  %v315_v45 = vmul.f32 %v1818_v0, %v299_v41  ;;  %v302_v12 = vld [vmem:[%s1831_s9 + $0x38] sm:$0xff]  ;;  %v732_v38 = vld [vmem:[%s2616_s1 + $0xc] sm:$0xff]  ;;  %p255_p10 = scmp.lt.s32.totalorder %s1925_s12, 15 }
  0x18   : > { %v1851_v19 = vmax.f32 %v327_v13, 0.0  ;;  %v1874_v29 = vmax.f32 %v330_v22, 0.0  ;;  %v1876_v30 = vmax.f32 %v341_v26, 0.0  ;;  %v340_v48 = vadd.f32 %v1828_v1, %v324_v42  ;;  %v603_v42 = vld [vmem:[%s2616_s1 + $0x8] sm:$0xf]  ;;  %s2642_s18 = smov (!%p265_p11, %s1729_s18), 1 }
  0x19   : > { %628 = vrot.lane.b32.xlu0 %v1849_v18, %s1747_s10  ;;  %v973_v24 = vrot.slane %v1853_v20, 1  ;;  %652 = vrot.lane.b32.xlu2 %v1855_v21, %s1748_s11  ;;  %v975_v31 = vrot.slane %v1855_v21, 1  ;;  %v411_v33 = vrot.slane %v1855_v21, 7  ;;  %v409_v37 = vrot.slane %v1853_v20, 7  ;;  %s2640_s12 = smov (!%p255_p10, %s1925_s12), 15  ;;  %s1595_s30 = sshll.u32 %s2636_s19, 1 }
  0x1a   : > { %604 = vrot.lane.b32.xlu1 %v1851_v19, %s1747_s10  ;;  %v972_v23 = vrot.slane %v1851_v19, 1  ;;  %v408_v25 = vrot.slane %v1851_v19, 7  ;;  %v976_v32 = vrot.slane %v1874_v29, 1  ;;  %v412_v46 = vrot.slane %v1874_v29, 7  ;;  %1619 = vmatpush.msk.msra.mxu1 %vm783_vm3, %v603_v42  ;;  %s268_s7 = sadd.s32 %s1595_s30, %s2642_s18 }
  0x1b   : > { %v1891_v35 = vsel %vm968_vm0, %v973_v24, 0.0  ;;  %v1894_v36 = vsel %vm404_vm1, 0.0, %v411_v33  ;;  %v332_v49 = vadd.f32 %v1828_v1, %v316_v44  ;;  %v326_v50 = vmul.f32 %v1818_v0, %v310_v47  ;;  %s1596_s8 = sshll.u32 %s268_s7, 1 }
  0x1c   : > { %v1869_v27 = vsel %vm968_vm0, %v972_v23, %v973_v24  ;;  %v1872_v28 = vsel %vm404_vm1, 0.0, %v408_v25  ;;  %v1888_v34 = vsel %vm968_vm0, %v975_v31, %v976_v32  ;;  %v1905_v39 = vsel %vm968_vm0, %v976_v32, 0.0  ;;  %v733_v32 = vld [vmem:[%s2616_s1 + $0x14] sm:$0xf] }
  0x1d   : > { %v1908_v40 = vsel %vm404_vm1, %v408_v25, %v409_v37  ;;  %v331_v51 = vadd.f32 %v1828_v1, %v315_v45  ;;  %v1931_v52 = vsel %vm404_vm1, %v411_v33, %v412_v46  ;;  %v1933_v53 = vmax.f32 %v340_v48, 0.0  ;;  %1657 = vmatpush.msk.msra.mxu3 %vm783_vm3, %v733_v32  ;;  %1602 = vmatpush.msk.msra.mxu0 %vm783_vm3, %v733_v32  ;;  %v602_v46 = vld [vmem:[%s2616_s1] sm:$0xff] }
  0x1e   : > { %v1936_v54 = vmax.f32 %v332_v49, 0.0  ;;  %v342_v55 = vadd.f32 %v1828_v1, %v326_v50  ;;  %v366_v2 = vmul.f32 %v1818_v0, %v364_v62  ;;  %v380_v4 = vstv %s379_s17  ;;  %918 = vmatpush.msra.mxu1 %v602_v46  ;;  %v1165_v49 = vld [vmem:[%s2616_s1 + $0x20] sm:$0xf] }
  0x1f   : > { %v1943_v56 = vmax.f32 %v331_v51, 0.0  ;;  %vm1979_vm2 = vcmp.eq.s32.totalorder %v380_v4, 1  ;;  %v367_v13 = vmul.f32 %v1818_v0, %v365_v10  ;;  %v317_v15 = vmul.f32 %v1818_v0, %v301_v11  ;;  %1658 = vmatpush.msra.mxu3 %v732_v38  ;;  %802 = vmatpush.msra.mxu0 %v732_v38  ;;  %v279_v51 = vld [vmem:[%s278_s15] sm:$0xff]  ;;  %v304_v10 = vld [vmem:[%s1831_s9 + $0x48] sm:$0xff] }
  0x20   : > { %v979_v57 = vrot.slane %v1936_v54, 1  ;;  %v1949_v59 = vmax.f32 %v342_v55, 0.0  ;;  %v368_v3 = vadd.f32 %v1828_v1, %v366_v2  ;;  %v415_v9 = vrot.slane %v1936_v54, 7  ;;  %1636 = vmatpush.msk.msra.mxu2 %vm783_vm3, %v1165_v49  ;;  %v1164_v55 = vld [vmem:[%s2616_s1 + $0x18] sm:$0xff] }
  0x21   : > { %1035 = vrot.lane.b32.xlu0 %v1869_v27, %s1747_s10  ;;  %676 = vrot.lane.b32.xlu2 %v1876_v30, %s1748_s11  ;;  %v978_v58 = vrot.slane %v1943_v56, 1  ;;  %v414_v61 = vrot.slane %v1943_v56, 7  ;;  %v318_v16 = vmul.f32 %v1818_v0, %v302_v12  ;;  %v369_v17 = vadd.f32 %v1828_v1, %v367_v13 }
  0x22   : > { %471 = vrot.lane.b32.xlu1 %v1872_v28, %s1747_s10  ;;  %v370_v5 = vmax.f32 %v368_v3, 0.0  ;;  %v1988_v8 = vsel %vm968_vm0, %v979_v57, 0.0  ;;  %v333_v22 = vadd.f32 %v1828_v1, %v317_v15  ;;  %v426_v44 = vrot.slane %v1849_v18, 7  ;;  %1659 = vmatpush.msk.msrb.mxu3 %vm783_vm3, %v603_v42 }
  0x23   : > { %v1952_v60 = vsel %vm968_vm0, %v978_v58, %v979_v57  ;;  %v1963_v63 = vsel %vm404_vm1, 0.0, %v414_v61  ;;  %v2001_v14 = vsel %vm404_vm1, %v414_v61, %v415_v9  ;;  %v334_v23 = vadd.f32 %v1828_v1, %v318_v16  ;;  %1232 = vmatpush.msra.mxu2 %v1164_v55  ;;  %v305_v58 = vld [vmem:[%s1831_s9 + $0x50] sm:$0xff]  ;;  %v303_v9 = vld [vmem:[%s1831_s9 + $0x40] sm:$0xff] }
  0x24   : > { %v1985_v7 = vsel %vm1979_vm2, 0.0, %v370_v5  ;;  %v371_v24 = vmax.f32 %v369_v17, 0.0  ;;  %v2014_v25 = vmax.f32 %v333_v22, 0.0  ;;  %1660 = vmatpush.msrb.mxu3 %v602_v46  ;;  %v2065_v48 = vsel %vm404_vm1, 0.0, %v426_v44  ;;  %v280_v5 = vld [vmem:[%s278_s15 + $0x8] sm:$0xff]  ;;  %s270_s15 = scalar_lea.vmem %s2620_s5, %s1596_s8 }
  0x25   : > { %v2016_v26 = vmax.f32 %v334_v23, 0.0  ;;  %v429_v50 = vrot.slane %v1876_v30, 7  ;;  %v284_v61 = vmul.f32 %v1818_v0, %v279_v51  ;;  %v321_v3 = vmul.f32 %v1818_v0, %v305_v58 }
  0x26   : > { %v2020_v31 = vsel %vm1979_vm2, 0.0, %v371_v24  ;;  %v981_v33 = vrot.slane %v2014_v25, 1  ;;  %v417_v43 = vrot.slane %v2014_v25, 7  ;;  %v374_v6 = vstv %s373_s26 }
  0x27   : > { %v982_v37 = vrot.slane %v2016_v26, 1  ;;  %v2087_v62 = vsel %vm404_vm1, 0.0, %v429_v50  ;;  %v289_v4 = vadd.f32 %v1828_v1, %v284_v61  ;;  %v418_v11 = vrot.slane %v2016_v26, 7 }
  0x28   : > { %v2059_v47 = vsel %vm404_vm1, 0.0, %v417_v43  ;;  %v337_v12 = vadd.f32 %v1828_v1, %v321_v3  ;;  %v285_v15 = vmul.f32 %v1818_v0, %v280_v5  ;;  %vm2105_vm4 = vcmp.eq.s32.totalorder %v374_v6, 1 }
  0x29   : > { %1084 = vrot.lane.b32.xlu0 %v1888_v34, %s1748_s11  ;;  %520 = vrot.lane.b32.xlu2 %v1894_v36, %s1748_s11  ;;  %v2040_v41 = vsel %vm968_vm0, %v981_v33, %v982_v37  ;;  %v2090_v2 = vsel %vm968_vm0, %v982_v37, 0.0  ;;  %v291_v16 = vmax.f32 %v289_v4, 0.0  ;;  %v319_v22 = vmul.f32 %v1818_v0, %v303_v9 }
  0x2a   : > { %1037 = vrot.lane.b32.xlu1 %v1891_v35, %s1747_s10  ;;  %v320_v23 = vmul.f32 %v1818_v0, %v304_v10  ;;  %v2112_v24 = vsel %vm404_vm1, %v417_v43, %v418_v11  ;;  %v2114_v32 = vmax.f32 %v337_v12, 0.0  ;;  %v290_v33 = vadd.f32 %v1828_v1, %v285_v15 }
  0x2b   : > { %v2123_v37 = vsel %vm2105_vm4, 0.0, %v291_v16  ;;  %v427_v38 = vrot.slane %v1933_v53, 7  ;;  %v335_v42 = vadd.f32 %v1828_v1, %v319_v22 }
  0x2c   : > { %v336_v43 = vadd.f32 %v1828_v1, %v320_v23  ;;  %v292_v4 = vmax.f32 %v290_v33, 0.0  ;;  %v405_v9 = vrot.slane %v2123_v37, 7  ;;  %v969_v22 = vrot.slane %v2123_v37, 1 }
  0x2d   : > { %v2143_v10 = vsel %vm404_vm1, %v426_v44, %v427_v38  ;;  %v2146_v11 = vmax.f32 %v335_v42, 0.0 }
  0x2e   : > { %v2148_v12 = vmax.f32 %v336_v43, 0.0  ;;  %v453_v44 = vsel %vm404_vm1, 0.0, %v405_v9 }
  0x2f   : > { %v984_v15 = vrot.slane %v2146_v11, 1 }
  0x30   : > { %v985_v16 = vrot.slane %v2148_v12, 1 }
  0x31   : > { %1086 = vrot.lane.b32.xlu0 %v1905_v39, %s1748_s11  ;;  %606 = vrot.lane.b32.xlu2 %v1853_v20, %s1747_s10 }
  0x32   : > { %473 = vrot.lane.b32.xlu1 %v1908_v40, %s1747_s10 }
  0x39   : > { %522 = vrot.lane.b32.xlu0 %v1931_v52, %s1748_s11  ;;  %630 = vrot.lane.b32.xlu2 %v1933_v53, %s1747_s10 }
  0x3a   : > { %654 = vrot.lane.b32.xlu1 %v1874_v29, %s1748_s11 }
  0x41   : > { %1039 = vrot.lane.b32.xlu0 %v1888_v34, %s1747_s10  ;;  %1088 = vrot.lane.b32.xlu2 %v1952_v60, %s1748_s11 }
  0x42   : > { %678 = vrot.lane.b32.xlu1 %v1949_v59, %s1748_s11 }
  0x49   : > { %475 = vrot.lane.b32.xlu0 %v1894_v36, %s1747_s10  ;;  %524 = vrot.lane.b32.xlu2 %v1963_v63, %s1748_s11 }
  0x4a   : > { %608 = vrot.lane.b32.xlu1 %v1855_v21, %s1747_s10 }
  0x51   : > { %656 = vrot.lane.b32.xlu0 %v1943_v56, %s1748_s11  ;;  %1041 = vrot.lane.b32.xlu2 %v1905_v39, %s1747_s10 }
  0x52   : > { %632 = vrot.lane.b32.xlu1 %v1876_v30, %s1747_s10 }
  0x59   : > { %680 = vrot.lane.b32.xlu0 %v1985_v7, %s1748_s11  ;;  %477 = vrot.lane.b32.xlu2 %v1931_v52, %s1747_s10 }
  0x5a   : > { %1090 = vrot.lane.b32.xlu1 %v1988_v8, %s1748_s11 }
  0x61   : > { %610 = vrot.lane.b32.xlu0 %v1874_v29, %s1747_s10  ;;  %658 = vrot.lane.b32.xlu2 %v1936_v54, %s1748_s11 }
  0x62   : > { %526 = vrot.lane.b32.xlu1 %v2001_v14, %s1748_s11 }
  0x69   : > { %634 = vrot.lane.b32.xlu0 %v1949_v59, %s1747_s10  ;;  %682 = vrot.lane.b32.xlu2 %v2020_v31, %s1748_s11 }
  0x6a   : > { %1043 = vrot.lane.b32.xlu1 %v1952_v60, %s1747_s10 }
  0x71   : > { %1092 = vrot.lane.b32.xlu0 %v2040_v41, %s1748_s11  ;;  %612 = vrot.lane.b32.xlu2 %v1943_v56, %s1747_s10 }
  0x72   : > { %479 = vrot.lane.b32.xlu1 %v1963_v63, %s1747_s10 }
  0x73   : > { %v653_v45 = vpop.permute.xlu2 %652 }
  0x79   : > { %528 = vrot.lane.b32.xlu0 %v2059_v47, %s1748_s11  ;;  %495 = vrot.lane.b32.xlu2 %v2065_v48, %s1747_s10 }
  0x7a   : > { %660 = vrot.lane.b32.xlu1 %v2014_v25, %s1748_s11 }
  0x7b   : > { %v677_v57 = vpop.permute.xlu2 %676 }
  0x81   : > { %1045 = vrot.lane.b32.xlu0 %v1988_v8, %s1747_s10  ;;  %1094 = vrot.lane.b32.xlu2 %v2090_v2, %s1748_s11 }
  0x82   : > { %544 = vrot.lane.b32.xlu1 %v2087_v62, %s1748_s11 }
  0x83   : > { %v521_v13 = vpop.permute.xlu2 %520 }
  0x89   : > { %481 = vrot.lane.b32.xlu0 %v2001_v14, %s1747_s10  ;;  %530 = vrot.lane.b32.xlu2 %v2112_v24, %s1748_s11 }
  0x8a   : > { %614 = vrot.lane.b32.xlu1 %v1936_v54, %s1747_s10 }
  0x8b   : > { %v629_v46 = vpop.permute.xlu0 %628  ;;  %v2134_v3 = vpop.permute.xlu2 %606 }
  0x8c   : > { %v605_v51 = vpop.permute.xlu1 %604  ;;  %v712_v58 = vsel %vm568_vm5, %v2114_v32, %v629_v46  ;;  %v2171_v46 = vsel %vm968_vm0, %v984_v15, %v985_v16 }
  0x8d   : > { %v700_v61 = vsel %vm568_vm5, %v2123_v37, %v605_v51  ;;  %v728_v5 = vsel %vm585_vm6, %v712_v58, %v677_v57  ;;  %v430_v57 = vrot.slane %v1949_v59, 7  ;;  %v420_v37 = vrot.slane %v2146_v11, 7 }
  0x8e   : > { %v716_v6 = vsel %vm585_vm6, %v700_v61, %v653_v45  ;;  %1615 = vmatmul.msk.f32.vlgmr.msra.gmra.mxu3 %vm734_vm7, %v728_v5  ;;  %v377_v45 = vsel %vm2105_vm4, 0.0, %v292_v4  ;;  %v433_v61 = vrot.slane %v2020_v31, 7 }
  0x8f   : > { %1603 = vmatmul.msk.f32.vlgmr.msra.gmra.mxu0 %vm734_vm7, %v716_v6  ;;  %1661 = vmatpush.msk.msra.mxu3 %vm783_vm3, %v1165_v49  ;;  %v970_v23 = vrot.slane %v377_v45, 1  ;;  %v431_v43 = vsel %vm404_vm1, %v429_v50, %v430_v57  ;;  %v432_v50 = vrot.slane %v1985_v7, 7  ;;  %v2186_v6 = vsel %vm404_vm1, 0.0, %v420_v37 }
  0x91   : > { %662 = vrot.lane.b32.xlu0 %v2016_v26, %s1748_s11  ;;  %1047 = vrot.lane.b32.xlu2 %v2040_v41, %s1747_s10  ;;  %v434_v57 = vsel %vm404_vm1, %v432_v50, %v433_v61  ;;  %v701_v61 = vsel %vm568_vm5, %v377_v45, %v2134_v3 }
  0x92   : > { %497 = vrot.lane.b32.xlu1 %v2143_v10, %s1747_s10  ;;  %1662 = vmatpush.msra.mxu3 %v1164_v55  ;;  %v971_v55 = vsel %vm968_vm0, %v969_v22, %v970_v23  ;;  %v406_v22 = vrot.slane %v377_v45, 7 }
  0x93   : > { %v1036_v49 = vpop.permute.xlu0 %1035  ;;  %v631_v38 = vpop.permute.xlu2 %630 }
  0x94   : > { %v472_v17 = vpop.permute.xlu1 %471 }
  0x95   : > { %v569_v33 = vsel %vm568_vm5, %v453_v44, %v472_v17  ;;  %v1017_v44 = vsel %vm968_vm0, %v970_v23, 0.0 }
  0x96   : > { %v586_v42 = vsel %vm585_vm6, %v569_v33, %v521_v13  ;;  %v1132_v13 = vsel %vm568_vm5, %v971_v55, %v1036_v49 }
  0x97   : > { %1620 = vmatmul.msk.f32.vlgmr.msra.gmra.mxu1 %vm734_vm7, %v586_v42  ;;  %v306_v42 = vld [vmem:[%s1831_s9 + $0x58] sm:$0xff]  ;;  %s1592_s9 = sshll.u32 %s2640_s12, 1 }
  0x98   : > { %v322_v55 = vmul.f32 %v1818_v0, %v306_v42 }
  0x99   : > { %546 = vrot.lane.b32.xlu0 %v431_v43, %s1748_s11  ;;  %483 = vrot.lane.b32.xlu2 %v2059_v47, %s1747_s10 }
  0x9a   : > { %1096 = vrot.lane.b32.xlu1 %v2171_v46, %s1748_s11  ;;  %v338_v0 = vadd.f32 %v1828_v1, %v322_v55  ;;  %v421_v1 = vrot.slane %v2148_v12, 7 }
  0x9b   : > { %v1085_v51 = vpop.permute.xlu0 %1084  ;;  %v1089_v5 = vpop.permute.xlu2 %1088 }
  0x9c   : > { %v1038_v58 = vpop.permute.xlu1 %1037  ;;  %v1148_v4 = vsel %vm585_vm6, %v1132_v13, %v1085_v51  ;;  %v462_v13 = vsel %vm404_vm1, 0.0, %v432_v50  ;;  %v407_v51 = vsel %vm404_vm1, %v405_v9, %v406_v22  ;;  %v2237_v55 = vsel %vm404_vm1, %v420_v37, %v421_v1 }
  0x9d   : > { %1637 = vmatmul.msk.f32.vlgmr.msra.gmra.mxu2 %vm734_vm7, %v1148_v4  ;;  %v1133_v15 = vsel %vm568_vm5, %v1017_v44, %v1038_v58 }
  0xa1   : > { %616 = vrot.lane.b32.xlu0 %v2014_v25, %s1747_s10  ;;  %664 = vrot.lane.b32.xlu2 %v2146_v11, %s1748_s11 }
  0xa2   : > { %532 = vrot.lane.b32.xlu1 %v2186_v6, %s1748_s11 }
  0xa3   : > { %v1087_v49 = vpop.permute.xlu0 %1086  ;;  %v525_v23 = vpop.permute.xlu2 %524 }
  0xa4   : > { %v474_v17 = vpop.permute.xlu1 %473  ;;  %v1149_v33 = vsel %vm585_vm6, %v1133_v15, %v1087_v49  ;;  %v2219_v49 = vmax.f32 %v338_v0, 0.0 }
  0xa5   : > { %1638 = vmatmul.msk.f32.gmra.mxu2 %vm734_vm7, %v1149_v33  ;;  %v570_v58 = vsel %vm568_vm5, %v407_v51, %v474_v17  ;;  %v987_v51 = vrot.slane %v2114_v32, 1 }
  0xa6   : > { %v713_v3 = vsel %vm568_vm5, %v2219_v49, %v631_v38 }
  0xa9   : > { %499 = vrot.lane.b32.xlu0 %v2087_v62, %s1747_s10  ;;  %548 = vrot.lane.b32.xlu2 %v462_v13, %s1748_s11  ;;  %v2217_v62 = vsel %vm968_vm0, %v985_v16, 0.0  ;;  %v988_v13 = vrot.slane %v2219_v49, 1 }
  0xaa   : > { %1049 = vrot.lane.b32.xlu1 %v2090_v2, %s1747_s10 }
  0xab   : > { %v523_v4 = vpop.permute.xlu0 %522  ;;  %v1042_v15 = vpop.permute.xlu2 %1041 }
  0xac   : > { %v655_v44 = vpop.permute.xlu1 %654  ;;  %v587_v9 = vsel %vm585_vm6, %v570_v58, %v523_v4 }
  0xad   : > { %v717_v50 = vsel %vm585_vm6, %v701_v61, %v655_v44  ;;  %1621 = vmatmul.msk.f32.gmra.mxu1 %vm734_vm7, %v587_v9  ;;  %v2251_v61 = vsel %vm968_vm0, %v987_v51, %v988_v13 }
  0xae   : > { %1604 = vmatmul.msk.f32.gmra.mxu0 %vm734_vm7, %v717_v50 }
  0xb1   : > { %1098 = vrot.lane.b32.xlu0 %v2217_v62, %s1748_s11  ;;  %618 = vrot.lane.b32.xlu2 %v2016_v26, %s1747_s10 }
  0xb2   : > { %485 = vrot.lane.b32.xlu1 %v2112_v24, %s1747_s10 }
  0xb3   : > { %v1040_v45 = vpop.permute.xlu0 %1039  ;;  %v478_v33 = vpop.permute.xlu2 %477 }
  0xb4   : > { %v679_v17 = vpop.permute.xlu1 %678  ;;  %v1134_v16 = vsel %vm568_vm5, %v1869_v27, %v1040_v45  ;;  %v990_v45 = vrot.slane %v1849_v18, 1 }
  0xb5   : > { %v729_v22 = vsel %vm585_vm6, %v713_v3, %v679_v17  ;;  %v1150_v42 = vsel %vm585_vm6, %v1134_v16, %v1089_v5  ;;  %v991_v3 = vrot.slane %v1933_v53, 1 }
  0xb6   : > { %1616 = vmatmul.msk.f32.gmra.mxu3 %vm734_vm7, %v729_v22  ;;  %1639 = vmatmul.msk.f32.gmra.mxu2 %vm734_vm7, %v1150_v42 }
  0xb7   : > { %v2283_v42 = vsel %vm968_vm0, %v990_v45, %v991_v3 }
  0xb9   : > { %534 = vrot.lane.b32.xlu0 %v2237_v55, %s1748_s11  ;;  %501 = vrot.lane.b32.xlu2 %v431_v43, %s1747_s10 }
  0xba   : > { %666 = vrot.lane.b32.xlu1 %v2148_v12, %s1748_s11 }
  0xbb   : > { %v476_v27 = vpop.permute.xlu0 %475  ;;  %v659_v58 = vpop.permute.xlu2 %658 }
  0xbc   : > { %v609_v38 = vpop.permute.xlu1 %608  ;;  %v571_v5 = vsel %vm568_vm5, %v1872_v28, %v476_v27  ;;  %v572_v27 = vsel %vm568_vm5, %v1908_v40, %v478_v33 }
  0xbd   : > { %v588_v37 = vsel %vm585_vm6, %v571_v5, %v525_v23  ;;  %v702_v43 = vsel %vm568_vm5, %v1851_v19, %v609_v38  ;;  %v423_v23 = vrot.slane %v2114_v32, 7 }
  0xbe   : > { %1622 = vmatmul.msk.f32.gmra.mxu1 %vm734_vm7, %v588_v37 }
  0xbf   : > { %v2264_v50 = vsel %vm404_vm1, 0.0, %v423_v23 }
  0xc1   : > { %1051 = vrot.lane.b32.xlu0 %v2171_v46, %s1747_s10  ;;  %1100 = vrot.lane.b32.xlu2 %v2251_v61, %s1748_s11 }
  0xc2   : > { %550 = vrot.lane.b32.xlu1 %v434_v57, %s1748_s11  ;;  %v1135_v57 = vsel %vm568_vm5, %v1891_v35, %v1042_v15  ;;  %v993_v35 = vrot.slane %v1876_v30, 1  ;;  %v994_v15 = vrot.slane %v1949_v59, 1  ;;  %v2302_v59 = vsel %vm968_vm0, %v988_v13, 0.0 }
  0xc3   : > { %v657_v28 = vpop.permute.xlu0 %656  ;;  %v683_v0 = vpop.permute.xlu2 %682 }
  0xc4   : > { %v633_v4 = vpop.permute.xlu1 %632  ;;  %v718_v44 = vsel %vm585_vm6, %v702_v43, %v657_v28  ;;  %v995_v28 = vsel %vm968_vm0, %v993_v35, %v994_v15 }
  0xc5   : > { %1605 = vmatmul.msk.f32.gmra.mxu0 %vm734_vm7, %v718_v44  ;;  %v714_v19 = vsel %vm568_vm5, %v1849_v18, %v633_v4 }
  0xc9   : > { %487 = vrot.lane.b32.xlu0 %v2186_v6, %s1747_s10  ;;  %536 = vrot.lane.b32.xlu2 %v2264_v50, %s1748_s11 }
  0xca   : > { %620 = vrot.lane.b32.xlu1 %v2146_v11, %s1747_s10 }
  0xcb   : > { %v681_v9 = vpop.permute.xlu0 %680  ;;  %v613_v22 = vpop.permute.xlu2 %612 }
  0xcc   : > { %v1091_v1 = vpop.permute.xlu1 %1090  ;;  %v730_v17 = vsel %vm585_vm6, %v714_v19, %v681_v9  ;;  %v704_v45 = vsel %vm568_vm5, %v1855_v21, %v613_v22  ;;  %v996_v21 = vrot.slane %v1985_v7, 1 }
  0xcd   : > { %v1151_v16 = vsel %vm585_vm6, %v1135_v57, %v1091_v1  ;;  %1617 = vmatmul.msk.f32.gmra.mxu3 %vm734_vm7, %v730_v17 }
  0xce   : > { %1640 = vmatmul.msk.f32.gmra.mxu2 %vm734_vm7, %v1151_v16 }
  0xd1   : > { %668 = vrot.lane.b32.xlu0 %v2114_v32, %s1748_s11  ;;  %1059 = vrot.lane.b32.xlu2 %v2283_v42, %s1747_s10 }
  0xd2   : > { %1053 = vrot.lane.b32.xlu1 %v2217_v62, %s1747_s10 }
  0xd3   : > { %v611_v38 = vpop.permute.xlu0 %610  ;;  %v496_v43 = vpop.permute.xlu2 %495 }
  0xd4   : > { %v527_v51 = vpop.permute.xlu1 %526  ;;  %v703_v5 = vsel %vm568_vm5, %v1853_v20, %v611_v38  ;;  %v424_v20 = vrot.slane %v2219_v49, 7  ;;  %v1025_v38 = vsel %vm968_vm0, %v994_v15, 0.0  ;;  %v581_v22 = vsel %vm568_vm5, %v2264_v50, %v496_v43 }
  0xd5   : > { %v589_v37 = vsel %vm585_vm6, %v572_v27, %v527_v51  ;;  %v719_v30 = vsel %vm585_vm6, %v703_v5, %v659_v58 }
  0xd6   : > { %1623 = vmatmul.msk.f32.gmra.mxu1 %vm734_vm7, %v589_v37  ;;  %1606 = vmatmul.msk.f32.gmra.mxu0 %vm734_vm7, %v719_v30  ;;  %v425_v44 = vsel %vm404_vm1, %v423_v23, %v424_v20  ;;  %v2326_v23 = vsel %vm968_vm0, %v991_v3, 0.0 }
  0xd9   : > { %1102 = vrot.lane.b32.xlu0 %v2302_v59, %s1748_s11  ;;  %489 = vrot.lane.b32.xlu2 %v2237_v55, %s1747_s10 }
  0xda   : > { %1108 = vrot.lane.b32.xlu1 %v995_v28, %s1748_s11 }
  0xdb   : > { %v635_v40 = vpop.permute.xlu0 %634  ;;  %v1095_v4 = vpop.permute.xlu2 %1094 }
  0xdc   : > { %v1044_v33 = vpop.permute.xlu1 %1043  ;;  %v715_v58 = vsel %vm568_vm5, %v1933_v53, %v635_v40 }
  0xdd   : > { %v731_v13 = vsel %vm585_vm6, %v715_v58, %v683_v0  ;;  %v1136_v19 = vsel %vm568_vm5, %v1888_v34, %v1044_v33 }
  0xde   : > { %1618 = vmatmul.msk.f32.gmra.mxu3 %vm734_vm7, %v731_v13 }
  0xe1   : > { %622 = vrot.lane.b32.xlu0 %v2148_v12, %s1747_s10  ;;  %670 = vrot.lane.b32.xlu2 %v2219_v49, %s1748_s11 }
  0xe2   : > { %538 = vrot.lane.b32.xlu1 %v425_v44, %s1748_s11 }
  0xe3   : > { %v1093_v57 = vpop.permute.xlu0 %1092  ;;  %v531_v0 = vpop.permute.xlu2 %530 }
  0xe4   : > { %v480_v9 = vpop.permute.xlu1 %479  ;;  %v1152_v1 = vsel %vm585_vm6, %v1136_v19, %v1093_v57 }
  0xe5   : > { %1641 = vmatmul.msk.f32.gmra.mxu2 %vm734_vm7, %v1152_v1  ;;  %v573_v34 = vsel %vm568_vm5, %v1894_v36, %v480_v9  ;;  %v997_v36 = vrot.slane %v2020_v31, 1 }
  0xe7   : > { %v998_v31 = vsel %vm968_vm0, %v996_v21, %v997_v36 }
  0xe9   : > { %1055 = vrot.lane.b32.xlu0 %v2251_v61, %s1747_s10  ;;  %1104 = vrot.lane.b32.xlu2 %v2283_v42, %s1748_s11 }
  0xea   : > { %1061 = vrot.lane.b32.xlu1 %v2326_v23, %s1747_s10 }
  0xeb   : > { %v529_v17 = vpop.permute.xlu0 %528  ;;  %v1048_v27 = vpop.permute.xlu2 %1047 }
  0xec   : > { %v661_v16 = vpop.permute.xlu1 %660  ;;  %v590_v35 = vsel %vm585_vm6, %v573_v34, %v529_v17 }
  0xed   : > { %v720_v3 = vsel %vm585_vm6, %v704_v45, %v661_v16  ;;  %1624 = vmatmul.msk.f32.gmra.mxu1 %vm734_vm7, %v590_v35 }
  0xee   : > { %1607 = vmatmul.msk.f32.gmra.mxu0 %vm734_vm7, %v720_v3 }
  0xf1   : > { %1110 = vrot.lane.b32.xlu0 %v1025_v38, %s1748_s11  ;;  %624 = vrot.lane.b32.xlu2 %v2114_v32, %s1747_s10 }
  0xf2   : > { %491 = vrot.lane.b32.xlu1 %v2264_v50, %s1747_s10 }
  0xf3   : > { %v1046_v51 = vpop.permute.xlu0 %1045  ;;  %v484_v30 = vpop.permute.xlu2 %483 }
  0xf4   : > { %v545_v5 = vpop.permute.xlu1 %544  ;;  %v1137_v15 = vsel %vm568_vm5, %v1905_v39, %v1046_v51 }
  0xf5   : > { %v598_v37 = vsel %vm585_vm6, %v581_v22, %v545_v5  ;;  %v1153_v7 = vsel %vm585_vm6, %v1137_v15, %v1095_v4 }
  0xf6   : > { %1632 = vmatmul.msk.f32.vlgmr.msrb.gmra.mxu3 %vm734_vm7, %v598_v37  ;;  %1642 = vmatmul.msk.f32.gmra.mxu2 %vm734_vm7, %v1153_v7 }
  0xf9   : > { %540 = vrot.lane.b32.xlu0 %v2065_v48, %s1748_s11  ;;  %1057 = vrot.lane.b32.xlu2 %v2302_v59, %s1747_s10 }
  0xfa   : > { %672 = vrot.lane.b32.xlu1 %v1849_v18, %s1748_s11 }
  0xfb   : > { %v482_v39 = vpop.permute.xlu0 %481  ;;  %v665_v43 = vpop.permute.xlu2 %664 }
  0xfc   : > { %v615_v32 = vpop.permute.xlu1 %614  ;;  %v574_v50 = vsel %vm568_vm5, %v1931_v52, %v482_v39 }
  0xfd   : > { %v591_v20 = vsel %vm585_vm6, %v574_v50, %v531_v0  ;;  %v705_v18 = vsel %vm568_vm5, %v1874_v29, %v615_v32  ;;  %v1138_v29 = vsel %vm568_vm5, %v1952_v60, %v1048_v27  ;;  %v575_v60 = vsel %vm568_vm5, %v1963_v63, %v484_v30 }
  0xfe   : > { %1625 = vmatmul.msk.f32.gmra.mxu1 %vm734_vm7, %v591_v20 }
 0x101   : > { %1063 = vrot.lane.b32.xlu0 %v995_v28, %s1747_s10  ;;  %1112 = vrot.lane.b32.xlu2 %v998_v31, %s1748_s11 }
 0x102   : > { %1106 = vrot.lane.b32.xlu1 %v2326_v23, %s1748_s11 }
 0x103   : > { %v663_v40 = vpop.permute.xlu0 %662  ;;  %v549_v58 = vpop.permute.xlu2 %548 }
 0x104   : > { %v498_v33 = vpop.permute.xlu1 %497  ;;  %v721_v52 = vsel %vm585_vm6, %v705_v18, %v663_v40 }
 0x105   : > { %1608 = vmatmul.msk.f32.gmra.mxu0 %vm734_vm7, %v721_v52  ;;  %v582_v28 = vsel %vm568_vm5, %v425_v44, %v498_v33 }
 0x109   : > { %493 = vrot.lane.b32.xlu0 %v425_v44, %s1747_s10  ;;  %542 = vrot.lane.b32.xlu2 %v2143_v10, %s1748_s11 }
 0x10a   : > { %626 = vrot.lane.b32.xlu1 %v2219_v49, %s1747_s10  ;;  %v1026_v49 = vsel %vm968_vm0, %v997_v36, 0.0 }
 0x10b   : > { %v547_v4 = vpop.permute.xlu0 %546  ;;  %v619_v9 = vpop.permute.xlu2 %618 }
 0x10c   : > { %v1097_v13 = vpop.permute.xlu1 %1096  ;;  %v599_v19 = vsel %vm585_vm6, %v582_v28, %v547_v4  ;;  %v804_v27 = vpop.f32.mrf.mxu0  ;;  %v707_v31 = vsel %vm568_vm5, %v1936_v54, %v619_v9 }
 0x10d   : > { %v1154_v57 = vsel %vm585_vm6, %v1138_v29, %v1097_v13  ;;  %1633 = vmatmul.msk.f32.gmra.mxu3 %vm734_vm7, %v599_v19 }
 0x10e   : > { %1643 = vmatmul.msk.f32.gmra.mxu2 %vm734_vm7, %v1154_v57 }
 0x111   : > { %674 = vrot.lane.b32.xlu0 %v1933_v53, %s1748_s11  ;;  %1114 = vrot.lane.b32.xlu2 %v1026_v49, %s1748_s11 }
 0x112   : > { %1065 = vrot.lane.b32.xlu1 %v1025_v38, %s1747_s10  ;;  %s1593_s10 = sshll.u32 %s2636_s19, 5 }
 0x113   : > { %v617_v44 = vpop.permute.xlu0 %616  ;;  %v502_v45 = vpop.permute.xlu2 %501  ;;  %s259_s11 = sadd.s32 %s1593_s10, %s1592_s9 }
 0x114   : > { %v533_v1 = vpop.permute.xlu1 %532  ;;  %v706_v0 = vsel %vm568_vm5, %v1943_v56, %v617_v44  ;;  %v920_v63 = vpop.f32.mrf.mxu1  ;;  %s1594_s27 = sshll.u32 %s259_s11, 3  ;;  %v584_v52 = vsel %vm568_vm5, %v2143_v10, %v502_v45 }
 0x115   : > { %v592_v34 = vsel %vm585_vm6, %v575_v60, %v533_v1  ;;  %v722_v53 = vsel %vm585_vm6, %v706_v0, %v665_v43  ;;  %v921_v38 = vadd.f32 %v920_v63, %v804_v27  ;;  %s2412_s12 = scalar_lea.vmem %s2619_s4, %s1594_s27 }
 0x116   : > { %1626 = vmatmul.msk.f32.gmra.mxu1 %vm734_vm7, %v592_v34  ;;  %1609 = vmatmul.msk.f32.gmra.mxu0 %vm734_vm7, %v722_v53 }
 0x11b   : > { %v500_v17 = vpop.permute.xlu0 %499  ;;  %v1101_v35 = vpop.permute.xlu2 %1100 }
 0x11c   : > { %v1050_v16 = vpop.permute.xlu1 %1049  ;;  %v583_v3 = vsel %vm568_vm5, %v2065_v48, %v500_v17 }
 0x11d   : > { %v600_v56 = vsel %vm585_vm6, %v583_v3, %v549_v58  ;;  %v1139_v22 = vsel %vm568_vm5, %v1988_v8, %v1050_v16 }
 0x11e   : > { %1634 = vmatmul.msk.f32.gmra.mxu3 %vm734_vm7, %v600_v56 }
 0x120   : > { %v1234_v21 = vpop.f32.mrf.mxu2 }
 0x121   : > { %v1282_v36 = vadd.f32 %v1234_v21, %v921_v38 }
 0x123   : > { %1336 = vst.msk [vmem:[%s2412_s12] sm:$0xff] %vm568_vm5, %v1282_v36  ;;  %v1099_v48 = vpop.permute.xlu0 %1098  ;;  %v537_v15 = vpop.permute.xlu2 %536  ;;  %v1298_v40 = vsel %vm568_vm5, %v1282_v36, 0.0 }
 0x124   : > { %v486_v51 = vpop.permute.xlu1 %485  ;;  %v1155_v5 = vsel %vm585_vm6, %v1139_v22, %v1099_v48 }
 0x125   : > { %1644 = vmatmul.msk.f32.gmra.mxu2 %vm734_vm7, %v1155_v5  ;;  %v576_v7 = vsel %vm568_vm5, %v2001_v14, %v486_v51 }
 0x128   : > { %v1237_v50 = vpop.f32.mrf.mxu2 }
 0x12a   : > { %v923_v30 = vpop.f32.mrf.mxu1 }
 0x12b   : > { %v807_v37 = vpop.f32.mrf.mxu0  ;;  %v535_v8 = vpop.permute.xlu0 %534 }
 0x12c   : > { %v924_v39 = vadd.f32 %v923_v30, %v807_v37  ;;  %v667_v32 = vpop.permute.xlu1 %666  ;;  %v593_v20 = vsel %vm585_vm6, %v576_v7, %v535_v8  ;;  %v1060_v33 = vpop.permute.xlu2 %1059 }
 0x12d   : > { %v723_v43 = vsel %vm585_vm6, %v707_v31, %v667_v32  ;;  %1627 = vmatmul.msk.f32.gmra.mxu1 %vm734_vm7, %v593_v20 }
 0x12e   : > { %v1283_v18 = vadd.f32 %v1237_v50, %v924_v39  ;;  %1610 = vmatmul.msk.f32.gmra.mxu0 %vm734_vm7, %v723_v43 }
 0x130   : > { %v1299_v14 = vsel %vm568_vm5, %v1283_v18, 0.0  ;;  %1337 = vst.msk [vmem:[%s2412_s12 + $0x8] sm:$0xff] %vm568_vm5, %v1283_v18 }
 0x131   : > { %v1300_v54 = vadd.f32 %v1299_v14, %v1298_v40 }
 0x133   : > { %v1052_v58 = vpop.permute.xlu0 %1051 }
 0x134   : > { %v551_v28 = vpop.permute.xlu1 %550  ;;  %v1140_v29 = vsel %vm568_vm5, %v2040_v41, %v1052_v58  ;;  %v490_v19 = vpop.permute.xlu2 %489 }
 0x135   : > { %v601_v4 = vsel %vm585_vm6, %v584_v52, %v551_v28  ;;  %v1156_v13 = vsel %vm585_vm6, %v1140_v29, %v1101_v35  ;;  %v578_v22 = vsel %vm568_vm5, %v2112_v24, %v490_v19 }
 0x136   : > { %1635 = vmatmul.msk.f32.gmra.mxu3 %vm734_vm7, %v601_v4  ;;  %1645 = vmatmul.msk.f32.gmra.mxu2 %vm734_vm7, %v1156_v13 }
 0x139   : > { %v1240_v45 = vpop.f32.mrf.mxu2 }
 0x13b   : > { %v488_v57 = vpop.permute.xlu0 %487  ;;  %v926_v41 = vpop.f32.mrf.mxu1 }
 0x13c   : > { %v621_v9 = vpop.permute.xlu1 %620  ;;  %v577_v10 = vsel %vm568_vm5, %v2059_v47, %v488_v57  ;;  %v671_v17 = vpop.permute.xlu2 %670 }
 0x13d   : > { %v594_v49 = vsel %vm585_vm6, %v577_v10, %v537_v15  ;;  %v708_v44 = vsel %vm568_vm5, %v2014_v25, %v621_v9  ;;  %v1144_v25 = vsel %vm568_vm5, %v2251_v61, %v1060_v33 }
 0x13e   : > { %1628 = vmatmul.msk.f32.gmra.mxu1 %vm734_vm7, %v594_v49 }
 0x142   : > { %v810_v60 = vpop.f32.mrf.mxu0 }
 0x143   : > { %v927_v1 = vadd.f32 %v926_v41, %v810_v60  ;;  %v669_v0 = vpop.permute.xlu0 %668 }
 0x144   : > { %v1054_v34 = vpop.permute.xlu1 %1053  ;;  %v724_v53 = vsel %vm585_vm6, %v708_v44, %v669_v0  ;;  %v1105_v21 = vpop.permute.xlu2 %1104 }
 0x145   : > { %v1284_v16 = vadd.f32 %v1240_v45, %v927_v1  ;;  %1611 = vmatmul.msk.f32.gmra.mxu0 %vm734_vm7, %v724_v53  ;;  %v1141_v3 = vsel %vm568_vm5, %v2090_v2, %v1054_v34 }
 0x147   : > { %v1301_v47 = vsel %vm568_vm5, %v1284_v16, 0.0  ;;  %1338 = vst.msk [vmem:[%s2412_s12 + $0x10] sm:$0xff] %vm568_vm5, %v1284_v16 }
 0x148   : > { %v1302_v63 = vadd.f32 %v1301_v47, %v1300_v54 }
 0x14b   : > { %v1103_v35 = vpop.permute.xlu0 %1102 }
 0x14c   : > { %v1109_v56 = vpop.permute.xlu1 %1108  ;;  %v1157_v38 = vsel %vm585_vm6, %v1141_v3, %v1103_v35  ;;  %v625_v31 = vpop.permute.xlu2 %624 }
 0x14d   : > { %v1160_v27 = vsel %vm585_vm6, %v1144_v25, %v1109_v56  ;;  %1646 = vmatmul.msk.f32.gmra.mxu2 %vm734_vm7, %v1157_v38  ;;  %v710_v52 = vsel %vm568_vm5, %v2146_v11, %v625_v31 }
 0x14e   : > { %1649 = vmatmul.msk.f32.vlgmr.msra.gmra.mxu3 %vm734_vm7, %v1160_v27 }
 0x151   : > { %v1243_v30 = vpop.f32.mrf.mxu2 }
 0x153   : > { %v929_v36 = vpop.f32.mrf.mxu1  ;;  %v623_v2 = vpop.permute.xlu0 %622 }
 0x154   : > { %v539_v48 = vpop.permute.xlu1 %538  ;;  %v709_v61 = vsel %vm568_vm5, %v2016_v26, %v623_v2  ;;  %v813_v51 = vpop.f32.mrf.mxu0 }
 0x155   : > { %v595_v5 = vsel %vm585_vm6, %v578_v22, %v539_v48  ;;  %v930_v15 = vadd.f32 %v929_v36, %v813_v51  ;;  %v725_v37 = vsel %vm585_vm6, %v709_v61, %v671_v17  ;;  %v1058_v43 = vpop.permute.xlu2 %1057 }
 0x156   : > { %1629 = vmatmul.msk.f32.gmra.mxu1 %vm734_vm7, %v595_v5  ;;  %1612 = vmatmul.msk.f32.gmra.mxu0 %vm734_vm7, %v725_v37  ;;  %v1143_v11 = vsel %vm568_vm5, %v2217_v62, %v1058_v43 }
 0x157   : > { %v1285_v7 = vadd.f32 %v1243_v30, %v930_v15 }
 0x159   : > { %v1303_v24 = vsel %vm568_vm5, %v1285_v7, 0.0  ;;  %1339 = vst.msk [vmem:[%s2412_s12 + $0x18] sm:$0xff] %vm568_vm5, %v1285_v7 }
 0x15a   : > { %v1304_v39 = vadd.f32 %v1303_v24, %v1302_v63 }
 0x15b   : > { %v1056_v8 = vpop.permute.xlu0 %1055 }
 0x15c   : > { %v1062_v26 = vpop.permute.xlu1 %1061  ;;  %v1142_v32 = vsel %vm568_vm5, %v2171_v46, %v1056_v8 }
 0x15d   : > { %v1158_v50 = vsel %vm585_vm6, %v1142_v32, %v1105_v21  ;;  %v1145_v20 = vsel %vm568_vm5, %v2302_v59, %v1062_v26  ;;  %v1113_v57 = vpop.permute.xlu2 %1112  ;;  %v840_v21 = vpop.f32.mrf.mxu3 }
 0x15e   : > { %1647 = vmatmul.msk.f32.gmra.mxu2 %vm734_vm7, %v1158_v50 }
 0x163   : > { %v1111_v18 = vpop.permute.xlu0 %1110 }
 0x164   : > { %v492_v40 = vpop.permute.xlu1 %491  ;;  %v1161_v14 = vsel %vm585_vm6, %v1145_v20, %v1111_v18 }
 0x165   : > { %1650 = vmatmul.msk.f32.gmra.mxu3 %vm734_vm7, %v1161_v14  ;;  %v579_v46 = vsel %vm568_vm5, %v2186_v6, %v492_v40  ;;  %v543_v1 = vpop.permute.xlu2 %542  ;;  %v843_v61 = vpop.f32.mrf.mxu3 }
 0x168   : > { %v1246_v4 = vpop.f32.mrf.mxu2 }
 0x16a   : > { %v932_v33 = vpop.f32.mrf.mxu1 }
 0x16b   : > { %v816_v54 = vpop.f32.mrf.mxu0  ;;  %v541_v28 = vpop.permute.xlu0 %540 }
 0x16c   : > { %v933_v58 = vadd.f32 %v932_v33, %v816_v54  ;;  %v673_v29 = vpop.permute.xlu1 %672  ;;  %v596_v13 = vsel %vm585_vm6, %v579_v46, %v541_v28 }
 0x16d   : > { %v726_v59 = vsel %vm585_vm6, %v710_v52, %v673_v29  ;;  %1630 = vmatmul.msk.f32.gmra.mxu1 %vm734_vm7, %v596_v13  ;;  %v846_v15 = vpop.f32.mrf.mxu3 }
 0x16e   : > { %v1286_v19 = vadd.f32 %v1246_v4, %v933_v58  ;;  %1613 = vmatmul.msk.f32.gmra.mxu0 %vm734_vm7, %v726_v59 }
 0x170   : > { %v1305_v9 = vsel %vm568_vm5, %v1286_v19, 0.0  ;;  %1340 = vst.msk [vmem:[%s2412_s12 + $0x20] sm:$0xff] %vm568_vm5, %v1286_v19 }
 0x171   : > { %v1306_v6 = vadd.f32 %v1305_v9, %v1304_v39 }
 0x173   : > { %v1064_v10 = vpop.permute.xlu0 %1063 }
 0x174   : > { %v1107_v49 = vpop.permute.xlu1 %1106  ;;  %v1146_v41 = vsel %vm568_vm5, %v2283_v42, %v1064_v10  ;;  %v1115_v42 = vpop.permute.xlu2 %1114 }
 0x175   : > { %v1159_v60 = vsel %vm585_vm6, %v1143_v11, %v1107_v49  ;;  %v1162_v44 = vsel %vm585_vm6, %v1146_v41, %v1113_v57  ;;  %v849_v37 = vpop.f32.mrf.mxu3 }
 0x176   : > { %1648 = vmatmul.msk.f32.gmra.mxu2 %vm734_vm7, %v1159_v60  ;;  %1651 = vmatmul.msk.f32.gmra.mxu3 %vm734_vm7, %v1162_v44 }
 0x179   : > { %v1249_v25 = vpop.f32.mrf.mxu2 }
 0x17b   : > { %v494_v0 = vpop.permute.xlu0 %493  ;;  %v935_v53 = vpop.f32.mrf.mxu1 }
 0x17c   : > { %v627_v34 = vpop.permute.xlu1 %626  ;;  %v580_v45 = vsel %vm568_vm5, %v2237_v55, %v494_v0 }
 0x17d   : > { %v597_v62 = vsel %vm585_vm6, %v580_v45, %v543_v1  ;;  %v711_v16 = vsel %vm568_vm5, %v2148_v12, %v627_v34  ;;  %v956_v26 = vpop.f32.mrf.mxu3 }
 0x17e   : > { %1631 = vmatmul.msk.f32.gmra.mxu1 %vm734_vm7, %v597_v62  ;;  %v957_v46 = vadd.f32 %v956_v26, %v840_v21  ;;  %v1354_v26 = vld [vmem:[%s2412_s12 + $0x10] sm:$0xff] }
 0x182   : > { %v819_v17 = vpop.f32.mrf.mxu0 }
 0x183   : > { %v936_v47 = vadd.f32 %v935_v53, %v819_v17  ;;  %v675_v63 = vpop.permute.xlu0 %674 }
 0x184   : > { %v1066_v3 = vpop.permute.xlu1 %1065  ;;  %v727_v55 = vsel %vm585_vm6, %v711_v16, %v675_v63 }
 0x185   : > { %v1147_v35 = vsel %vm568_vm5, %v2326_v23, %v1066_v3  ;;  %v1287_v56 = vadd.f32 %v1249_v25, %v936_v47  ;;  %1614 = vmatmul.msk.f32.gmra.mxu0 %vm734_vm7, %v727_v55 }
 0x186   : > { %v1163_v27 = vsel %vm585_vm6, %v1147_v35, %v1115_v42 }
 0x187   : > { %1652 = vmatmul.msk.f32.gmra.mxu3 %vm734_vm7, %v1163_v27  ;;  %v1307_v38 = vsel %vm568_vm5, %v1287_v56, 0.0  ;;  %1341 = vst.msk [vmem:[%s2412_s12 + $0x28] sm:$0xff] %vm568_vm5, %v1287_v56 }
 0x188   : > { %v1308_v12 = vadd.f32 %v1307_v38, %v1306_v6 }
 0x190   : > { %v959_v50 = vpop.f32.mrf.mxu3 }
 0x191   : > { %v1252_v2 = vpop.f32.mrf.mxu2  ;;  %v960_v19 = vadd.f32 %v959_v50, %v843_v61  ;;  %v1355_v50 = vld [vmem:[%s2412_s12 + $0x18] sm:$0xff] }
 0x193   : > { %v938_v36 = vpop.f32.mrf.mxu1  ;;  %v822_v22 = vpop.f32.mrf.mxu0 }
 0x194   : > { %v939_v23 = vadd.f32 %v938_v36, %v822_v22 }
 0x196   : > { %v1288_v48 = vadd.f32 %v1252_v2, %v939_v23 }
 0x198   : > { %v1309_v51 = vsel %vm568_vm5, %v1288_v48, 0.0  ;;  %1342 = vst.msk [vmem:[%s2412_s12 + $0x30] sm:$0xff] %vm568_vm5, %v1288_v48 }
 0x199   : > { %v1310_v5 = vadd.f32 %v1309_v51, %v1308_v12 }
 0x1a1   : > { %v962_v43 = vpop.f32.mrf.mxu3 }
 0x1a2   : > { %v963_v60 = vadd.f32 %v962_v43, %v846_v15 }
 0x1a8   : > { %v1255_v24 = vpop.f32.mrf.mxu2 }
 0x1aa   : > { %v941_v7 = vpop.f32.mrf.mxu1 }
 0x1ab   : > { %v825_v30 = vpop.f32.mrf.mxu0 }
 0x1ac   : > { %v942_v31 = vadd.f32 %v941_v7, %v825_v30 }
 0x1ae   : > { %v1289_v39 = vadd.f32 %v1255_v24, %v942_v31  ;;  %v1352_v31 = vld [vmem:[%s2412_s12] sm:$0xff]  ;;  %v1353_v24 = vld [vmem:[%s2412_s12 + $0x8] sm:$0xff] }
 0x1b0   : > { %v1311_v8 = vsel %vm568_vm5, %v1289_v39, 0.0  ;;  %1343 = vst.msk [vmem:[%s2412_s12 + $0x38] sm:$0xff] %vm568_vm5, %v1289_v39 }
 0x1b1   : > { %v1312_v32 = vadd.f32 %v1311_v8, %v1310_v5 }
 0x1b9   : > { %v1258_v14 = vpop.f32.mrf.mxu2  ;;  %v965_v33 = vpop.f32.mrf.mxu3 }
 0x1ba   : > { %v966_v35 = vadd.f32 %v965_v33, %v849_v37  ;;  %v1357_v33 = vld [vmem:[%s2412_s12 + $0x28] sm:$0xff] }
 0x1bb   : > { %v944_v20 = vpop.f32.mrf.mxu1 }
 0x1c2   : > { %v828_v18 = vpop.f32.mrf.mxu0 }
 0x1c3   : > { %v945_v40 = vadd.f32 %v944_v20, %v828_v18 }
 0x1c5   : > { %v1290_v54 = vadd.f32 %v1258_v14, %v945_v40  ;;  %v1356_v40 = vld [vmem:[%s2412_s12 + $0x20] sm:$0xff] }
 0x1c7   : > { %1344 = vst.msk [vmem:[%s2412_s12 + $0x40] sm:$0xff] %vm568_vm5, %v1290_v54  ;;  %v1313_v0 = vsel %vm568_vm5, %v1290_v54, 0.0 }
 0x1c8   : > { %v1314_v45 = vadd.f32 %v1313_v0, %v1312_v32 }
 0x1d0   : > { %v1261_v59 = vpop.f32.mrf.mxu2 }
 0x1d1   : > { %v1270_v52 = vpop.f32.mrf.mxu3 }
 0x1d2   : > { %v1294_v58 = vadd.f32 %v1270_v52, %v957_v46 }
 0x1d3   : > { %v947_v28 = vpop.f32.mrf.mxu1  ;;  %v831_v29 = vpop.f32.mrf.mxu0 }
 0x1d4   : > { %1348 = vst.msk [vmem:[%s2412_s12 + $0x60] sm:$0xff] %vm568_vm5, %v1294_v58  ;;  %v948_v4 = vadd.f32 %v947_v28, %v831_v29  ;;  %v1321_v56 = vsel %vm568_vm5, %v1294_v58, 0.0  ;;  %v1358_v29 = vld [vmem:[%s2412_s12 + $0x30] sm:$0xff] }
 0x1d6   : > { %v1291_v13 = vadd.f32 %v1261_v59, %v948_v4 }
 0x1d8   : > { %1345 = vst.msk [vmem:[%s2412_s12 + $0x48] sm:$0xff] %vm568_vm5, %v1291_v13  ;;  %v1315_v34 = vsel %vm568_vm5, %v1291_v13, 0.0 }
 0x1d9   : > { %v1316_v16 = vadd.f32 %v1315_v34, %v1314_v45 }
 0x1df   : > { %v1361_v0 = vld [vmem:[%s2412_s12 + $0x48] sm:$0xff] }
 0x1e1   : > { %v1264_v49 = vpop.f32.mrf.mxu2 }
 0x1e8   : > { %v1273_v57 = vpop.f32.mrf.mxu3 }
 0x1e9   : > { %v1295_v9 = vadd.f32 %v1273_v57, %v960_v19  ;;  %v1359_v57 = vld [vmem:[%s2412_s12 + $0x38] sm:$0xff] }
 0x1ea   : > { %v950_v11 = vpop.f32.mrf.mxu1 }
 0x1eb   : > { %v834_v6 = vpop.f32.mrf.mxu0  ;;  %1349 = vst.msk [vmem:[%s2412_s12 + $0x68] sm:$0xff] %vm568_vm5, %v1295_v9  ;;  %v1323_v21 = vsel %vm568_vm5, %v1295_v9, 0.0 }
 0x1ec   : > { %v951_v10 = vadd.f32 %v950_v11, %v834_v6 }
 0x1ee   : > { %v1292_v41 = vadd.f32 %v1264_v49, %v951_v10  ;;  %v1360_v49 = vld [vmem:[%s2412_s12 + $0x40] sm:$0xff] }
 0x1f0   : > { %1346 = vst.msk [vmem:[%s2412_s12 + $0x50] sm:$0xff] %vm568_vm5, %v1292_v41  ;;  %v1317_v53 = vsel %vm568_vm5, %v1292_v41, 0.0 }
 0x1f1   : > { %v1318_v3 = vadd.f32 %v1317_v53, %v1316_v16 }
 0x1f7   : > { %v1362_v53 = vld [vmem:[%s2412_s12 + $0x50] sm:$0xff] }
 0x1f9   : > { %v1276_v44 = vpop.f32.mrf.mxu3  ;;  %v1267_v47 = vpop.f32.mrf.mxu2 }
 0x1fa   : > { %v1296_v1 = vadd.f32 %v1276_v44, %v963_v60 }
 0x1fb   : > { %v953_v62 = vpop.f32.mrf.mxu1 }
 0x1fc   : > { %1350 = vst.msk [vmem:[%s2412_s12 + $0x70] sm:$0xff] %vm568_vm5, %v1296_v1  ;;  %v1325_v22 = vsel %vm568_vm5, %v1296_v1, 0.0 }
 0x202   : > { %v837_v42 = vpop.f32.mrf.mxu0 }
 0x203   : > { %v954_v17 = vadd.f32 %v953_v62, %v837_v42 }
 0x205   : > { %v1293_v63 = vadd.f32 %v1267_v47, %v954_v17 }
 0x207   : > { %v1319_v25 = vsel %vm568_vm5, %v1293_v63, 0.0  ;;  %1347 = vst.msk [vmem:[%s2412_s12 + $0x58] sm:$0xff] %vm568_vm5, %v1293_v63 }
 0x208   : > { %v1320_v55 = vadd.f32 %v1319_v25, %v1318_v3 }
 0x20a   : > { %v1279_v27 = vpop.f32.mrf.mxu3  ;;  %v1322_v38 = vadd.f32 %v1321_v56, %v1320_v55 }
 0x20b   : > { %v1297_v12 = vadd.f32 %v1279_v27, %v966_v35  ;;  %v1364_v27 = vld [vmem:[%s2412_s12 + $0x60] sm:$0xff] }
 0x20c   : > { %v1324_v36 = vadd.f32 %v1323_v21, %v1322_v38 }
 0x20d   : > { %1351 = vst.msk [vmem:[%s2412_s12 + $0x78] sm:$0xff] %vm568_vm5, %v1297_v12  ;;  %v1327_v2 = vsel %vm568_vm5, %v1297_v12, 0.0 }
 0x20e   : > { %v1326_v23 = vadd.f32 %v1325_v22, %v1324_v36  ;;  %v1363_v3 = vld [vmem:[%s2412_s12 + $0x58] sm:$0xff]  ;;  %v1365_v22 = vld [vmem:[%s2412_s12 + $0x68] sm:$0xff] }
 0x210   : > { %v1328_v48 = vadd.f32 %v1327_v2, %v1326_v23 }
 0x212   : > { %v1329_v61 = vrot.slane %v1328_v48, 4 }
 0x214   : > { %v1330_v51 = vadd.f32 %v1329_v61, %v1328_v48 }
 0x216   : > { %v1331_v5 = vrot.slane %v1330_v51, 2 }
 0x218   : > { %v1332_v15 = vadd.f32 %v1331_v5, %v1330_v51  ;;  %v1366_v51 = vld [vmem:[%s2412_s12 + $0x70] sm:$0xff] }
 0x21a   : > { %v1333_v37 = vrot.slane %v1332_v15, 1 }
 0x21c   : > { %v1334_v30 = vadd.f32 %v1333_v37, %v1332_v15 }
 0x21e   : > { %v2542_v7 = vmul.f32 0.0078125, %v1334_v30 }
 0x220   : > { %v1368_v39 = vsub.f32 %v1352_v31, %v2542_v7  ;;  %v1369_v8 = vsub.f32 %v1353_v24, %v2542_v7  ;;  %v1370_v32 = vsub.f32 %v1354_v26, %v2542_v7  ;;  %v1371_v43 = vsub.f32 %v1355_v50, %v2542_v7  ;;  %v1367_v31 = vld [vmem:[%s2412_s12 + $0x78] sm:$0xff] }
 0x221   : > { %v1372_v14 = vsub.f32 %v1356_v40, %v2542_v7  ;;  %v1373_v46 = vsub.f32 %v1357_v33, %v2542_v7  ;;  %v1374_v59 = vsub.f32 %v1358_v29, %v2542_v7  ;;  %v1375_v6 = vsub.f32 %v1359_v57, %v2542_v7 }
 0x222   : > { %v1384_v20 = vmul.f32 %v1368_v39, %v1368_v39  ;;  %v1385_v18 = vmul.f32 %v1369_v8, %v1369_v8  ;;  %v1386_v54 = vmul.f32 %v1370_v32, %v1370_v32  ;;  %v1387_v52 = vmul.f32 %v1371_v43, %v1371_v43 }
 0x223   : > { %v1388_v13 = vmul.f32 %v1372_v14, %v1372_v14  ;;  %v1389_v11 = vmul.f32 %v1373_v46, %v1373_v46  ;;  %v1376_v60 = vsub.f32 %v1360_v49, %v2542_v7  ;;  %v1390_v44 = vmul.f32 %v1374_v59, %v1374_v59 }
 0x224   : > { %v1400_v58 = vsel %vm568_vm5, %v1384_v20, 0.0  ;;  %v1401_v28 = vsel %vm568_vm5, %v1385_v18, 0.0  ;;  %v1403_v19 = vsel %vm568_vm5, %v1386_v54, 0.0  ;;  %v1405_v10 = vsel %vm568_vm5, %v1387_v52, 0.0 }
 0x225   : > { %v1402_v4 = vadd.f32 %v1401_v28, %v1400_v58  ;;  %v1407_v1 = vsel %vm568_vm5, %v1388_v13, 0.0  ;;  %v1377_v45 = vsub.f32 %v1361_v0, %v2542_v7  ;;  %v1391_v62 = vmul.f32 %v1375_v6, %v1375_v6 }
 0x226   : > { %v1409_v42 = vsel %vm568_vm5, %v1389_v11, 0.0  ;;  %v1378_v16 = vsub.f32 %v1362_v53, %v2542_v7  ;;  %v1392_v47 = vmul.f32 %v1376_v60, %v1376_v60  ;;  %v1411_v63 = vsel %vm568_vm5, %v1390_v44, 0.0 }
 0x227   : > { %v1404_v9 = vadd.f32 %v1403_v19, %v1402_v4  ;;  %v1379_v35 = vsub.f32 %v1363_v3, %v2542_v7  ;;  %v1393_v55 = vmul.f32 %v1377_v45, %v1377_v45  ;;  %v1413_v56 = vsel %vm568_vm5, %v1391_v62, 0.0 }
 0x228   : > { %v1380_v12 = vsub.f32 %v1364_v27, %v2542_v7  ;;  %v1394_v21 = vmul.f32 %v1378_v16, %v1378_v16  ;;  %v1415_v36 = vsel %vm568_vm5, %v1392_v47, 0.0  ;;  %v1381_v2 = vsub.f32 %v1365_v22, %v2542_v7 }
 0x229   : > { %v1406_v41 = vadd.f32 %v1405_v10, %v1404_v9  ;;  %v1395_v48 = vmul.f32 %v1379_v35, %v1379_v35  ;;  %v1417_v61 = vsel %vm568_vm5, %v1393_v55, 0.0  ;;  %v1382_v15 = vsub.f32 %v1366_v51, %v2542_v7 }
 0x22a   : > { %v1396_v37 = vmul.f32 %v1380_v12, %v1380_v12  ;;  %v1419_v30 = vsel %vm568_vm5, %v1394_v21, 0.0  ;;  %v1383_v39 = vsub.f32 %v1367_v31, %v2542_v7  ;;  %v1397_v8 = vmul.f32 %v1381_v2, %v1381_v2 }
 0x22b   : > { %v1408_v34 = vadd.f32 %v1407_v1, %v1406_v41  ;;  %v1421_v26 = vsel %vm568_vm5, %v1395_v48, 0.0  ;;  %v1398_v50 = vmul.f32 %v1382_v15, %v1382_v15 }
 0x22c   : > { %v1423_v43 = vsel %vm568_vm5, %v1396_v37, 0.0  ;;  %v1399_v18 = vmul.f32 %v1383_v39, %v1383_v39  ;;  %v1425_v40 = vsel %vm568_vm5, %v1397_v8, 0.0 }
 0x22d   : > { %v1410_v17 = vadd.f32 %v1409_v42, %v1408_v34  ;;  %v1427_v54 = vsel %vm568_vm5, %v1398_v50, 0.0 }
 0x22e   : > { %v1429_v46 = vsel %vm568_vm5, %v1399_v18, 0.0 }
 0x22f   : > { %v1412_v25 = vadd.f32 %v1411_v63, %v1410_v17 }
 0x231   : > { %v1414_v38 = vadd.f32 %v1413_v56, %v1412_v25 }
 0x233   : > { %v1416_v23 = vadd.f32 %v1415_v36, %v1414_v38 }
 0x235   : > { %v1418_v5 = vadd.f32 %v1417_v61, %v1416_v23 }
 0x237   : > { %v1420_v24 = vadd.f32 %v1419_v30, %v1418_v5 }
 0x239   : > { %v1422_v32 = vadd.f32 %v1421_v26, %v1420_v24 }
 0x23b   : > { %v1424_v20 = vadd.f32 %v1423_v43, %v1422_v32 }
 0x23d   : > { %v1426_v14 = vadd.f32 %v1425_v40, %v1424_v20 }
 0x23f   : > { %v1428_v33 = vadd.f32 %v1427_v54, %v1426_v14 }
 0x241   : > { %v1430_v52 = vadd.f32 %v1429_v46, %v1428_v33 }
 0x243   : > { %v1431_v58 = vrot.slane %v1430_v52, 4 }
 0x245   : > { %v1432_v28 = vadd.f32 %v1431_v58, %v1430_v52 }
 0x247   : > { %v1433_v29 = vrot.slane %v1432_v28, 2 }
 0x249   : > { %v1434_v4 = vadd.f32 %v1433_v29, %v1432_v28 }
 0x24b   : > { %v1435_v59 = vrot.slane %v1434_v4, 1 }
 0x24d   : > { %v1436_v13 = vadd.f32 %v1435_v59, %v1434_v4 }
 0x24f   : > { %v1438_v19 = vsel %vm404_vm1, %v2542_v7, %v1436_v13 }
 0x250   : > { %1440 = vst.msk [vmem:[%s270_s15] sm:$0x3] %vm1439_vm8, %v1438_v19 }
 0x251 PF: > { %s16_s22 = sadd.s32 1, %s1745_s22   ;;  %s2625_s18 = smov %s1737_s20 }
 0x252   : > { %p13_p12 = scmp.ge.s32.totalorder %s16_s22, 6   ;;  %s2626_s19 = smov %s1741_s21 }
 0x253   : > { %s2627_s20 = smov %s2630_s23  ;;  %s2628_s21 = smov %s2634_s24 }
 0x254   :  { %15 = sbr.rel (!%p13_p12) target bundleno = 3 (0x3), region = 81 }

</bundles_post_ra>
